<compile_context>
chip_gen: v6e
topology: v6e:2x2x1
jax: 0.10.0
libtpu: 0.0.40
codegen_flags: <defaults>
</compile_context>

<pallas_src>
import numpy as np
import jax
import jax.numpy as jnp
from jax.experimental import pallas as pl
from jax.experimental.pallas import tpu as pltpu

OC1P = 8               # conv1 out-channels padded 6 -> 8 (lane group of pooled1)
N1 = 14 * OC1P         # pooled1 lane width: col*OC1P + channel  (= 112)
N2 = 5 * 16            # pooled2 lane width: col*16   + channel  (= 80)
LANE = 128             # fc-head lane width (logits padded 10 -> 128)
_VMEM_LIMIT = 32 * 1024 * 1024   # safe on v5e/v6e (128 MiB) and v7x (64 MiB)


# ---------------------------------------------------------------------------
# The fused per-image kernel
# ---------------------------------------------------------------------------

def _lenet_kernel(x_ref, t1_ref, b1_ref, t2_ref, b2_ref,
                  f1_ref, fb1_ref, f2_ref, fb2_ref, f3_ref, fb3_ref, o_ref):
    """Whole Net forward for ONE image (one grid step).  All intermediates stay
    in VMEM/vregs; the only HBM write is the (1, 128) padded logits row."""
    f32 = jnp.float32

    # ---- stage 1: conv1 (5x5, 3->6) + bias + ReLU + 2x2 maxpool ----------
    # x[t, u, w*3+c] holds input row y = 4u+t.  t1[i, q] maps one input row to
    # conv outputs at columns 2s+q (lane s*OC1P+oc) for kernel row i, so a
    # pooled row is max over 4 candidates (2 conv rows x 2 column parities).
    x = x_ref[0]                                          # (4, 8, 96) bf16
    bias1 = b1_ref[...]                                   # (1, N1) f32
    pooled1 = []                                          # pooled rows, by row parity
    for par in range(2):                                  # pooled-row parity
        cand = None
        for t in (2 * par, 2 * par + 1):                  # conv row in the 2x2 window
            for q in range(2):                            # conv column parity
                acc = None
                for i in range(5):                        # kernel row
                    k = t + i
                    lhs = x[k % 4, (k // 4):(k // 4) + 7, :]            # (7, 96)
                    d = jnp.dot(lhs, t1_ref[i, q], preferred_element_type=f32)
                    acc = d if acc is None else acc + d                 # (7, N1)
                cand = acc if cand is None else jnp.maximum(cand, acc)
        pooled1.append(jnp.maximum(cand + bias1, 0.0).astype(jnp.bfloat16))

    # ---- stage 2: conv2 (5x5, 6->16) + bias + ReLU + 2x2 maxpool ---------
    bias2 = b2_ref[...]                                   # (1, N2) f32
    cand = None
    for dy in range(2):                                   # conv row in the 2x2 window
        for q in range(2):                                # conv column parity
            acc = None
            for i in range(5):                            # kernel row
                k = dy + i
                lhs = pooled1[k % 2][(k // 2):(k // 2) + 5, :]          # (5, N1)
                d = jnp.dot(lhs, t2_ref[i, q], preferred_element_type=f32)
                acc = d if acc is None else acc + d                     # (5, N2)
            cand = acc if cand is None else jnp.maximum(cand, acc)
    pooled2 = jnp.maximum(cand + bias2, 0.0).astype(jnp.bfloat16)       # (5, N2)

    # ---- fc1 + ReLU + fc2 + ReLU + fc3 (flatten folded into f1 packing) --
    h = None
    for r in range(5):
        d = jnp.dot(pooled2[r:r + 1, :], f1_ref[r], preferred_element_type=f32)
        h = d if h is None else h + d                                   # (1, 128)
    h = jnp.maximum(h + fb1_ref[...], 0.0).astype(jnp.bfloat16)
    h = jnp.dot(h, f2_ref[...], preferred_element_type=f32)
    h = jnp.maximum(h + fb2_ref[...], 0.0).astype(jnp.bfloat16)
    logits = jnp.dot(h, f3_ref[...], preferred_element_type=f32) + fb3_ref[...]
    o_ref[0] = logits                                                   # (1, 128)


# ---------------------------------------------------------------------------
# Forward pass (matches Net.forward semantics)
# ---------------------------------------------------------------------------

def net_forward(pp, x_nchw):
    B, C, H, W = x_nchw.shape
    assert (C, H, W) == (3, 32, 32)
    # Tiny input repack (12 KB/image): NCHW -> rows y, lanes w*3+c, then split
    # rows by (y mod 4) so the kernel only needs contiguous row slices.
    # TODO(synk): fold this NCHW->row-lane repack into the kernel loads if the
    # input relayout ever shows up in profiles (negligible XLA glue today).
    x = jnp.transpose(x_nchw, (0, 2, 3, 1)).reshape(B, 32, 96)
    x4 = jnp.transpose(x.reshape(B, 8, 4, 96), (0, 2, 1, 3)).astype(jnp.bfloat16)

    flops = B * 2 * (40 * 7 * 96 * N1 + 20 * 5 * N1 * N2
                     + 5 * N2 * LANE + 2 * LANE * LANE)
    weight_bytes = sum(int(v.size) * v.dtype.itemsize for v in pp.values())
    bytes_accessed = int(x4.size) * x4.dtype.itemsize + weight_bytes + B * LANE * 4

    out = pl.pallas_call(
        _lenet_kernel,
        out_shape=jax.ShapeDtypeStruct((B, 1, LANE), jnp.float32),
        grid=(B,),
        in_specs=[
            pl.BlockSpec((1, 4, 8, 96), lambda b: (b, 0, 0, 0)),      # image
            pl.BlockSpec((5, 2, 96, N1), lambda b: (0, 0, 0, 0)),     # conv1 Toeplitz
            pl.BlockSpec((1, N1), lambda b: (0, 0)),                  # conv1 bias row
            pl.BlockSpec((5, 2, N1, N2), lambda b: (0, 0, 0, 0)),     # conv2 Toeplitz
            pl.BlockSpec((1, N2), lambda b: (0, 0)),                  # conv2 bias row
            pl.BlockSpec((5, N2, LANE), lambda b: (0, 0, 0)),         # fc1 row blocks
            pl.BlockSpec((1, LANE), lambda b: (0, 0)),                # fc1 bias
            pl.BlockSpec((LANE, LANE), lambda b: (0, 0)),             # fc2 weight
            pl.BlockSpec((1, LANE), lambda b: (0, 0)),                # fc2 bias
            pl.BlockSpec((LANE, LANE), lambda b: (0, 0)),             # fc3 weight
            pl.BlockSpec((1, LANE), lambda b: (0, 0)),                # fc3 bias
        ],
        out_specs=pl.BlockSpec((1, 1, LANE), lambda b: (b, 0, 0)),
        compiler_params=pltpu.CompilerParams(
            dimension_semantics=("parallel",),
            vmem_limit_bytes=_VMEM_LIMIT),
        cost_estimate=pl.CostEstimate(flops=flops, transcendentals=0,
                                      bytes_accessed=bytes_accessed),
    )(x4, pp["t1"], pp["b1"], pp["t2"], pp["b2"],
      pp["f1"], pp["fb1"], pp["f2"], pp["fb2"], pp["f3"], pp["fb3"])
    return out[:, 0, :10]


# ---------------------------------------------------------------------------
# Parameters: PyTorch-shaped init + one-time repack to kernel layouts
# ---------------------------------------------------------------------------

def init_params(key):
    """Deterministic init mirroring nn.Conv2d / nn.Linear default shapes."""
    def uinit(k, shape, fan_in):
        bound = 1.0 / jnp.sqrt(jnp.float32(fan_in))
        return jax.random.uniform(k, shape, jnp.float32, -bound, bound)

    ks = jax.random.split(key, 10)
    return {
        "conv1_w": uinit(ks[0], (6, 3, 5, 5), 3 * 5 * 5),
        "conv1_b": uinit(ks[1], (6,), 3 * 5 * 5),
        "conv2_w": uinit(ks[2], (16, 6, 5, 5), 6 * 5 * 5),
        "conv2_b": uinit(ks[3], (16,), 6 * 5 * 5),
        "fc1_w": uinit(ks[4], (120, 400), 400),
        "fc1_b": uinit(ks[5], (120,), 400),
        "fc2_w": uinit(ks[6], (84, 120), 120),
        "fc2_b": uinit(ks[7], (84,), 120),
        "fc3_w": uinit(ks[8], (10, 84), 84),
        "fc3_b": uinit(ks[9], (10,), 84),
    }


def prepare_params(p):
    """One-time host-side repack (init-time, not per forward):
       * conv weights -> block-Toeplitz bf16 matrices over the (col, ch) lanes
         with column parity split (so 2x2 pooling is an elementwise max),
       * fc1 -> 5 per-pooled-row (80, 128) blocks with the PyTorch NCHW flatten
         permutation baked in, fc2/fc3 transposed and zero-padded to 128 lanes,
       * biases tiled/padded to the matching lane layouts (f32)."""
    w1 = np.asarray(p["conv1_w"], np.float32)   # (6, 3, 5, 5)
    b1 = np.asarray(p["conv1_b"], np.float32)
    w2 = np.asarray(p["conv2_w"], np.float32)   # (16, 6, 5, 5)
    b2 = np.asarray(p["conv2_b"], np.float32)
    f1 = np.asarray(p["fc1_w"], np.float32)     # (120, 400)
    f2 = np.asarray(p["fc2_w"], np.float32)     # (84, 120)
    f3 = np.asarray(p["fc3_w"], np.float32)     # (10, 84)

    # conv1: t1[i, q, w*3+c, s*OC1P+oc] = w1[oc, c, i, w - (2s+q)]
    t1 = np.zeros((5, 2, 32 * 3, N1), np.float32)
    for i in range(5):
        for q in range(2):
            for j in range(5):
                for s in range(14):
                    w = 2 * s + q + j                       # input column (< 32)
                    t1[i, q, w * 3:w * 3 + 3, s * OC1P:s * OC1P + 6] = w1[:, :, i, j].T
    b1row = np.zeros((1, N1), np.float32)
    for s in range(14):
        b1row[0, s * OC1P:s * OC1P + 6] = b1

    # conv2: t2[i, q, w*OC1P+c, s*16+oc] = w2[oc, c, i, w - (2s+q)]
    t2 = np.zeros((5, 2, N1, N2), np.float32)
    for i in range(5):
        for q in range(2):
            for j in range(5):
                for s in range(5):
                    w = 2 * s + q + j                       # pooled1 column (< 14)
                    t2[i, q, w * OC1P:w * OC1P + 6, s * 16:s * 16 + 16] = w2[:, :, i, j].T
    b2row = np.zeros((1, N2), np.float32)
    for s in range(5):
        b2row[0, s * 16:s * 16 + 16] = b2

    # fc1 split into 5 per-pooled-row blocks; columns permuted from PyTorch's
    # NCHW flatten (oc*25 + r*5 + s) to our (s*16 + oc) lane order.
    wf1 = np.zeros((5, N2, LANE), np.float32)
    for r in range(5):
        for s in range(5):
            for oc in range(16):
                wf1[r, s * 16 + oc, :120] = f1[:, oc * 25 + r * 5 + s]
    wf2 = np.zeros((LANE, LANE), np.float32)
    wf2[:120, :84] = f2.T
    wf3 = np.zeros((LANE, LANE), np.float32)
    wf3[:84, :10] = f3.T
    fb1 = np.zeros((1, LANE), np.float32); fb1[0, :120] = np.asarray(p["fc1_b"])
    fb2 = np.zeros((1, LANE), np.float32); fb2[0, :84] = np.asarray(p["fc2_b"])
    fb3 = np.zeros((1, LANE), np.float32); fb3[0, :10] = np.asarray(p["fc3_b"])

    bf = lambda a: jnp.asarray(a, jnp.bfloat16)
    fp = lambda a: jnp.asarray(a, jnp.float32)
    return {"t1": bf(t1), "b1": fp(b1row), "t2": bf(t2), "b2": fp(b2row),
            "f1": bf(wf1), "fb1": fp(fb1), "f2": bf(wf2), "fb2": fp(fb2),
            "f3": bf(wf3), "fb3": fp(fb3)}


# ---------------------------------------------------------------------------
# Pure-JAX (XLA) reference for correctness checking
# ---------------------------------------------------------------------------

def net_reference(params, x_nchw):
    hi = jax.lax.Precision.HIGHEST

    def conv(x, w, b):
        y = jax.lax.conv_general_dilated(
            x, w, (1, 1), "VALID",
            dimension_numbers=("NCHW", "OIHW", "NCHW"), precision=hi)
        return jax.nn.relu(y + b[None, :, None, None])

    def pool(x):
        return jax.lax.reduce_window(x, -jnp.inf, jax.lax.max,
                                     (1, 1, 2, 2), (1, 1, 2, 2), "VALID")

    x = pool(conv(x_nchw, params["conv1_w"], params["conv1_b"]))
    x = pool(conv(x, params["conv2_w"], params["conv2_b"]))
    x = x.reshape(x.shape[0], -1)
    x = jax.nn.relu(jnp.dot(x, params["fc1_w"].T, precision=hi) + params["fc1_b"])
    x = jax.nn.relu(jnp.dot(x, params["fc2_w"].T, precision=hi) + params["fc2_b"])
    return jnp.dot(x, params["fc3_w"].T, precision=hi) + params["fc3_b"]


if __name__ == "__main__":
    key = jax.random.PRNGKey(0)
    k_param, k_x = jax.random.split(key)
    params = init_params(k_param)
    prepared = prepare_params(params)
    # The module's flatten (16*5*5) implies 32x32 spatial input; batch = 2 so
    # the "parallel" grid has 2 steps (both v7x TensorCores get work).
    x = jax.random.normal(k_x, (2, 3, 32, 32), dtype=jnp.float32)

    out = jax.block_until_ready(jax.jit(net_forward)(prepared, x))
    assert out.shape == (2, 10), out.shape

    # Correctness vs the f32 XLA reference.  Tolerance sized for seven cascaded
    # bf16-operand matmul stages with f32 accumulation (~5% of logit scale).
    ref = jax.block_until_ready(jax.jit(net_reference)(params, x))
    err = float(jnp.max(jnp.abs(out - ref)))
    scale = float(jnp.max(jnp.abs(ref)))
    assert err <= 0.05 * scale + 2e-3, (err, scale)
    print("KERNEL_OK")
</pallas_src>

<mosaic_0001>
module attributes {stable_mosaic.version = 11 : i64} {
  func.func @_lenet_kernel(%arg0: i32, %arg1: memref<1x4x8x96xbf16, #tpu.memory_space<vmem>>, %arg2: memref<5x2x96x112xbf16, #tpu.memory_space<vmem>>, %arg3: memref<1x112xf32, #tpu.memory_space<vmem>>, %arg4: memref<5x2x112x80xbf16, #tpu.memory_space<vmem>>, %arg5: memref<1x80xf32, #tpu.memory_space<vmem>>, %arg6: memref<5x80x128xbf16, #tpu.memory_space<vmem>>, %arg7: memref<1x128xf32, #tpu.memory_space<vmem>>, %arg8: memref<128x128xbf16, #tpu.memory_space<vmem>>, %arg9: memref<1x128xf32, #tpu.memory_space<vmem>>, %arg10: memref<128x128xbf16, #tpu.memory_space<vmem>>, %arg11: memref<1x128xf32, #tpu.memory_space<vmem>>, %arg12: memref<1x1x128xf32, #tpu.memory_space<vmem>>) attributes {dimension_semantics = [#tpu.dimension_semantics<parallel>], iteration_bounds = array<i64: 2>, scalar_prefetch = 0 : i64, scratch_operands = 0 : i64, tpu.core_type = #tpu.core_type<tc>, window_params = [{transform_indices = @transform_0, window_bounds = array<i64: 1, 4, 8, 96>}, {pipeline_mode = #tpu.pipeline_mode<synchronous>, transform_indices = @transform_1, window_bounds = array<i64: 5, 2, 96, 112>}, {pipeline_mode = #tpu.pipeline_mode<synchronous>, transform_indices = @transform_2, window_bounds = array<i64: 1, 112>}, {pipeline_mode = #tpu.pipeline_mode<synchronous>, transform_indices = @transform_3, window_bounds = array<i64: 5, 2, 112, 80>}, {pipeline_mode = #tpu.pipeline_mode<synchronous>, transform_indices = @transform_4, window_bounds = array<i64: 1, 80>}, {pipeline_mode = #tpu.pipeline_mode<synchronous>, transform_indices = @transform_5, window_bounds = array<i64: 5, 80, 128>}, {pipeline_mode = #tpu.pipeline_mode<synchronous>, transform_indices = @transform_6, window_bounds = array<i64: 1, 128>}, {pipeline_mode = #tpu.pipeline_mode<synchronous>, transform_indices = @transform_7, window_bounds = array<i64: 128, 128>}, {pipeline_mode = #tpu.pipeline_mode<synchronous>, transform_indices = @transform_8, window_bounds = array<i64: 1, 128>}, {pipeline_mode = #tpu.pipeline_mode<synchronous>, transform_indices = @transform_9, window_bounds = array<i64: 128, 128>}, {pipeline_mode = #tpu.pipeline_mode<synchronous>, transform_indices = @transform_10, window_bounds = array<i64: 1, 128>}, {transform_indices = @transform_11, window_bounds = array<i64: 1, 1, 128>}]} {
    %c0 = arith.constant 0 : index
    %c0_0 = arith.constant 0 : index
    %c0_1 = arith.constant 0 : index
    %c0_2 = arith.constant 0 : index
    %0 = vector.load %arg1[%c0, %c0_0, %c0_1, %c0_2] : memref<1x4x8x96xbf16, #tpu.memory_space<vmem>>, vector<1x4x8x96xbf16>
    %1 = vector.shape_cast %0 : vector<1x4x8x96xbf16> to vector<4x8x96xbf16>
    %c0_3 = arith.constant 0 : index
    %c0_4 = arith.constant 0 : index
    %2 = vector.load %arg3[%c0_3, %c0_4] : memref<1x112xf32, #tpu.memory_space<vmem>>, vector<1x112xf32>
    %3 = vector.extract_strided_slice %1 {offsets = [0, 0, 0], sizes = [1, 7, 96], strides = [1, 1, 1]} : vector<4x8x96xbf16> to vector<1x7x96xbf16>
    %4 = vector.shape_cast %3 : vector<1x7x96xbf16> to vector<7x96xbf16>
    %c0_5 = arith.constant 0 : index
    %c0_6 = arith.constant 0 : index
    %c0_7 = arith.constant 0 : index
    %c0_8 = arith.constant 0 : index
    %5 = vector.load %arg2[%c0_5, %c0_6, %c0_7, %c0_8] : memref<5x2x96x112xbf16, #tpu.memory_space<vmem>>, vector<1x1x96x112xbf16>
    %6 = vector.shape_cast %5 : vector<1x1x96x112xbf16> to vector<96x112xbf16>
    %cst = arith.constant dense<0.000000e+00> : vector<7x112xf32>
    %7 = tpu.matmul %4, %6, %cst {dimension_numbers = #tpu.dot_dimension_numbers<[1], [0], [0], [1], [0, 0, 1, 1], [], []>} : vector<7x96xbf16>, vector<96x112xbf16>, vector<7x112xf32> -> vector<7x112xf32>
    %8 = vector.extract_strided_slice %1 {offsets = [1, 0, 0], sizes = [1, 7, 96], strides = [1, 1, 1]} : vector<4x8x96xbf16> to vector<1x7x96xbf16>
    %9 = vector.shape_cast %8 : vector<1x7x96xbf16> to vector<7x96xbf16>
    %c1 = arith.constant 1 : index
    %c0_9 = arith.constant 0 : index
    %c0_10 = arith.constant 0 : index
    %c0_11 = arith.constant 0 : index
    %10 = vector.load %arg2[%c1, %c0_9, %c0_10, %c0_11] : memref<5x2x96x112xbf16, #tpu.memory_space<vmem>>, vector<1x1x96x112xbf16>
    %11 = vector.shape_cast %10 : vector<1x1x96x112xbf16> to vector<96x112xbf16>
    %cst_12 = arith.constant dense<0.000000e+00> : vector<7x112xf32>
    %12 = tpu.matmul %9, %11, %cst_12 {dimension_numbers = #tpu.dot_dimension_numbers<[1], [0], [0], [1], [0, 0, 1, 1], [], []>} : vector<7x96xbf16>, vector<96x112xbf16>, vector<7x112xf32> -> vector<7x112xf32>
    %13 = arith.addf %7, %12 : vector<7x112xf32>
    %14 = vector.extract_strided_slice %1 {offsets = [2, 0, 0], sizes = [1, 7, 96], strides = [1, 1, 1]} : vector<4x8x96xbf16> to vector<1x7x96xbf16>
    %15 = vector.shape_cast %14 : vector<1x7x96xbf16> to vector<7x96xbf16>
    %c2 = arith.constant 2 : index
    %c0_13 = arith.constant 0 : index
    %c0_14 = arith.constant 0 : index
    %c0_15 = arith.constant 0 : index
    %16 = vector.load %arg2[%c2, %c0_13, %c0_14, %c0_15] : memref<5x2x96x112xbf16, #tpu.memory_space<vmem>>, vector<1x1x96x112xbf16>
    %17 = vector.shape_cast %16 : vector<1x1x96x112xbf16> to vector<96x112xbf16>
    %cst_16 = arith.constant dense<0.000000e+00> : vector<7x112xf32>
    %18 = tpu.matmul %15, %17, %cst_16 {dimension_numbers = #tpu.dot_dimension_numbers<[1], [0], [0], [1], [0, 0, 1, 1], [], []>} : vector<7x96xbf16>, vector<96x112xbf16>, vector<7x112xf32> -> vector<7x112xf32>
    %19 = arith.addf %13, %18 : vector<7x112xf32>
    %20 = vector.extract_strided_slice %1 {offsets = [3, 0, 0], sizes = [1, 7, 96], strides = [1, 1, 1]} : vector<4x8x96xbf16> to vector<1x7x96xbf16>
    %21 = vector.shape_cast %20 : vector<1x7x96xbf16> to vector<7x96xbf16>
    %c3 = arith.constant 3 : index
    %c0_17 = arith.constant 0 : index
    %c0_18 = arith.constant 0 : index
    %c0_19 = arith.constant 0 : index
    %22 = vector.load %arg2[%c3, %c0_17, %c0_18, %c0_19] : memref<5x2x96x112xbf16, #tpu.memory_space<vmem>>, vector<1x1x96x112xbf16>
    %23 = vector.shape_cast %22 : vector<1x1x96x112xbf16> to vector<96x112xbf16>
    %cst_20 = arith.constant dense<0.000000e+00> : vector<7x112xf32>
    %24 = tpu.matmul %21, %23, %cst_20 {dimension_numbers = #tpu.dot_dimension_numbers<[1], [0], [0], [1], [0, 0, 1, 1], [], []>} : vector<7x96xbf16>, vector<96x112xbf16>, vector<7x112xf32> -> vector<7x112xf32>
    %25 = arith.addf %19, %24 : vector<7x112xf32>
    %26 = vector.extract_strided_slice %1 {offsets = [0, 1, 0], sizes = [1, 7, 96], strides = [1, 1, 1]} : vector<4x8x96xbf16> to vector<1x7x96xbf16>
    %27 = vector.shape_cast %26 : vector<1x7x96xbf16> to vector<7x96xbf16>
    %c4 = arith.constant 4 : index
    %c0_21 = arith.constant 0 : index
    %c0_22 = arith.constant 0 : index
    %c0_23 = arith.constant 0 : index
    %28 = vector.load %arg2[%c4, %c0_21, %c0_22, %c0_23] : memref<5x2x96x112xbf16, #tpu.memory_space<vmem>>, vector<1x1x96x112xbf16>
    %29 = vector.shape_cast %28 : vector<1x1x96x112xbf16> to vector<96x112xbf16>
    %cst_24 = arith.constant dense<0.000000e+00> : vector<7x112xf32>
    %30 = tpu.matmul %27, %29, %cst_24 {dimension_numbers = #tpu.dot_dimension_numbers<[1], [0], [0], [1], [0, 0, 1, 1], [], []>} : vector<7x96xbf16>, vector<96x112xbf16>, vector<7x112xf32> -> vector<7x112xf32>
    %31 = arith.addf %25, %30 : vector<7x112xf32>
    %32 = vector.extract_strided_slice %1 {offsets = [0, 0, 0], sizes = [1, 7, 96], strides = [1, 1, 1]} : vector<4x8x96xbf16> to vector<1x7x96xbf16>
    %33 = vector.shape_cast %32 : vector<1x7x96xbf16> to vector<7x96xbf16>
    %c0_25 = arith.constant 0 : index
    %c1_26 = arith.constant 1 : index
    %c0_27 = arith.constant 0 : index
    %c0_28 = arith.constant 0 : index
    %34 = vector.load %arg2[%c0_25, %c1_26, %c0_27, %c0_28] : memref<5x2x96x112xbf16, #tpu.memory_space<vmem>>, vector<1x1x96x112xbf16>
    %35 = vector.shape_cast %34 : vector<1x1x96x112xbf16> to vector<96x112xbf16>
    %cst_29 = arith.constant dense<0.000000e+00> : vector<7x112xf32>
    %36 = tpu.matmul %33, %35, %cst_29 {dimension_numbers = #tpu.dot_dimension_numbers<[1], [0], [0], [1], [0, 0, 1, 1], [], []>} : vector<7x96xbf16>, vector<96x112xbf16>, vector<7x112xf32> -> vector<7x112xf32>
    %37 = vector.extract_strided_slice %1 {offsets = [1, 0, 0], sizes = [1, 7, 96], strides = [1, 1, 1]} : vector<4x8x96xbf16> to vector<1x7x96xbf16>
    %38 = vector.shape_cast %37 : vector<1x7x96xbf16> to vector<7x96xbf16>
    %c1_30 = arith.constant 1 : index
    %c1_31 = arith.constant 1 : index
    %c0_32 = arith.constant 0 : index
    %c0_33 = arith.constant 0 : index
    %39 = vector.load %arg2[%c1_30, %c1_31, %c0_32, %c0_33] : memref<5x2x96x112xbf16, #tpu.memory_space<vmem>>, vector<1x1x96x112xbf16>
    %40 = vector.shape_cast %39 : vector<1x1x96x112xbf16> to vector<96x112xbf16>
    %cst_34 = arith.constant dense<0.000000e+00> : vector<7x112xf32>
    %41 = tpu.matmul %38, %40, %cst_34 {dimension_numbers = #tpu.dot_dimension_numbers<[1], [0], [0], [1], [0, 0, 1, 1], [], []>} : vector<7x96xbf16>, vector<96x112xbf16>, vector<7x112xf32> -> vector<7x112xf32>
    %42 = arith.addf %36, %41 : vector<7x112xf32>
    %43 = vector.extract_strided_slice %1 {offsets = [2, 0, 0], sizes = [1, 7, 96], strides = [1, 1, 1]} : vector<4x8x96xbf16> to vector<1x7x96xbf16>
    %44 = vector.shape_cast %43 : vector<1x7x96xbf16> to vector<7x96xbf16>
    %c2_35 = arith.constant 2 : index
    %c1_36 = arith.constant 1 : index
    %c0_37 = arith.constant 0 : index
    %c0_38 = arith.constant 0 : index
    %45 = vector.load %arg2[%c2_35, %c1_36, %c0_37, %c0_38] : memref<5x2x96x112xbf16, #tpu.memory_space<vmem>>, vector<1x1x96x112xbf16>
    %46 = vector.shape_cast %45 : vector<1x1x96x112xbf16> to vector<96x112xbf16>
    %cst_39 = arith.constant dense<0.000000e+00> : vector<7x112xf32>
    %47 = tpu.matmul %44, %46, %cst_39 {dimension_numbers = #tpu.dot_dimension_numbers<[1], [0], [0], [1], [0, 0, 1, 1], [], []>} : vector<7x96xbf16>, vector<96x112xbf16>, vector<7x112xf32> -> vector<7x112xf32>
    %48 = arith.addf %42, %47 : vector<7x112xf32>
    %49 = vector.extract_strided_slice %1 {offsets = [3, 0, 0], sizes = [1, 7, 96], strides = [1, 1, 1]} : vector<4x8x96xbf16> to vector<1x7x96xbf16>
    %50 = vector.shape_cast %49 : vector<1x7x96xbf16> to vector<7x96xbf16>
    %c3_40 = arith.constant 3 : index
    %c1_41 = arith.constant 1 : index
    %c0_42 = arith.constant 0 : index
    %c0_43 = arith.constant 0 : index
    %51 = vector.load %arg2[%c3_40, %c1_41, %c0_42, %c0_43] : memref<5x2x96x112xbf16, #tpu.memory_space<vmem>>, vector<1x1x96x112xbf16>
    %52 = vector.shape_cast %51 : vector<1x1x96x112xbf16> to vector<96x112xbf16>
    %cst_44 = arith.constant dense<0.000000e+00> : vector<7x112xf32>
    %53 = tpu.matmul %50, %52, %cst_44 {dimension_numbers = #tpu.dot_dimension_numbers<[1], [0], [0], [1], [0, 0, 1, 1], [], []>} : vector<7x96xbf16>, vector<96x112xbf16>, vector<7x112xf32> -> vector<7x112xf32>
    %54 = arith.addf %48, %53 : vector<7x112xf32>
    %55 = vector.extract_strided_slice %1 {offsets = [0, 1, 0], sizes = [1, 7, 96], strides = [1, 1, 1]} : vector<4x8x96xbf16> to vector<1x7x96xbf16>
    %56 = vector.shape_cast %55 : vector<1x7x96xbf16> to vector<7x96xbf16>
    %c4_45 = arith.constant 4 : index
    %c1_46 = arith.constant 1 : index
    %c0_47 = arith.constant 0 : index
    %c0_48 = arith.constant 0 : index
    %57 = vector.load %arg2[%c4_45, %c1_46, %c0_47, %c0_48] : memref<5x2x96x112xbf16, #tpu.memory_space<vmem>>, vector<1x1x96x112xbf16>
    %58 = vector.shape_cast %57 : vector<1x1x96x112xbf16> to vector<96x112xbf16>
    %cst_49 = arith.constant dense<0.000000e+00> : vector<7x112xf32>
    %59 = tpu.matmul %56, %58, %cst_49 {dimension_numbers = #tpu.dot_dimension_numbers<[1], [0], [0], [1], [0, 0, 1, 1], [], []>} : vector<7x96xbf16>, vector<96x112xbf16>, vector<7x112xf32> -> vector<7x112xf32>
    %60 = arith.addf %54, %59 : vector<7x112xf32>
    %61 = arith.maximumf %31, %60 : vector<7x112xf32>
    %62 = vector.extract_strided_slice %1 {offsets = [1, 0, 0], sizes = [1, 7, 96], strides = [1, 1, 1]} : vector<4x8x96xbf16> to vector<1x7x96xbf16>
    %63 = vector.shape_cast %62 : vector<1x7x96xbf16> to vector<7x96xbf16>
    %c0_50 = arith.constant 0 : index
    %c0_51 = arith.constant 0 : index
    %c0_52 = arith.constant 0 : index
    %c0_53 = arith.constant 0 : index
    %64 = vector.load %arg2[%c0_50, %c0_51, %c0_52, %c0_53] : memref<5x2x96x112xbf16, #tpu.memory_space<vmem>>, vector<1x1x96x112xbf16>
    %65 = vector.shape_cast %64 : vector<1x1x96x112xbf16> to vector<96x112xbf16>
    %cst_54 = arith.constant dense<0.000000e+00> : vector<7x112xf32>
    %66 = tpu.matmul %63, %65, %cst_54 {dimension_numbers = #tpu.dot_dimension_numbers<[1], [0], [0], [1], [0, 0, 1, 1], [], []>} : vector<7x96xbf16>, vector<96x112xbf16>, vector<7x112xf32> -> vector<7x112xf32>
    %67 = vector.extract_strided_slice %1 {offsets = [2, 0, 0], sizes = [1, 7, 96], strides = [1, 1, 1]} : vector<4x8x96xbf16> to vector<1x7x96xbf16>
    %68 = vector.shape_cast %67 : vector<1x7x96xbf16> to vector<7x96xbf16>
    %c1_55 = arith.constant 1 : index
    %c0_56 = arith.constant 0 : index
    %c0_57 = arith.constant 0 : index
    %c0_58 = arith.constant 0 : index
    %69 = vector.load %arg2[%c1_55, %c0_56, %c0_57, %c0_58] : memref<5x2x96x112xbf16, #tpu.memory_space<vmem>>, vector<1x1x96x112xbf16>
    %70 = vector.shape_cast %69 : vector<1x1x96x112xbf16> to vector<96x112xbf16>
    %cst_59 = arith.constant dense<0.000000e+00> : vector<7x112xf32>
    %71 = tpu.matmul %68, %70, %cst_59 {dimension_numbers = #tpu.dot_dimension_numbers<[1], [0], [0], [1], [0, 0, 1, 1], [], []>} : vector<7x96xbf16>, vector<96x112xbf16>, vector<7x112xf32> -> vector<7x112xf32>
    %72 = arith.addf %66, %71 : vector<7x112xf32>
    %73 = vector.extract_strided_slice %1 {offsets = [3, 0, 0], sizes = [1, 7, 96], strides = [1, 1, 1]} : vector<4x8x96xbf16> to vector<1x7x96xbf16>
    %74 = vector.shape_cast %73 : vector<1x7x96xbf16> to vector<7x96xbf16>
    %c2_60 = arith.constant 2 : index
    %c0_61 = arith.constant 0 : index
    %c0_62 = arith.constant 0 : index
    %c0_63 = arith.constant 0 : index
    %75 = vector.load %arg2[%c2_60, %c0_61, %c0_62, %c0_63] : memref<5x2x96x112xbf16, #tpu.memory_space<vmem>>, vector<1x1x96x112xbf16>
    %76 = vector.shape_cast %75 : vector<1x1x96x112xbf16> to vector<96x112xbf16>
    %cst_64 = arith.constant dense<0.000000e+00> : vector<7x112xf32>
    %77 = tpu.matmul %74, %76, %cst_64 {dimension_numbers = #tpu.dot_dimension_numbers<[1], [0], [0], [1], [0, 0, 1, 1], [], []>} : vector<7x96xbf16>, vector<96x112xbf16>, vector<7x112xf32> -> vector<7x112xf32>
    %78 = arith.addf %72, %77 : vector<7x112xf32>
    %79 = vector.extract_strided_slice %1 {offsets = [0, 1, 0], sizes = [1, 7, 96], strides = [1, 1, 1]} : vector<4x8x96xbf16> to vector<1x7x96xbf16>
    %80 = vector.shape_cast %79 : vector<1x7x96xbf16> to vector<7x96xbf16>
    %c3_65 = arith.constant 3 : index
    %c0_66 = arith.constant 0 : index
    %c0_67 = arith.constant 0 : index
    %c0_68 = arith.constant 0 : index
    %81 = vector.load %arg2[%c3_65, %c0_66, %c0_67, %c0_68] : memref<5x2x96x112xbf16, #tpu.memory_space<vmem>>, vector<1x1x96x112xbf16>
    %82 = vector.shape_cast %81 : vector<1x1x96x112xbf16> to vector<96x112xbf16>
    %cst_69 = arith.constant dense<0.000000e+00> : vector<7x112xf32>
    %83 = tpu.matmul %80, %82, %cst_69 {dimension_numbers = #tpu.dot_dimension_numbers<[1], [0], [0], [1], [0, 0, 1, 1], [], []>} : vector<7x96xbf16>, vector<96x112xbf16>, vector<7x112xf32> -> vector<7x112xf32>
    %84 = arith.addf %78, %83 : vector<7x112xf32>
    %85 = vector.extract_strided_slice %1 {offsets = [1, 1, 0], sizes = [1, 7, 96], strides = [1, 1, 1]} : vector<4x8x96xbf16> to vector<1x7x96xbf16>
    %86 = vector.shape_cast %85 : vector<1x7x96xbf16> to vector<7x96xbf16>
    %c4_70 = arith.constant 4 : index
    %c0_71 = arith.constant 0 : index
    %c0_72 = arith.constant 0 : index
    %c0_73 = arith.constant 0 : index
    %87 = vector.load %arg2[%c4_70, %c0_71, %c0_72, %c0_73] : memref<5x2x96x112xbf16, #tpu.memory_space<vmem>>, vector<1x1x96x112xbf16>
    %88 = vector.shape_cast %87 : vector<1x1x96x112xbf16> to vector<96x112xbf16>
    %cst_74 = arith.constant dense<0.000000e+00> : vector<7x112xf32>
    %89 = tpu.matmul %86, %88, %cst_74 {dimension_numbers = #tpu.dot_dimension_numbers<[1], [0], [0], [1], [0, 0, 1, 1], [], []>} : vector<7x96xbf16>, vector<96x112xbf16>, vector<7x112xf32> -> vector<7x112xf32>
    %90 = arith.addf %84, %89 : vector<7x112xf32>
    %91 = arith.maximumf %61, %90 : vector<7x112xf32>
    %92 = vector.extract_strided_slice %1 {offsets = [1, 0, 0], sizes = [1, 7, 96], strides = [1, 1, 1]} : vector<4x8x96xbf16> to vector<1x7x96xbf16>
    %93 = vector.shape_cast %92 : vector<1x7x96xbf16> to vector<7x96xbf16>
    %c0_75 = arith.constant 0 : index
    %c1_76 = arith.constant 1 : index
    %c0_77 = arith.constant 0 : index
    %c0_78 = arith.constant 0 : index
    %94 = vector.load %arg2[%c0_75, %c1_76, %c0_77, %c0_78] : memref<5x2x96x112xbf16, #tpu.memory_space<vmem>>, vector<1x1x96x112xbf16>
    %95 = vector.shape_cast %94 : vector<1x1x96x112xbf16> to vector<96x112xbf16>
    %cst_79 = arith.constant dense<0.000000e+00> : vector<7x112xf32>
    %96 = tpu.matmul %93, %95, %cst_79 {dimension_numbers = #tpu.dot_dimension_numbers<[1], [0], [0], [1], [0, 0, 1, 1], [], []>} : vector<7x96xbf16>, vector<96x112xbf16>, vector<7x112xf32> -> vector<7x112xf32>
    %97 = vector.extract_strided_slice %1 {offsets = [2, 0, 0], sizes = [1, 7, 96], strides = [1, 1, 1]} : vector<4x8x96xbf16> to vector<1x7x96xbf16>
    %98 = vector.shape_cast %97 : vector<1x7x96xbf16> to vector<7x96xbf16>
    %c1_80 = arith.constant 1 : index
    %c1_81 = arith.constant 1 : index
    %c0_82 = arith.constant 0 : index
    %c0_83 = arith.constant 0 : index
    %99 = vector.load %arg2[%c1_80, %c1_81, %c0_82, %c0_83] : memref<5x2x96x112xbf16, #tpu.memory_space<vmem>>, vector<1x1x96x112xbf16>
    %100 = vector.shape_cast %99 : vector<1x1x96x112xbf16> to vector<96x112xbf16>
    %cst_84 = arith.constant dense<0.000000e+00> : vector<7x112xf32>
    %101 = tpu.matmul %98, %100, %cst_84 {dimension_numbers = #tpu.dot_dimension_numbers<[1], [0], [0], [1], [0, 0, 1, 1], [], []>} : vector<7x96xbf16>, vector<96x112xbf16>, vector<7x112xf32> -> vector<7x112xf32>
    %102 = arith.addf %96, %101 : vector<7x112xf32>
    %103 = vector.extract_strided_slice %1 {offsets = [3, 0, 0], sizes = [1, 7, 96], strides = [1, 1, 1]} : vector<4x8x96xbf16> to vector<1x7x96xbf16>
    %104 = vector.shape_cast %103 : vector<1x7x96xbf16> to vector<7x96xbf16>
    %c2_85 = arith.constant 2 : index
    %c1_86 = arith.constant 1 : index
    %c0_87 = arith.constant 0 : index
    %c0_88 = arith.constant 0 : index
    %105 = vector.load %arg2[%c2_85, %c1_86, %c0_87, %c0_88] : memref<5x2x96x112xbf16, #tpu.memory_space<vmem>>, vector<1x1x96x112xbf16>
    %106 = vector.shape_cast %105 : vector<1x1x96x112xbf16> to vector<96x112xbf16>
    %cst_89 = arith.constant dense<0.000000e+00> : vector<7x112xf32>
    %107 = tpu.matmul %104, %106, %cst_89 {dimension_numbers = #tpu.dot_dimension_numbers<[1], [0], [0], [1], [0, 0, 1, 1], [], []>} : vector<7x96xbf16>, vector<96x112xbf16>, vector<7x112xf32> -> vector<7x112xf32>
    %108 = arith.addf %102, %107 : vector<7x112xf32>
    %109 = vector.extract_strided_slice %1 {offsets = [0, 1, 0], sizes = [1, 7, 96], strides = [1, 1, 1]} : vector<4x8x96xbf16> to vector<1x7x96xbf16>
    %110 = vector.shape_cast %109 : vector<1x7x96xbf16> to vector<7x96xbf16>
    %c3_90 = arith.constant 3 : index
    %c1_91 = arith.constant 1 : index
    %c0_92 = arith.constant 0 : index
    %c0_93 = arith.constant 0 : index
    %111 = vector.load %arg2[%c3_90, %c1_91, %c0_92, %c0_93] : memref<5x2x96x112xbf16, #tpu.memory_space<vmem>>, vector<1x1x96x112xbf16>
    %112 = vector.shape_cast %111 : vector<1x1x96x112xbf16> to vector<96x112xbf16>
    %cst_94 = arith.constant dense<0.000000e+00> : vector<7x112xf32>
    %113 = tpu.matmul %110, %112, %cst_94 {dimension_numbers = #tpu.dot_dimension_numbers<[1], [0], [0], [1], [0, 0, 1, 1], [], []>} : vector<7x96xbf16>, vector<96x112xbf16>, vector<7x112xf32> -> vector<7x112xf32>
    %114 = arith.addf %108, %113 : vector<7x112xf32>
    %115 = vector.extract_strided_slice %1 {offsets = [1, 1, 0], sizes = [1, 7, 96], strides = [1, 1, 1]} : vector<4x8x96xbf16> to vector<1x7x96xbf16>
    %116 = vector.shape_cast %115 : vector<1x7x96xbf16> to vector<7x96xbf16>
    %c4_95 = arith.constant 4 : index
    %c1_96 = arith.constant 1 : index
    %c0_97 = arith.constant 0 : index
    %c0_98 = arith.constant 0 : index
    %117 = vector.load %arg2[%c4_95, %c1_96, %c0_97, %c0_98] : memref<5x2x96x112xbf16, #tpu.memory_space<vmem>>, vector<1x1x96x112xbf16>
    %118 = vector.shape_cast %117 : vector<1x1x96x112xbf16> to vector<96x112xbf16>
    %cst_99 = arith.constant dense<0.000000e+00> : vector<7x112xf32>
    %119 = tpu.matmul %116, %118, %cst_99 {dimension_numbers = #tpu.dot_dimension_numbers<[1], [0], [0], [1], [0, 0, 1, 1], [], []>} : vector<7x96xbf16>, vector<96x112xbf16>, vector<7x112xf32> -> vector<7x112xf32>
    %120 = arith.addf %114, %119 : vector<7x112xf32>
    %121 = arith.maximumf %91, %120 : vector<7x112xf32>
    %122 = vector.broadcast %2 : vector<1x112xf32> to vector<7x112xf32>
    %123 = arith.addf %121, %122 : vector<7x112xf32>
    %cst_100 = arith.constant 0.000000e+00 : f32
    %124 = vector.broadcast %cst_100 : f32 to vector<7x112xf32>
    %125 = arith.maximumf %123, %124 : vector<7x112xf32>
    %126 = arith.truncf %125 : vector<7x112xf32> to vector<7x112xbf16>
    %127 = vector.extract_strided_slice %1 {offsets = [2, 0, 0], sizes = [1, 7, 96], strides = [1, 1, 1]} : vector<4x8x96xbf16> to vector<1x7x96xbf16>
    %128 = vector.shape_cast %127 : vector<1x7x96xbf16> to vector<7x96xbf16>
    %c0_101 = arith.constant 0 : index
    %c0_102 = arith.constant 0 : index
    %c0_103 = arith.constant 0 : index
    %c0_104 = arith.constant 0 : index
    %129 = vector.load %arg2[%c0_101, %c0_102, %c0_103, %c0_104] : memref<5x2x96x112xbf16, #tpu.memory_space<vmem>>, vector<1x1x96x112xbf16>
    %130 = vector.shape_cast %129 : vector<1x1x96x112xbf16> to vector<96x112xbf16>
    %cst_105 = arith.constant dense<0.000000e+00> : vector<7x112xf32>
    %131 = tpu.matmul %128, %130, %cst_105 {dimension_numbers = #tpu.dot_dimension_numbers<[1], [0], [0], [1], [0, 0, 1, 1], [], []>} : vector<7x96xbf16>, vector<96x112xbf16>, vector<7x112xf32> -> vector<7x112xf32>
    %132 = vector.extract_strided_slice %1 {offsets = [3, 0, 0], sizes = [1, 7, 96], strides = [1, 1, 1]} : vector<4x8x96xbf16> to vector<1x7x96xbf16>
    %133 = vector.shape_cast %132 : vector<1x7x96xbf16> to vector<7x96xbf16>
    %c1_106 = arith.constant 1 : index
    %c0_107 = arith.constant 0 : index
    %c0_108 = arith.constant 0 : index
    %c0_109 = arith.constant 0 : index
    %134 = vector.load %arg2[%c1_106, %c0_107, %c0_108, %c0_109] : memref<5x2x96x112xbf16, #tpu.memory_space<vmem>>, vector<1x1x96x112xbf16>
    %135 = vector.shape_cast %134 : vector<1x1x96x112xbf16> to vector<96x112xbf16>
    %cst_110 = arith.constant dense<0.000000e+00> : vector<7x112xf32>
    %136 = tpu.matmul %133, %135, %cst_110 {dimension_numbers = #tpu.dot_dimension_numbers<[1], [0], [0], [1], [0, 0, 1, 1], [], []>} : vector<7x96xbf16>, vector<96x112xbf16>, vector<7x112xf32> -> vector<7x112xf32>
    %137 = arith.addf %131, %136 : vector<7x112xf32>
    %138 = vector.extract_strided_slice %1 {offsets = [0, 1, 0], sizes = [1, 7, 96], strides = [1, 1, 1]} : vector<4x8x96xbf16> to vector<1x7x96xbf16>
    %139 = vector.shape_cast %138 : vector<1x7x96xbf16> to vector<7x96xbf16>
    %c2_111 = arith.constant 2 : index
    %c0_112 = arith.constant 0 : index
    %c0_113 = arith.constant 0 : index
    %c0_114 = arith.constant 0 : index
    %140 = vector.load %arg2[%c2_111, %c0_112, %c0_113, %c0_114] : memref<5x2x96x112xbf16, #tpu.memory_space<vmem>>, vector<1x1x96x112xbf16>
    %141 = vector.shape_cast %140 : vector<1x1x96x112xbf16> to vector<96x112xbf16>
    %cst_115 = arith.constant dense<0.000000e+00> : vector<7x112xf32>
    %142 = tpu.matmul %139, %141, %cst_115 {dimension_numbers = #tpu.dot_dimension_numbers<[1], [0], [0], [1], [0, 0, 1, 1], [], []>} : vector<7x96xbf16>, vector<96x112xbf16>, vector<7x112xf32> -> vector<7x112xf32>
    %143 = arith.addf %137, %142 : vector<7x112xf32>
    %144 = vector.extract_strided_slice %1 {offsets = [1, 1, 0], sizes = [1, 7, 96], strides = [1, 1, 1]} : vector<4x8x96xbf16> to vector<1x7x96xbf16>
    %145 = vector.shape_cast %144 : vector<1x7x96xbf16> to vector<7x96xbf16>
    %c3_116 = arith.constant 3 : index
    %c0_117 = arith.constant 0 : index
    %c0_118 = arith.constant 0 : index
    %c0_119 = arith.constant 0 : index
    %146 = vector.load %arg2[%c3_116, %c0_117, %c0_118, %c0_119] : memref<5x2x96x112xbf16, #tpu.memory_space<vmem>>, vector<1x1x96x112xbf16>
    %147 = vector.shape_cast %146 : vector<1x1x96x112xbf16> to vector<96x112xbf16>
    %cst_120 = arith.constant dense<0.000000e+00> : vector<7x112xf32>
    %148 = tpu.matmul %145, %147, %cst_120 {dimension_numbers = #tpu.dot_dimension_numbers<[1], [0], [0], [1], [0, 0, 1, 1], [], []>} : vector<7x96xbf16>, vector<96x112xbf16>, vector<7x112xf32> -> vector<7x112xf32>
    %149 = arith.addf %143, %148 : vector<7x112xf32>
    %150 = vector.extract_strided_slice %1 {offsets = [2, 1, 0], sizes = [1, 7, 96], strides = [1, 1, 1]} : vector<4x8x96xbf16> to vector<1x7x96xbf16>
    %151 = vector.shape_cast %150 : vector<1x7x96xbf16> to vector<7x96xbf16>
    %c4_121 = arith.constant 4 : index
    %c0_122 = arith.constant 0 : index
    %c0_123 = arith.constant 0 : index
    %c0_124 = arith.constant 0 : index
    %152 = vector.load %arg2[%c4_121, %c0_122, %c0_123, %c0_124] : memref<5x2x96x112xbf16, #tpu.memory_space<vmem>>, vector<1x1x96x112xbf16>
    %153 = vector.shape_cast %152 : vector<1x1x96x112xbf16> to vector<96x112xbf16>
    %cst_125 = arith.constant dense<0.000000e+00> : vector<7x112xf32>
    %154 = tpu.matmul %151, %153, %cst_125 {dimension_numbers = #tpu.dot_dimension_numbers<[1], [0], [0], [1], [0, 0, 1, 1], [], []>} : vector<7x96xbf16>, vector<96x112xbf16>, vector<7x112xf32> -> vector<7x112xf32>
    %155 = arith.addf %149, %154 : vector<7x112xf32>
    %156 = vector.extract_strided_slice %1 {offsets = [2, 0, 0], sizes = [1, 7, 96], strides = [1, 1, 1]} : vector<4x8x96xbf16> to vector<1x7x96xbf16>
    %157 = vector.shape_cast %156 : vector<1x7x96xbf16> to vector<7x96xbf16>
    %c0_126 = arith.constant 0 : index
    %c1_127 = arith.constant 1 : index
    %c0_128 = arith.constant 0 : index
    %c0_129 = arith.constant 0 : index
    %158 = vector.load %arg2[%c0_126, %c1_127, %c0_128, %c0_129] : memref<5x2x96x112xbf16, #tpu.memory_space<vmem>>, vector<1x1x96x112xbf16>
    %159 = vector.shape_cast %158 : vector<1x1x96x112xbf16> to vector<96x112xbf16>
    %cst_130 = arith.constant dense<0.000000e+00> : vector<7x112xf32>
    %160 = tpu.matmul %157, %159, %cst_130 {dimension_numbers = #tpu.dot_dimension_numbers<[1], [0], [0], [1], [0, 0, 1, 1], [], []>} : vector<7x96xbf16>, vector<96x112xbf16>, vector<7x112xf32> -> vector<7x112xf32>
    %161 = vector.extract_strided_slice %1 {offsets = [3, 0, 0], sizes = [1, 7, 96], strides = [1, 1, 1]} : vector<4x8x96xbf16> to vector<1x7x96xbf16>
    %162 = vector.shape_cast %161 : vector<1x7x96xbf16> to vector<7x96xbf16>
    %c1_131 = arith.constant 1 : index
    %c1_132 = arith.constant 1 : index
    %c0_133 = arith.constant 0 : index
    %c0_134 = arith.constant 0 : index
    %163 = vector.load %arg2[%c1_131, %c1_132, %c0_133, %c0_134] : memref<5x2x96x112xbf16, #tpu.memory_space<vmem>>, vector<1x1x96x112xbf16>
    %164 = vector.shape_cast %163 : vector<1x1x96x112xbf16> to vector<96x112xbf16>
    %cst_135 = arith.constant dense<0.000000e+00> : vector<7x112xf32>
    %165 = tpu.matmul %162, %164, %cst_135 {dimension_numbers = #tpu.dot_dimension_numbers<[1], [0], [0], [1], [0, 0, 1, 1], [], []>} : vector<7x96xbf16>, vector<96x112xbf16>, vector<7x112xf32> -> vector<7x112xf32>
    %166 = arith.addf %160, %165 : vector<7x112xf32>
    %167 = vector.extract_strided_slice %1 {offsets = [0, 1, 0], sizes = [1, 7, 96], strides = [1, 1, 1]} : vector<4x8x96xbf16> to vector<1x7x96xbf16>
    %168 = vector.shape_cast %167 : vector<1x7x96xbf16> to vector<7x96xbf16>
    %c2_136 = arith.constant 2 : index
    %c1_137 = arith.constant 1 : index
    %c0_138 = arith.constant 0 : index
    %c0_139 = arith.constant 0 : index
    %169 = vector.load %arg2[%c2_136, %c1_137, %c0_138, %c0_139] : memref<5x2x96x112xbf16, #tpu.memory_space<vmem>>, vector<1x1x96x112xbf16>
    %170 = vector.shape_cast %169 : vector<1x1x96x112xbf16> to vector<96x112xbf16>
    %cst_140 = arith.constant dense<0.000000e+00> : vector<7x112xf32>
    %171 = tpu.matmul %168, %170, %cst_140 {dimension_numbers = #tpu.dot_dimension_numbers<[1], [0], [0], [1], [0, 0, 1, 1], [], []>} : vector<7x96xbf16>, vector<96x112xbf16>, vector<7x112xf32> -> vector<7x112xf32>
    %172 = arith.addf %166, %171 : vector<7x112xf32>
    %173 = vector.extract_strided_slice %1 {offsets = [1, 1, 0], sizes = [1, 7, 96], strides = [1, 1, 1]} : vector<4x8x96xbf16> to vector<1x7x96xbf16>
    %174 = vector.shape_cast %173 : vector<1x7x96xbf16> to vector<7x96xbf16>
    %c3_141 = arith.constant 3 : index
    %c1_142 = arith.constant 1 : index
    %c0_143 = arith.constant 0 : index
    %c0_144 = arith.constant 0 : index
    %175 = vector.load %arg2[%c3_141, %c1_142, %c0_143, %c0_144] : memref<5x2x96x112xbf16, #tpu.memory_space<vmem>>, vector<1x1x96x112xbf16>
    %176 = vector.shape_cast %175 : vector<1x1x96x112xbf16> to vector<96x112xbf16>
    %cst_145 = arith.constant dense<0.000000e+00> : vector<7x112xf32>
    %177 = tpu.matmul %174, %176, %cst_145 {dimension_numbers = #tpu.dot_dimension_numbers<[1], [0], [0], [1], [0, 0, 1, 1], [], []>} : vector<7x96xbf16>, vector<96x112xbf16>, vector<7x112xf32> -> vector<7x112xf32>
    %178 = arith.addf %172, %177 : vector<7x112xf32>
    %179 = vector.extract_strided_slice %1 {offsets = [2, 1, 0], sizes = [1, 7, 96], strides = [1, 1, 1]} : vector<4x8x96xbf16> to vector<1x7x96xbf16>
    %180 = vector.shape_cast %179 : vector<1x7x96xbf16> to vector<7x96xbf16>
    %c4_146 = arith.constant 4 : index
    %c1_147 = arith.constant 1 : index
    %c0_148 = arith.constant 0 : index
    %c0_149 = arith.constant 0 : index
    %181 = vector.load %arg2[%c4_146, %c1_147, %c0_148, %c0_149] : memref<5x2x96x112xbf16, #tpu.memory_space<vmem>>, vector<1x1x96x112xbf16>
    %182 = vector.shape_cast %181 : vector<1x1x96x112xbf16> to vector<96x112xbf16>
    %cst_150 = arith.constant dense<0.000000e+00> : vector<7x112xf32>
    %183 = tpu.matmul %180, %182, %cst_150 {dimension_numbers = #tpu.dot_dimension_numbers<[1], [0], [0], [1], [0, 0, 1, 1], [], []>} : vector<7x96xbf16>, vector<96x112xbf16>, vector<7x112xf32> -> vector<7x112xf32>
    %184 = arith.addf %178, %183 : vector<7x112xf32>
    %185 = arith.maximumf %155, %184 : vector<7x112xf32>
    %186 = vector.extract_strided_slice %1 {offsets = [3, 0, 0], sizes = [1, 7, 96], strides = [1, 1, 1]} : vector<4x8x96xbf16> to vector<1x7x96xbf16>
    %187 = vector.shape_cast %186 : vector<1x7x96xbf16> to vector<7x96xbf16>
    %c0_151 = arith.constant 0 : index
    %c0_152 = arith.constant 0 : index
    %c0_153 = arith.constant 0 : index
    %c0_154 = arith.constant 0 : index
    %188 = vector.load %arg2[%c0_151, %c0_152, %c0_153, %c0_154] : memref<5x2x96x112xbf16, #tpu.memory_space<vmem>>, vector<1x1x96x112xbf16>
    %189 = vector.shape_cast %188 : vector<1x1x96x112xbf16> to vector<96x112xbf16>
    %cst_155 = arith.constant dense<0.000000e+00> : vector<7x112xf32>
    %190 = tpu.matmul %187, %189, %cst_155 {dimension_numbers = #tpu.dot_dimension_numbers<[1], [0], [0], [1], [0, 0, 1, 1], [], []>} : vector<7x96xbf16>, vector<96x112xbf16>, vector<7x112xf32> -> vector<7x112xf32>
    %191 = vector.extract_strided_slice %1 {offsets = [0, 1, 0], sizes = [1, 7, 96], strides = [1, 1, 1]} : vector<4x8x96xbf16> to vector<1x7x96xbf16>
    %192 = vector.shape_cast %191 : vector<1x7x96xbf16> to vector<7x96xbf16>
    %c1_156 = arith.constant 1 : index
    %c0_157 = arith.constant 0 : index
    %c0_158 = arith.constant 0 : index
    %c0_159 = arith.constant 0 : index
    %193 = vector.load %arg2[%c1_156, %c0_157, %c0_158, %c0_159] : memref<5x2x96x112xbf16, #tpu.memory_space<vmem>>, vector<1x1x96x112xbf16>
    %194 = vector.shape_cast %193 : vector<1x1x96x112xbf16> to vector<96x112xbf16>
    %cst_160 = arith.constant dense<0.000000e+00> : vector<7x112xf32>
    %195 = tpu.matmul %192, %194, %cst_160 {dimension_numbers = #tpu.dot_dimension_numbers<[1], [0], [0], [1], [0, 0, 1, 1], [], []>} : vector<7x96xbf16>, vector<96x112xbf16>, vector<7x112xf32> -> vector<7x112xf32>
    %196 = arith.addf %190, %195 : vector<7x112xf32>
    %197 = vector.extract_strided_slice %1 {offsets = [1, 1, 0], sizes = [1, 7, 96], strides = [1, 1, 1]} : vector<4x8x96xbf16> to vector<1x7x96xbf16>
    %198 = vector.shape_cast %197 : vector<1x7x96xbf16> to vector<7x96xbf16>
    %c2_161 = arith.constant 2 : index
    %c0_162 = arith.constant 0 : index
    %c0_163 = arith.constant 0 : index
    %c0_164 = arith.constant 0 : index
    %199 = vector.load %arg2[%c2_161, %c0_162, %c0_163, %c0_164] : memref<5x2x96x112xbf16, #tpu.memory_space<vmem>>, vector<1x1x96x112xbf16>
    %200 = vector.shape_cast %199 : vector<1x1x96x112xbf16> to vector<96x112xbf16>
    %cst_165 = arith.constant dense<0.000000e+00> : vector<7x112xf32>
    %201 = tpu.matmul %198, %200, %cst_165 {dimension_numbers = #tpu.dot_dimension_numbers<[1], [0], [0], [1], [0, 0, 1, 1], [], []>} : vector<7x96xbf16>, vector<96x112xbf16>, vector<7x112xf32> -> vector<7x112xf32>
    %202 = arith.addf %196, %201 : vector<7x112xf32>
    %203 = vector.extract_strided_slice %1 {offsets = [2, 1, 0], sizes = [1, 7, 96], strides = [1, 1, 1]} : vector<4x8x96xbf16> to vector<1x7x96xbf16>
    %204 = vector.shape_cast %203 : vector<1x7x96xbf16> to vector<7x96xbf16>
    %c3_166 = arith.constant 3 : index
    %c0_167 = arith.constant 0 : index
    %c0_168 = arith.constant 0 : index
    %c0_169 = arith.constant 0 : index
    %205 = vector.load %arg2[%c3_166, %c0_167, %c0_168, %c0_169] : memref<5x2x96x112xbf16, #tpu.memory_space<vmem>>, vector<1x1x96x112xbf16>
    %206 = vector.shape_cast %205 : vector<1x1x96x112xbf16> to vector<96x112xbf16>
    %cst_170 = arith.constant dense<0.000000e+00> : vector<7x112xf32>
    %207 = tpu.matmul %204, %206, %cst_170 {dimension_numbers = #tpu.dot_dimension_numbers<[1], [0], [0], [1], [0, 0, 1, 1], [], []>} : vector<7x96xbf16>, vector<96x112xbf16>, vector<7x112xf32> -> vector<7x112xf32>
    %208 = arith.addf %202, %207 : vector<7x112xf32>
    %209 = vector.extract_strided_slice %1 {offsets = [3, 1, 0], sizes = [1, 7, 96], strides = [1, 1, 1]} : vector<4x8x96xbf16> to vector<1x7x96xbf16>
    %210 = vector.shape_cast %209 : vector<1x7x96xbf16> to vector<7x96xbf16>
    %c4_171 = arith.constant 4 : index
    %c0_172 = arith.constant 0 : index
    %c0_173 = arith.constant 0 : index
    %c0_174 = arith.constant 0 : index
    %211 = vector.load %arg2[%c4_171, %c0_172, %c0_173, %c0_174] : memref<5x2x96x112xbf16, #tpu.memory_space<vmem>>, vector<1x1x96x112xbf16>
    %212 = vector.shape_cast %211 : vector<1x1x96x112xbf16> to vector<96x112xbf16>
    %cst_175 = arith.constant dense<0.000000e+00> : vector<7x112xf32>
    %213 = tpu.matmul %210, %212, %cst_175 {dimension_numbers = #tpu.dot_dimension_numbers<[1], [0], [0], [1], [0, 0, 1, 1], [], []>} : vector<7x96xbf16>, vector<96x112xbf16>, vector<7x112xf32> -> vector<7x112xf32>
    %214 = arith.addf %208, %213 : vector<7x112xf32>
    %215 = arith.maximumf %185, %214 : vector<7x112xf32>
    %216 = vector.extract_strided_slice %1 {offsets = [3, 0, 0], sizes = [1, 7, 96], strides = [1, 1, 1]} : vector<4x8x96xbf16> to vector<1x7x96xbf16>
    %217 = vector.shape_cast %216 : vector<1x7x96xbf16> to vector<7x96xbf16>
    %c0_176 = arith.constant 0 : index
    %c1_177 = arith.constant 1 : index
    %c0_178 = arith.constant 0 : index
    %c0_179 = arith.constant 0 : index
    %218 = vector.load %arg2[%c0_176, %c1_177, %c0_178, %c0_179] : memref<5x2x96x112xbf16, #tpu.memory_space<vmem>>, vector<1x1x96x112xbf16>
    %219 = vector.shape_cast %218 : vector<1x1x96x112xbf16> to vector<96x112xbf16>
    %cst_180 = arith.constant dense<0.000000e+00> : vector<7x112xf32>
    %220 = tpu.matmul %217, %219, %cst_180 {dimension_numbers = #tpu.dot_dimension_numbers<[1], [0], [0], [1], [0, 0, 1, 1], [], []>} : vector<7x96xbf16>, vector<96x112xbf16>, vector<7x112xf32> -> vector<7x112xf32>
    %221 = vector.extract_strided_slice %1 {offsets = [0, 1, 0], sizes = [1, 7, 96], strides = [1, 1, 1]} : vector<4x8x96xbf16> to vector<1x7x96xbf16>
    %222 = vector.shape_cast %221 : vector<1x7x96xbf16> to vector<7x96xbf16>
    %c1_181 = arith.constant 1 : index
    %c1_182 = arith.constant 1 : index
    %c0_183 = arith.constant 0 : index
    %c0_184 = arith.constant 0 : index
    %223 = vector.load %arg2[%c1_181, %c1_182, %c0_183, %c0_184] : memref<5x2x96x112xbf16, #tpu.memory_space<vmem>>, vector<1x1x96x112xbf16>
    %224 = vector.shape_cast %223 : vector<1x1x96x112xbf16> to vector<96x112xbf16>
    %cst_185 = arith.constant dense<0.000000e+00> : vector<7x112xf32>
    %225 = tpu.matmul %222, %224, %cst_185 {dimension_numbers = #tpu.dot_dimension_numbers<[1], [0], [0], [1], [0, 0, 1, 1], [], []>} : vector<7x96xbf16>, vector<96x112xbf16>, vector<7x112xf32> -> vector<7x112xf32>
    %226 = arith.addf %220, %225 : vector<7x112xf32>
    %227 = vector.extract_strided_slice %1 {offsets = [1, 1, 0], sizes = [1, 7, 96], strides = [1, 1, 1]} : vector<4x8x96xbf16> to vector<1x7x96xbf16>
    %228 = vector.shape_cast %227 : vector<1x7x96xbf16> to vector<7x96xbf16>
    %c2_186 = arith.constant 2 : index
    %c1_187 = arith.constant 1 : index
    %c0_188 = arith.constant 0 : index
    %c0_189 = arith.constant 0 : index
    %229 = vector.load %arg2[%c2_186, %c1_187, %c0_188, %c0_189] : memref<5x2x96x112xbf16, #tpu.memory_space<vmem>>, vector<1x1x96x112xbf16>
    %230 = vector.shape_cast %229 : vector<1x1x96x112xbf16> to vector<96x112xbf16>
    %cst_190 = arith.constant dense<0.000000e+00> : vector<7x112xf32>
    %231 = tpu.matmul %228, %230, %cst_190 {dimension_numbers = #tpu.dot_dimension_numbers<[1], [0], [0], [1], [0, 0, 1, 1], [], []>} : vector<7x96xbf16>, vector<96x112xbf16>, vector<7x112xf32> -> vector<7x112xf32>
    %232 = arith.addf %226, %231 : vector<7x112xf32>
    %233 = vector.extract_strided_slice %1 {offsets = [2, 1, 0], sizes = [1, 7, 96], strides = [1, 1, 1]} : vector<4x8x96xbf16> to vector<1x7x96xbf16>
    %234 = vector.shape_cast %233 : vector<1x7x96xbf16> to vector<7x96xbf16>
    %c3_191 = arith.constant 3 : index
    %c1_192 = arith.constant 1 : index
    %c0_193 = arith.constant 0 : index
    %c0_194 = arith.constant 0 : index
    %235 = vector.load %arg2[%c3_191, %c1_192, %c0_193, %c0_194] : memref<5x2x96x112xbf16, #tpu.memory_space<vmem>>, vector<1x1x96x112xbf16>
    %236 = vector.shape_cast %235 : vector<1x1x96x112xbf16> to vector<96x112xbf16>
    %cst_195 = arith.constant dense<0.000000e+00> : vector<7x112xf32>
    %237 = tpu.matmul %234, %236, %cst_195 {dimension_numbers = #tpu.dot_dimension_numbers<[1], [0], [0], [1], [0, 0, 1, 1], [], []>} : vector<7x96xbf16>, vector<96x112xbf16>, vector<7x112xf32> -> vector<7x112xf32>
    %238 = arith.addf %232, %237 : vector<7x112xf32>
    %239 = vector.extract_strided_slice %1 {offsets = [3, 1, 0], sizes = [1, 7, 96], strides = [1, 1, 1]} : vector<4x8x96xbf16> to vector<1x7x96xbf16>
    %240 = vector.shape_cast %239 : vector<1x7x96xbf16> to vector<7x96xbf16>
    %c4_196 = arith.constant 4 : index
    %c1_197 = arith.constant 1 : index
    %c0_198 = arith.constant 0 : index
    %c0_199 = arith.constant 0 : index
    %241 = vector.load %arg2[%c4_196, %c1_197, %c0_198, %c0_199] : memref<5x2x96x112xbf16, #tpu.memory_space<vmem>>, vector<1x1x96x112xbf16>
    %242 = vector.shape_cast %241 : vector<1x1x96x112xbf16> to vector<96x112xbf16>
    %cst_200 = arith.constant dense<0.000000e+00> : vector<7x112xf32>
    %243 = tpu.matmul %240, %242, %cst_200 {dimension_numbers = #tpu.dot_dimension_numbers<[1], [0], [0], [1], [0, 0, 1, 1], [], []>} : vector<7x96xbf16>, vector<96x112xbf16>, vector<7x112xf32> -> vector<7x112xf32>
    %244 = arith.addf %238, %243 : vector<7x112xf32>
    %245 = arith.maximumf %215, %244 : vector<7x112xf32>
    %246 = vector.broadcast %2 : vector<1x112xf32> to vector<7x112xf32>
    %247 = arith.addf %245, %246 : vector<7x112xf32>
    %cst_201 = arith.constant 0.000000e+00 : f32
    %248 = vector.broadcast %cst_201 : f32 to vector<7x112xf32>
    %249 = arith.maximumf %247, %248 : vector<7x112xf32>
    %250 = arith.truncf %249 : vector<7x112xf32> to vector<7x112xbf16>
    %c0_202 = arith.constant 0 : index
    %c0_203 = arith.constant 0 : index
    %251 = vector.load %arg5[%c0_202, %c0_203] : memref<1x80xf32, #tpu.memory_space<vmem>>, vector<1x80xf32>
    %252 = vector.extract_strided_slice %126 {offsets = [0, 0], sizes = [5, 112], strides = [1, 1]} : vector<7x112xbf16> to vector<5x112xbf16>
    %c0_204 = arith.constant 0 : index
    %c0_205 = arith.constant 0 : index
    %c0_206 = arith.constant 0 : index
    %c0_207 = arith.constant 0 : index
    %253 = vector.load %arg4[%c0_204, %c0_205, %c0_206, %c0_207] : memref<5x2x112x80xbf16, #tpu.memory_space<vmem>>, vector<1x1x112x80xbf16>
    %254 = vector.shape_cast %253 : vector<1x1x112x80xbf16> to vector<112x80xbf16>
    %cst_208 = arith.constant dense<0.000000e+00> : vector<5x80xf32>
    %255 = tpu.matmul %252, %254, %cst_208 {dimension_numbers = #tpu.dot_dimension_numbers<[1], [0], [0], [1], [0, 0, 1, 1], [], []>} : vector<5x112xbf16>, vector<112x80xbf16>, vector<5x80xf32> -> vector<5x80xf32>
    %256 = vector.extract_strided_slice %250 {offsets = [0, 0], sizes = [5, 112], strides = [1, 1]} : vector<7x112xbf16> to vector<5x112xbf16>
    %c1_209 = arith.constant 1 : index
    %c0_210 = arith.constant 0 : index
    %c0_211 = arith.constant 0 : index
    %c0_212 = arith.constant 0 : index
    %257 = vector.load %arg4[%c1_209, %c0_210, %c0_211, %c0_212] : memref<5x2x112x80xbf16, #tpu.memory_space<vmem>>, vector<1x1x112x80xbf16>
    %258 = vector.shape_cast %257 : vector<1x1x112x80xbf16> to vector<112x80xbf16>
    %cst_213 = arith.constant dense<0.000000e+00> : vector<5x80xf32>
    %259 = tpu.matmul %256, %258, %cst_213 {dimension_numbers = #tpu.dot_dimension_numbers<[1], [0], [0], [1], [0, 0, 1, 1], [], []>} : vector<5x112xbf16>, vector<112x80xbf16>, vector<5x80xf32> -> vector<5x80xf32>
    %260 = arith.addf %255, %259 : vector<5x80xf32>
    %261 = vector.extract_strided_slice %126 {offsets = [1, 0], sizes = [5, 112], strides = [1, 1]} : vector<7x112xbf16> to vector<5x112xbf16>
    %c2_214 = arith.constant 2 : index
    %c0_215 = arith.constant 0 : index
    %c0_216 = arith.constant 0 : index
    %c0_217 = arith.constant 0 : index
    %262 = vector.load %arg4[%c2_214, %c0_215, %c0_216, %c0_217] : memref<5x2x112x80xbf16, #tpu.memory_space<vmem>>, vector<1x1x112x80xbf16>
    %263 = vector.shape_cast %262 : vector<1x1x112x80xbf16> to vector<112x80xbf16>
    %cst_218 = arith.constant dense<0.000000e+00> : vector<5x80xf32>
    %264 = tpu.matmul %261, %263, %cst_218 {dimension_numbers = #tpu.dot_dimension_numbers<[1], [0], [0], [1], [0, 0, 1, 1], [], []>} : vector<5x112xbf16>, vector<112x80xbf16>, vector<5x80xf32> -> vector<5x80xf32>
    %265 = arith.addf %260, %264 : vector<5x80xf32>
    %266 = vector.extract_strided_slice %250 {offsets = [1, 0], sizes = [5, 112], strides = [1, 1]} : vector<7x112xbf16> to vector<5x112xbf16>
    %c3_219 = arith.constant 3 : index
    %c0_220 = arith.constant 0 : index
    %c0_221 = arith.constant 0 : index
    %c0_222 = arith.constant 0 : index
    %267 = vector.load %arg4[%c3_219, %c0_220, %c0_221, %c0_222] : memref<5x2x112x80xbf16, #tpu.memory_space<vmem>>, vector<1x1x112x80xbf16>
    %268 = vector.shape_cast %267 : vector<1x1x112x80xbf16> to vector<112x80xbf16>
    %cst_223 = arith.constant dense<0.000000e+00> : vector<5x80xf32>
    %269 = tpu.matmul %266, %268, %cst_223 {dimension_numbers = #tpu.dot_dimension_numbers<[1], [0], [0], [1], [0, 0, 1, 1], [], []>} : vector<5x112xbf16>, vector<112x80xbf16>, vector<5x80xf32> -> vector<5x80xf32>
    %270 = arith.addf %265, %269 : vector<5x80xf32>
    %271 = vector.extract_strided_slice %126 {offsets = [2, 0], sizes = [5, 112], strides = [1, 1]} : vector<7x112xbf16> to vector<5x112xbf16>
    %c4_224 = arith.constant 4 : index
    %c0_225 = arith.constant 0 : index
    %c0_226 = arith.constant 0 : index
    %c0_227 = arith.constant 0 : index
    %272 = vector.load %arg4[%c4_224, %c0_225, %c0_226, %c0_227] : memref<5x2x112x80xbf16, #tpu.memory_space<vmem>>, vector<1x1x112x80xbf16>
    %273 = vector.shape_cast %272 : vector<1x1x112x80xbf16> to vector<112x80xbf16>
    %cst_228 = arith.constant dense<0.000000e+00> : vector<5x80xf32>
    %274 = tpu.matmul %271, %273, %cst_228 {dimension_numbers = #tpu.dot_dimension_numbers<[1], [0], [0], [1], [0, 0, 1, 1], [], []>} : vector<5x112xbf16>, vector<112x80xbf16>, vector<5x80xf32> -> vector<5x80xf32>
    %275 = arith.addf %270, %274 : vector<5x80xf32>
    %276 = vector.extract_strided_slice %126 {offsets = [0, 0], sizes = [5, 112], strides = [1, 1]} : vector<7x112xbf16> to vector<5x112xbf16>
    %c0_229 = arith.constant 0 : index
    %c1_230 = arith.constant 1 : index
    %c0_231 = arith.constant 0 : index
    %c0_232 = arith.constant 0 : index
    %277 = vector.load %arg4[%c0_229, %c1_230, %c0_231, %c0_232] : memref<5x2x112x80xbf16, #tpu.memory_space<vmem>>, vector<1x1x112x80xbf16>
    %278 = vector.shape_cast %277 : vector<1x1x112x80xbf16> to vector<112x80xbf16>
    %cst_233 = arith.constant dense<0.000000e+00> : vector<5x80xf32>
    %279 = tpu.matmul %276, %278, %cst_233 {dimension_numbers = #tpu.dot_dimension_numbers<[1], [0], [0], [1], [0, 0, 1, 1], [], []>} : vector<5x112xbf16>, vector<112x80xbf16>, vector<5x80xf32> -> vector<5x80xf32>
    %280 = vector.extract_strided_slice %250 {offsets = [0, 0], sizes = [5, 112], strides = [1, 1]} : vector<7x112xbf16> to vector<5x112xbf16>
    %c1_234 = arith.constant 1 : index
    %c1_235 = arith.constant 1 : index
    %c0_236 = arith.constant 0 : index
    %c0_237 = arith.constant 0 : index
    %281 = vector.load %arg4[%c1_234, %c1_235, %c0_236, %c0_237] : memref<5x2x112x80xbf16, #tpu.memory_space<vmem>>, vector<1x1x112x80xbf16>
    %282 = vector.shape_cast %281 : vector<1x1x112x80xbf16> to vector<112x80xbf16>
    %cst_238 = arith.constant dense<0.000000e+00> : vector<5x80xf32>
    %283 = tpu.matmul %280, %282, %cst_238 {dimension_numbers = #tpu.dot_dimension_numbers<[1], [0], [0], [1], [0, 0, 1, 1], [], []>} : vector<5x112xbf16>, vector<112x80xbf16>, vector<5x80xf32> -> vector<5x80xf32>
    %284 = arith.addf %279, %283 : vector<5x80xf32>
    %285 = vector.extract_strided_slice %126 {offsets = [1, 0], sizes = [5, 112], strides = [1, 1]} : vector<7x112xbf16> to vector<5x112xbf16>
    %c2_239 = arith.constant 2 : index
    %c1_240 = arith.constant 1 : index
    %c0_241 = arith.constant 0 : index
    %c0_242 = arith.constant 0 : index
    %286 = vector.load %arg4[%c2_239, %c1_240, %c0_241, %c0_242] : memref<5x2x112x80xbf16, #tpu.memory_space<vmem>>, vector<1x1x112x80xbf16>
    %287 = vector.shape_cast %286 : vector<1x1x112x80xbf16> to vector<112x80xbf16>
    %cst_243 = arith.constant dense<0.000000e+00> : vector<5x80xf32>
    %288 = tpu.matmul %285, %287, %cst_243 {dimension_numbers = #tpu.dot_dimension_numbers<[1], [0], [0], [1], [0, 0, 1, 1], [], []>} : vector<5x112xbf16>, vector<112x80xbf16>, vector<5x80xf32> -> vector<5x80xf32>
    %289 = arith.addf %284, %288 : vector<5x80xf32>
    %290 = vector.extract_strided_slice %250 {offsets = [1, 0], sizes = [5, 112], strides = [1, 1]} : vector<7x112xbf16> to vector<5x112xbf16>
    %c3_244 = arith.constant 3 : index
    %c1_245 = arith.constant 1 : index
    %c0_246 = arith.constant 0 : index
    %c0_247 = arith.constant 0 : index
    %291 = vector.load %arg4[%c3_244, %c1_245, %c0_246, %c0_247] : memref<5x2x112x80xbf16, #tpu.memory_space<vmem>>, vector<1x1x112x80xbf16>
    %292 = vector.shape_cast %291 : vector<1x1x112x80xbf16> to vector<112x80xbf16>
    %cst_248 = arith.constant dense<0.000000e+00> : vector<5x80xf32>
    %293 = tpu.matmul %290, %292, %cst_248 {dimension_numbers = #tpu.dot_dimension_numbers<[1], [0], [0], [1], [0, 0, 1, 1], [], []>} : vector<5x112xbf16>, vector<112x80xbf16>, vector<5x80xf32> -> vector<5x80xf32>
    %294 = arith.addf %289, %293 : vector<5x80xf32>
    %295 = vector.extract_strided_slice %126 {offsets = [2, 0], sizes = [5, 112], strides = [1, 1]} : vector<7x112xbf16> to vector<5x112xbf16>
    %c4_249 = arith.constant 4 : index
    %c1_250 = arith.constant 1 : index
    %c0_251 = arith.constant 0 : index
    %c0_252 = arith.constant 0 : index
    %296 = vector.load %arg4[%c4_249, %c1_250, %c0_251, %c0_252] : memref<5x2x112x80xbf16, #tpu.memory_space<vmem>>, vector<1x1x112x80xbf16>
    %297 = vector.shape_cast %296 : vector<1x1x112x80xbf16> to vector<112x80xbf16>
    %cst_253 = arith.constant dense<0.000000e+00> : vector<5x80xf32>
    %298 = tpu.matmul %295, %297, %cst_253 {dimension_numbers = #tpu.dot_dimension_numbers<[1], [0], [0], [1], [0, 0, 1, 1], [], []>} : vector<5x112xbf16>, vector<112x80xbf16>, vector<5x80xf32> -> vector<5x80xf32>
    %299 = arith.addf %294, %298 : vector<5x80xf32>
    %300 = arith.maximumf %275, %299 : vector<5x80xf32>
    %301 = vector.extract_strided_slice %250 {offsets = [0, 0], sizes = [5, 112], strides = [1, 1]} : vector<7x112xbf16> to vector<5x112xbf16>
    %c0_254 = arith.constant 0 : index
    %c0_255 = arith.constant 0 : index
    %c0_256 = arith.constant 0 : index
    %c0_257 = arith.constant 0 : index
    %302 = vector.load %arg4[%c0_254, %c0_255, %c0_256, %c0_257] : memref<5x2x112x80xbf16, #tpu.memory_space<vmem>>, vector<1x1x112x80xbf16>
    %303 = vector.shape_cast %302 : vector<1x1x112x80xbf16> to vector<112x80xbf16>
    %cst_258 = arith.constant dense<0.000000e+00> : vector<5x80xf32>
    %304 = tpu.matmul %301, %303, %cst_258 {dimension_numbers = #tpu.dot_dimension_numbers<[1], [0], [0], [1], [0, 0, 1, 1], [], []>} : vector<5x112xbf16>, vector<112x80xbf16>, vector<5x80xf32> -> vector<5x80xf32>
    %305 = vector.extract_strided_slice %126 {offsets = [1, 0], sizes = [5, 112], strides = [1, 1]} : vector<7x112xbf16> to vector<5x112xbf16>
    %c1_259 = arith.constant 1 : index
    %c0_260 = arith.constant 0 : index
    %c0_261 = arith.constant 0 : index
    %c0_262 = arith.constant 0 : index
    %306 = vector.load %arg4[%c1_259, %c0_260, %c0_261, %c0_262] : memref<5x2x112x80xbf16, #tpu.memory_space<vmem>>, vector<1x1x112x80xbf16>
    %307 = vector.shape_cast %306 : vector<1x1x112x80xbf16> to vector<112x80xbf16>
    %cst_263 = arith.constant dense<0.000000e+00> : vector<5x80xf32>
    %308 = tpu.matmul %305, %307, %cst_263 {dimension_numbers = #tpu.dot_dimension_numbers<[1], [0], [0], [1], [0, 0, 1, 1], [], []>} : vector<5x112xbf16>, vector<112x80xbf16>, vector<5x80xf32> -> vector<5x80xf32>
    %309 = arith.addf %304, %308 : vector<5x80xf32>
    %310 = vector.extract_strided_slice %250 {offsets = [1, 0], sizes = [5, 112], strides = [1, 1]} : vector<7x112xbf16> to vector<5x112xbf16>
    %c2_264 = arith.constant 2 : index
    %c0_265 = arith.constant 0 : index
    %c0_266 = arith.constant 0 : index
    %c0_267 = arith.constant 0 : index
    %311 = vector.load %arg4[%c2_264, %c0_265, %c0_266, %c0_267] : memref<5x2x112x80xbf16, #tpu.memory_space<vmem>>, vector<1x1x112x80xbf16>
    %312 = vector.shape_cast %311 : vector<1x1x112x80xbf16> to vector<112x80xbf16>
    %cst_268 = arith.constant dense<0.000000e+00> : vector<5x80xf32>
    %313 = tpu.matmul %310, %312, %cst_268 {dimension_numbers = #tpu.dot_dimension_numbers<[1], [0], [0], [1], [0, 0, 1, 1], [], []>} : vector<5x112xbf16>, vector<112x80xbf16>, vector<5x80xf32> -> vector<5x80xf32>
    %314 = arith.addf %309, %313 : vector<5x80xf32>
    %315 = vector.extract_strided_slice %126 {offsets = [2, 0], sizes = [5, 112], strides = [1, 1]} : vector<7x112xbf16> to vector<5x112xbf16>
    %c3_269 = arith.constant 3 : index
    %c0_270 = arith.constant 0 : index
    %c0_271 = arith.constant 0 : index
    %c0_272 = arith.constant 0 : index
    %316 = vector.load %arg4[%c3_269, %c0_270, %c0_271, %c0_272] : memref<5x2x112x80xbf16, #tpu.memory_space<vmem>>, vector<1x1x112x80xbf16>
    %317 = vector.shape_cast %316 : vector<1x1x112x80xbf16> to vector<112x80xbf16>
    %cst_273 = arith.constant dense<0.000000e+00> : vector<5x80xf32>
    %318 = tpu.matmul %315, %317, %cst_273 {dimension_numbers = #tpu.dot_dimension_numbers<[1], [0], [0], [1], [0, 0, 1, 1], [], []>} : vector<5x112xbf16>, vector<112x80xbf16>, vector<5x80xf32> -> vector<5x80xf32>
    %319 = arith.addf %314, %318 : vector<5x80xf32>
    %320 = vector.extract_strided_slice %250 {offsets = [2, 0], sizes = [5, 112], strides = [1, 1]} : vector<7x112xbf16> to vector<5x112xbf16>
    %c4_274 = arith.constant 4 : index
    %c0_275 = arith.constant 0 : index
    %c0_276 = arith.constant 0 : index
    %c0_277 = arith.constant 0 : index
    %321 = vector.load %arg4[%c4_274, %c0_275, %c0_276, %c0_277] : memref<5x2x112x80xbf16, #tpu.memory_space<vmem>>, vector<1x1x112x80xbf16>
    %322 = vector.shape_cast %321 : vector<1x1x112x80xbf16> to vector<112x80xbf16>
    %cst_278 = arith.constant dense<0.000000e+00> : vector<5x80xf32>
    %323 = tpu.matmul %320, %322, %cst_278 {dimension_numbers = #tpu.dot_dimension_numbers<[1], [0], [0], [1], [0, 0, 1, 1], [], []>} : vector<5x112xbf16>, vector<112x80xbf16>, vector<5x80xf32> -> vector<5x80xf32>
    %324 = arith.addf %319, %323 : vector<5x80xf32>
    %325 = arith.maximumf %300, %324 : vector<5x80xf32>
    %326 = vector.extract_strided_slice %250 {offsets = [0, 0], sizes = [5, 112], strides = [1, 1]} : vector<7x112xbf16> to vector<5x112xbf16>
    %c0_279 = arith.constant 0 : index
    %c1_280 = arith.constant 1 : index
    %c0_281 = arith.constant 0 : index
    %c0_282 = arith.constant 0 : index
    %327 = vector.load %arg4[%c0_279, %c1_280, %c0_281, %c0_282] : memref<5x2x112x80xbf16, #tpu.memory_space<vmem>>, vector<1x1x112x80xbf16>
    %328 = vector.shape_cast %327 : vector<1x1x112x80xbf16> to vector<112x80xbf16>
    %cst_283 = arith.constant dense<0.000000e+00> : vector<5x80xf32>
    %329 = tpu.matmul %326, %328, %cst_283 {dimension_numbers = #tpu.dot_dimension_numbers<[1], [0], [0], [1], [0, 0, 1, 1], [], []>} : vector<5x112xbf16>, vector<112x80xbf16>, vector<5x80xf32> -> vector<5x80xf32>
    %330 = vector.extract_strided_slice %126 {offsets = [1, 0], sizes = [5, 112], strides = [1, 1]} : vector<7x112xbf16> to vector<5x112xbf16>
    %c1_284 = arith.constant 1 : index
    %c1_285 = arith.constant 1 : index
    %c0_286 = arith.constant 0 : index
    %c0_287 = arith.constant 0 : index
    %331 = vector.load %arg4[%c1_284, %c1_285, %c0_286, %c0_287] : memref<5x2x112x80xbf16, #tpu.memory_space<vmem>>, vector<1x1x112x80xbf16>
    %332 = vector.shape_cast %331 : vector<1x1x112x80xbf16> to vector<112x80xbf16>
    %cst_288 = arith.constant dense<0.000000e+00> : vector<5x80xf32>
    %333 = tpu.matmul %330, %332, %cst_288 {dimension_numbers = #tpu.dot_dimension_numbers<[1], [0], [0], [1], [0, 0, 1, 1], [], []>} : vector<5x112xbf16>, vector<112x80xbf16>, vector<5x80xf32> -> vector<5x80xf32>
    %334 = arith.addf %329, %333 : vector<5x80xf32>
    %335 = vector.extract_strided_slice %250 {offsets = [1, 0], sizes = [5, 112], strides = [1, 1]} : vector<7x112xbf16> to vector<5x112xbf16>
    %c2_289 = arith.constant 2 : index
    %c1_290 = arith.constant 1 : index
    %c0_291 = arith.constant 0 : index
    %c0_292 = arith.constant 0 : index
    %336 = vector.load %arg4[%c2_289, %c1_290, %c0_291, %c0_292] : memref<5x2x112x80xbf16, #tpu.memory_space<vmem>>, vector<1x1x112x80xbf16>
    %337 = vector.shape_cast %336 : vector<1x1x112x80xbf16> to vector<112x80xbf16>
    %cst_293 = arith.constant dense<0.000000e+00> : vector<5x80xf32>
    %338 = tpu.matmul %335, %337, %cst_293 {dimension_numbers = #tpu.dot_dimension_numbers<[1], [0], [0], [1], [0, 0, 1, 1], [], []>} : vector<5x112xbf16>, vector<112x80xbf16>, vector<5x80xf32> -> vector<5x80xf32>
    %339 = arith.addf %334, %338 : vector<5x80xf32>
    %340 = vector.extract_strided_slice %126 {offsets = [2, 0], sizes = [5, 112], strides = [1, 1]} : vector<7x112xbf16> to vector<5x112xbf16>
    %c3_294 = arith.constant 3 : index
    %c1_295 = arith.constant 1 : index
    %c0_296 = arith.constant 0 : index
    %c0_297 = arith.constant 0 : index
    %341 = vector.load %arg4[%c3_294, %c1_295, %c0_296, %c0_297] : memref<5x2x112x80xbf16, #tpu.memory_space<vmem>>, vector<1x1x112x80xbf16>
    %342 = vector.shape_cast %341 : vector<1x1x112x80xbf16> to vector<112x80xbf16>
    %cst_298 = arith.constant dense<0.000000e+00> : vector<5x80xf32>
    %343 = tpu.matmul %340, %342, %cst_298 {dimension_numbers = #tpu.dot_dimension_numbers<[1], [0], [0], [1], [0, 0, 1, 1], [], []>} : vector<5x112xbf16>, vector<112x80xbf16>, vector<5x80xf32> -> vector<5x80xf32>
    %344 = arith.addf %339, %343 : vector<5x80xf32>
    %345 = vector.extract_strided_slice %250 {offsets = [2, 0], sizes = [5, 112], strides = [1, 1]} : vector<7x112xbf16> to vector<5x112xbf16>
    %c4_299 = arith.constant 4 : index
    %c1_300 = arith.constant 1 : index
    %c0_301 = arith.constant 0 : index
    %c0_302 = arith.constant 0 : index
    %346 = vector.load %arg4[%c4_299, %c1_300, %c0_301, %c0_302] : memref<5x2x112x80xbf16, #tpu.memory_space<vmem>>, vector<1x1x112x80xbf16>
    %347 = vector.shape_cast %346 : vector<1x1x112x80xbf16> to vector<112x80xbf16>
    %cst_303 = arith.constant dense<0.000000e+00> : vector<5x80xf32>
    %348 = tpu.matmul %345, %347, %cst_303 {dimension_numbers = #tpu.dot_dimension_numbers<[1], [0], [0], [1], [0, 0, 1, 1], [], []>} : vector<5x112xbf16>, vector<112x80xbf16>, vector<5x80xf32> -> vector<5x80xf32>
    %349 = arith.addf %344, %348 : vector<5x80xf32>
    %350 = arith.maximumf %325, %349 : vector<5x80xf32>
    %351 = vector.broadcast %251 : vector<1x80xf32> to vector<5x80xf32>
    %352 = arith.addf %350, %351 : vector<5x80xf32>
    %cst_304 = arith.constant 0.000000e+00 : f32
    %353 = vector.broadcast %cst_304 : f32 to vector<5x80xf32>
    %354 = arith.maximumf %352, %353 : vector<5x80xf32>
    %355 = arith.truncf %354 : vector<5x80xf32> to vector<5x80xbf16>
    %356 = vector.extract_strided_slice %355 {offsets = [0, 0], sizes = [1, 80], strides = [1, 1]} : vector<5x80xbf16> to vector<1x80xbf16>
    %c0_305 = arith.constant 0 : index
    %c0_306 = arith.constant 0 : index
    %c0_307 = arith.constant 0 : index
    %357 = vector.load %arg6[%c0_305, %c0_306, %c0_307] : memref<5x80x128xbf16, #tpu.memory_space<vmem>>, vector<1x80x128xbf16>
    %358 = vector.shape_cast %357 : vector<1x80x128xbf16> to vector<80x128xbf16>
    %cst_308 = arith.constant dense<0.000000e+00> : vector<1x128xf32>
    %359 = tpu.matmul %356, %358, %cst_308 {dimension_numbers = #tpu.dot_dimension_numbers<[1], [0], [0], [1], [0, 0, 1, 1], [], []>} : vector<1x80xbf16>, vector<80x128xbf16>, vector<1x128xf32> -> vector<1x128xf32>
    %360 = vector.extract_strided_slice %355 {offsets = [1, 0], sizes = [1, 80], strides = [1, 1]} : vector<5x80xbf16> to vector<1x80xbf16>
    %c1_309 = arith.constant 1 : index
    %c0_310 = arith.constant 0 : index
    %c0_311 = arith.constant 0 : index
    %361 = vector.load %arg6[%c1_309, %c0_310, %c0_311] : memref<5x80x128xbf16, #tpu.memory_space<vmem>>, vector<1x80x128xbf16>
    %362 = vector.shape_cast %361 : vector<1x80x128xbf16> to vector<80x128xbf16>
    %cst_312 = arith.constant dense<0.000000e+00> : vector<1x128xf32>
    %363 = tpu.matmul %360, %362, %cst_312 {dimension_numbers = #tpu.dot_dimension_numbers<[1], [0], [0], [1], [0, 0, 1, 1], [], []>} : vector<1x80xbf16>, vector<80x128xbf16>, vector<1x128xf32> -> vector<1x128xf32>
    %364 = arith.addf %359, %363 : vector<1x128xf32>
    %365 = vector.extract_strided_slice %355 {offsets = [2, 0], sizes = [1, 80], strides = [1, 1]} : vector<5x80xbf16> to vector<1x80xbf16>
    %c2_313 = arith.constant 2 : index
    %c0_314 = arith.constant 0 : index
    %c0_315 = arith.constant 0 : index
    %366 = vector.load %arg6[%c2_313, %c0_314, %c0_315] : memref<5x80x128xbf16, #tpu.memory_space<vmem>>, vector<1x80x128xbf16>
    %367 = vector.shape_cast %366 : vector<1x80x128xbf16> to vector<80x128xbf16>
    %cst_316 = arith.constant dense<0.000000e+00> : vector<1x128xf32>
    %368 = tpu.matmul %365, %367, %cst_316 {dimension_numbers = #tpu.dot_dimension_numbers<[1], [0], [0], [1], [0, 0, 1, 1], [], []>} : vector<1x80xbf16>, vector<80x128xbf16>, vector<1x128xf32> -> vector<1x128xf32>
    %369 = arith.addf %364, %368 : vector<1x128xf32>
    %370 = vector.extract_strided_slice %355 {offsets = [3, 0], sizes = [1, 80], strides = [1, 1]} : vector<5x80xbf16> to vector<1x80xbf16>
    %c3_317 = arith.constant 3 : index
    %c0_318 = arith.constant 0 : index
    %c0_319 = arith.constant 0 : index
    %371 = vector.load %arg6[%c3_317, %c0_318, %c0_319] : memref<5x80x128xbf16, #tpu.memory_space<vmem>>, vector<1x80x128xbf16>
    %372 = vector.shape_cast %371 : vector<1x80x128xbf16> to vector<80x128xbf16>
    %cst_320 = arith.constant dense<0.000000e+00> : vector<1x128xf32>
    %373 = tpu.matmul %370, %372, %cst_320 {dimension_numbers = #tpu.dot_dimension_numbers<[1], [0], [0], [1], [0, 0, 1, 1], [], []>} : vector<1x80xbf16>, vector<80x128xbf16>, vector<1x128xf32> -> vector<1x128xf32>
    %374 = arith.addf %369, %373 : vector<1x128xf32>
    %375 = vector.extract_strided_slice %355 {offsets = [4, 0], sizes = [1, 80], strides = [1, 1]} : vector<5x80xbf16> to vector<1x80xbf16>
    %c4_321 = arith.constant 4 : index
    %c0_322 = arith.constant 0 : index
    %c0_323 = arith.constant 0 : index
    %376 = vector.load %arg6[%c4_321, %c0_322, %c0_323] : memref<5x80x128xbf16, #tpu.memory_space<vmem>>, vector<1x80x128xbf16>
    %377 = vector.shape_cast %376 : vector<1x80x128xbf16> to vector<80x128xbf16>
    %cst_324 = arith.constant dense<0.000000e+00> : vector<1x128xf32>
    %378 = tpu.matmul %375, %377, %cst_324 {dimension_numbers = #tpu.dot_dimension_numbers<[1], [0], [0], [1], [0, 0, 1, 1], [], []>} : vector<1x80xbf16>, vector<80x128xbf16>, vector<1x128xf32> -> vector<1x128xf32>
    %379 = arith.addf %374, %378 : vector<1x128xf32>
    %c0_325 = arith.constant 0 : index
    %c0_326 = arith.constant 0 : index
    %380 = vector.load %arg7[%c0_325, %c0_326] : memref<1x128xf32, #tpu.memory_space<vmem>>, vector<1x128xf32>
    %381 = arith.addf %379, %380 : vector<1x128xf32>
    %cst_327 = arith.constant 0.000000e+00 : f32
    %382 = vector.broadcast %cst_327 : f32 to vector<1x128xf32>
    %383 = arith.maximumf %381, %382 : vector<1x128xf32>
    %384 = arith.truncf %383 : vector<1x128xf32> to vector<1x128xbf16>
    %c0_328 = arith.constant 0 : index
    %c0_329 = arith.constant 0 : index
    %385 = vector.load %arg8[%c0_328, %c0_329] : memref<128x128xbf16, #tpu.memory_space<vmem>>, vector<128x128xbf16>
    %cst_330 = arith.constant dense<0.000000e+00> : vector<1x128xf32>
    %386 = tpu.matmul %384, %385, %cst_330 {dimension_numbers = #tpu.dot_dimension_numbers<[1], [0], [0], [1], [0, 0, 1, 1], [], []>} : vector<1x128xbf16>, vector<128x128xbf16>, vector<1x128xf32> -> vector<1x128xf32>
    %c0_331 = arith.constant 0 : index
    %c0_332 = arith.constant 0 : index
    %387 = vector.load %arg9[%c0_331, %c0_332] : memref<1x128xf32, #tpu.memory_space<vmem>>, vector<1x128xf32>
    %388 = arith.addf %386, %387 : vector<1x128xf32>
    %cst_333 = arith.constant 0.000000e+00 : f32
    %389 = vector.broadcast %cst_333 : f32 to vector<1x128xf32>
    %390 = arith.maximumf %388, %389 : vector<1x128xf32>
    %391 = arith.truncf %390 : vector<1x128xf32> to vector<1x128xbf16>
    %c0_334 = arith.constant 0 : index
    %c0_335 = arith.constant 0 : index
    %392 = vector.load %arg10[%c0_334, %c0_335] : memref<128x128xbf16, #tpu.memory_space<vmem>>, vector<128x128xbf16>
    %cst_336 = arith.constant dense<0.000000e+00> : vector<1x128xf32>
    %393 = tpu.matmul %391, %392, %cst_336 {dimension_numbers = #tpu.dot_dimension_numbers<[1], [0], [0], [1], [0, 0, 1, 1], [], []>} : vector<1x128xbf16>, vector<128x128xbf16>, vector<1x128xf32> -> vector<1x128xf32>
    %c0_337 = arith.constant 0 : index
    %c0_338 = arith.constant 0 : index
    %394 = vector.load %arg11[%c0_337, %c0_338] : memref<1x128xf32, #tpu.memory_space<vmem>>, vector<1x128xf32>
    %395 = arith.addf %393, %394 : vector<1x128xf32>
    %c0_339 = arith.constant 0 : index
    %c0_340 = arith.constant 0 : index
    %c0_341 = arith.constant 0 : index
    %396 = vector.load %arg12[%c0_339, %c0_340, %c0_341] : memref<1x1x128xf32, #tpu.memory_space<vmem>>, vector<1x1x128xf32>
    %397 = vector.shape_cast %396 : vector<1x1x128xf32> to vector<1x128xf32>
    %398 = vector.shape_cast %395 : vector<1x128xf32> to vector<1x1x128xf32>
    tpu.vector_store %arg12[%c0_339, %c0_340, %c0_341], %398 {strides = array<i32>} : memref<1x1x128xf32, #tpu.memory_space<vmem>>, vector<1x1x128xf32>,
    return
  }
  func.func @transform_0(%arg0: i32) -> (i32, i32, i32, i32) {
    %c0_i32 = arith.constant 0 : i32
    %c0_i32_0 = arith.constant 0 : i32
    %c0_i32_1 = arith.constant 0 : i32
    %c0_i32_2 = arith.constant 0 : i32
    return %arg0, %c0_i32, %c0_i32_0, %c0_i32_1 : i32, i32, i32, i32
  }
  func.func @transform_1(%arg0: i32) -> (i32, i32, i32, i32) {
    %c0_i32 = arith.constant 0 : i32
    %c0_i32_0 = arith.constant 0 : i32
    %c0_i32_1 = arith.constant 0 : i32
    %c0_i32_2 = arith.constant 0 : i32
    %c0_i32_3 = arith.constant 0 : i32
    return %c0_i32, %c0_i32_0, %c0_i32_1, %c0_i32_2 : i32, i32, i32, i32
  }
  func.func @transform_2(%arg0: i32) -> (i32, i32) {
    %c0_i32 = arith.constant 0 : i32
    %c0_i32_0 = arith.constant 0 : i32
    %c0_i32_1 = arith.constant 0 : i32
    return %c0_i32, %c0_i32_0 : i32, i32
  }
  func.func @transform_3(%arg0: i32) -> (i32, i32, i32, i32) {
    %c0_i32 = arith.constant 0 : i32
    %c0_i32_0 = arith.constant 0 : i32
    %c0_i32_1 = arith.constant 0 : i32
    %c0_i32_2 = arith.constant 0 : i32
    %c0_i32_3 = arith.constant 0 : i32
    return %c0_i32, %c0_i32_0, %c0_i32_1, %c0_i32_2 : i32, i32, i32, i32
  }
  func.func @transform_4(%arg0: i32) -> (i32, i32) {
    %c0_i32 = arith.constant 0 : i32
    %c0_i32_0 = arith.constant 0 : i32
    %c0_i32_1 = arith.constant 0 : i32
    return %c0_i32, %c0_i32_0 : i32, i32
  }
  func.func @transform_5(%arg0: i32) -> (i32, i32, i32) {
    %c0_i32 = arith.constant 0 : i32
    %c0_i32_0 = arith.constant 0 : i32
    %c0_i32_1 = arith.constant 0 : i32
    %c0_i32_2 = arith.constant 0 : i32
    return %c0_i32, %c0_i32_0, %c0_i32_1 : i32, i32, i32
  }
  func.func @transform_6(%arg0: i32) -> (i32, i32) {
    %c0_i32 = arith.constant 0 : i32
    %c0_i32_0 = arith.constant 0 : i32
    %c0_i32_1 = arith.constant 0 : i32
    return %c0_i32, %c0_i32_0 : i32, i32
  }
  func.func @transform_7(%arg0: i32) -> (i32, i32) {
    %c0_i32 = arith.constant 0 : i32
    %c0_i32_0 = arith.constant 0 : i32
    %c0_i32_1 = arith.constant 0 : i32
    return %c0_i32, %c0_i32_0 : i32, i32
  }
  func.func @transform_8(%arg0: i32) -> (i32, i32) {
    %c0_i32 = arith.constant 0 : i32
    %c0_i32_0 = arith.constant 0 : i32
    %c0_i32_1 = arith.constant 0 : i32
    return %c0_i32, %c0_i32_0 : i32, i32
  }
  func.func @transform_9(%arg0: i32) -> (i32, i32) {
    %c0_i32 = arith.constant 0 : i32
    %c0_i32_0 = arith.constant 0 : i32
    %c0_i32_1 = arith.constant 0 : i32
    return %c0_i32, %c0_i32_0 : i32, i32
  }
  func.func @transform_10(%arg0: i32) -> (i32, i32) {
    %c0_i32 = arith.constant 0 : i32
    %c0_i32_0 = arith.constant 0 : i32
    %c0_i32_1 = arith.constant 0 : i32
    return %c0_i32, %c0_i32_0 : i32, i32
  }
  func.func @transform_11(%arg0: i32) -> (i32, i32, i32) {
    %c0_i32 = arith.constant 0 : i32
    %c0_i32_0 = arith.constant 0 : i32
    %c0_i32_1 = arith.constant 0 : i32
    return %arg0, %c0_i32, %c0_i32_0 : i32, i32, i32
  }
}

</mosaic_0001>

<bundles_post_ra>
// kernel: net_forward.1
= control target key start
LH: loop header
LB: loop body
LE: loop exit
PB: predicated region body
PF: predicated region fallthrough
CT: control target
= control target key end

     0   :  { %16 = vsyncpa [#allocation3], 0  ;;  %s9508_s0 = inlined_call_operand.vmem [shape: bf16[2,4,8,96], index: 0, kind: input, shape index: {}]   ;;  %s9509_s1 = inlined_call_operand.vmem [shape: bf16[5,2,96,112], index: 1, kind: input, shape index: {}]   ;;  %s9510_s2 = inlined_call_operand.vmem [shape: f32[1,112], index: 2, kind: input, shape index: {}]   ;;  %s9511_s3 = inlined_call_operand.vmem [shape: bf16[5,2,112,80], index: 3, kind: input, shape index: {}]   ;;  %s9512_s4 = inlined_call_operand.vmem [shape: f32[1,80], index: 4, kind: input, shape index: {}]   ;;  %s9513_s5 = inlined_call_operand.vmem [shape: bf16[5,80,128], index: 5, kind: input, shape index: {}]   ;;  %s9514_s6 = inlined_call_operand.vmem [shape: f32[1,128], index: 6, kind: input, shape index: {}]   ;;  %s9515_s7 = inlined_call_operand.vmem [shape: bf16[128,128], index: 7, kind: input, shape index: {}]   ;;  %s9516_s8 = inlined_call_operand.vmem [shape: f32[1,128], index: 8, kind: input, shape index: {}]   ;;  %s9517_s9 = inlined_call_operand.vmem [shape: bf16[128,128], index: 9, kind: input, shape index: {}]   ;;  %s9518_s10 = inlined_call_operand.vmem [shape: f32[1,128], index: 10, kind: input, shape index: {}]   ;;  %s9519_s11 = inlined_call_operand.hbm [shape: f32[2,1,128], index: 11, kind: output, shape index: {}]  }
   0x1   :  { %18 = vsyncpa [#allocation3 + $0x1], 0  ;;  %s7257_s17 = smov 0   ;;  %s7259_s18 = smov 0  }
   0x2   :  { %s7261_s19 = smov 0   ;;  %s7263_s20 = smov 0  }
   0x3 LB: > { %s7278_s21 = sadd.s32 4294967295, %s7192_s20   ;;  %s4729_s22 = sadd.s32 4294967294, %s7192_s20   ;;  %s7192_s20 = sphi %s7263_s20, %s9582_s20   ;;  %s7188_s19 = sphi %s7261_s19, %s9581_s19   ;;  %s7184_s18 = sphi %s7259_s18, %s9580_s18   ;;  %s7180_s17 = sphi %s7257_s17, %s9579_s17  }
   0x4   : > { %s7282_s23 = sadd.s32 1, %s7192_s20   ;;  %s267_s24 = sadd.s32 1, %s7188_s19 }
   0x5   : > { %s264_s25 = ssub.s32 %s7192_s20, %s7282_s23  ;;  %p277_p0 = scmp.ne.s32.totalorder %s7188_s19, %s7184_s18 }
   0x6   : > { %p265_p1 = scmp.eq.s32.totalorder %s264_s25, 0  ;;  %p278_p2 = scmp.eq.s32.totalorder %s7278_s21, 1 }
   0x7   : > { %p283_p3 = scmp.ne.s32.totalorder %s7184_s18, %s7180_s17  ;;  %p284_p4 = scmp.eq.s32.totalorder %s4729_s22, 1 }
   0x8   : > { %s7293_s26 = scalar_select %p265_p1, %s7188_s19, %s267_s24  }
   0x9   : > { %p7295_p5 = por %p278_p2, %p277_p0  ;;  %p7299_p6 = por %p284_p4, %p283_p3 }
   0xa   : > { %9538 = sst [smem:[#allocation5_spill]] %s7293_s26  ;;  %p4732_p7 = scmp.ge.s32.totalorder %s7192_s20, 1 }
   0xb   : > { %p340_p8 = scmp.lt.s32.totalorder %s7192_s20, 3 }
   0xd   : > { %p341_p9 = pnand %p4732_p7, %p340_p8 }
   0xf   : > { %344 = sbr.rel (%p341_p9) target bundleno = 1814 (0x716), region = 64 }
  0x14   : > { %v6894_v0 = vld [vmem:[%s9509_s1 + $0x88] sm:$0xff]   ;;  %v7194_v1 = vmov 0.0   ;;  %v6896_v3 = vld [vmem:[%s9509_s1 + $0x80] sm:$0xff]   ;;  %vm7195_vm0 = vmmov 0   ;;  %v6898_v5 = vld [vmem:[%s9509_s1 + $0x78] sm:$0xff]   ;;  %p379_p10 = scmp.lt.s32.totalorder %s7278_s21, 1 }
  0x15   : > { %5743 = vmatprep.subr.bf16.mxu0 %v7194_v1  ;;  %5759 = vmatprep.subr.bf16.mxu1 %v7194_v1  ;;  %v6895_v2 = vld [vmem:[%s9509_s1 + $0x28] sm:$0xff]   ;;  %v6897_v4 = vld [vmem:[%s9509_s1 + $0x20] sm:$0xff]   ;;  %v6899_v6 = vld [vmem:[%s9509_s1 + $0x18] sm:$0xff]   ;;  %vm451_vm1 = vcmask 785408   ;;  %vm2658_vm2 = vcmask 916480   ;;  %vm4069_vm3 = vcmask 654336  }
  0x16   : > { %5744 = vmatpush3.bf16.msra.mxu0 %v6894_v0  ;;  %5755 = vmatprep.mubr.msk.bf16.mxu0 %vm7195_vm0, %v7194_v1  ;;  %v6900_v7 = vld [vmem:[%s9509_s1 + $0x70] sm:$0xff]   ;;  %s380_s14 = scalar_select %p379_p10, %s7278_s21, 1  ;;  %v6902_v9 = vld [vmem:[%s9509_s1 + $0x68] sm:$0xff]   ;;  %v6904_v11 = vld [vmem:[%s9509_s1 + $0x60] sm:$0xff]  }
  0x17   : > { %5760 = vmatpush3.bf16.msra.mxu1 %v6895_v2  ;;  %5745 = vmatprep.subr.bf16.mxu0 %v7194_v1  ;;  %v6901_v8 = vld [vmem:[%s9509_s1 + $0x10] sm:$0xff]   ;;  %v6903_v10 = vld [vmem:[%s9509_s1 + $0x8] sm:$0xff]   ;;  %v7363_v12 = vld [vmem:[%s9509_s1] sm:$0xff]   ;;  %s377_s15 = sand.u32 1, %s7184_s18   ;;  %s5251_s22 = sshll.u32 %s7278_s21, 4 }
  0x18   : > { %5761 = vmatprep.subr.bf16.mxu1 %v7194_v1  ;;  %5771 = vmatprep.mubr.msk.bf16.mxu1 %vm7195_vm0, %v7194_v1  ;;  %s5254_s25 = sshll.u32 %s380_s14, 4  ;;  %v7375_v15 = vld [vmem:[%s9509_s1 + $0xe8] sm:$0xff]   ;;  %v7393_v17 = vld [vmem:[%s9509_s1 + $0xe0] sm:$0xff]   ;;  %v7411_v19 = vld [vmem:[%s9509_s1 + $0xd8] sm:$0xff]   ;;  %s378_s24 = scalar_lea.vmem [#allocation2], %s377_s15 }
  0x19   : > { %s7357_s26 = scalar_lea.vmem %s9508_s0, %s5254_s25  ;;  %v7382_v16 = vld [vmem:[%s9509_s1 + $0x148] sm:$0xff]   ;;  %v7400_v18 = vld [vmem:[%s9509_s1 + $0x140] sm:$0xff]   ;;  %v7418_v20 = vld [vmem:[%s9509_s1 + $0x138] sm:$0xff]   ;;  %s4674_s25 = sshll.u32 %s378_s24, 4  ;;  %s9469_s25 = int_to_ptr.vmem [resolvable:$true] %s4674_s25 }
  0x1a   : > { %5746 = vmatpush3.bf16.msra.mxu0 %v6896_v3  ;;  %v7367_v13 = vld [vmem:[%s7357_s26 + $0x4] sm:$0xf]  ;;  %v7370_v14 = vld [vmem:[%s7357_s26] sm:$0xf]  ;;  %v7425_v21 = vld [vmem:[%s9509_s1 + $0xd0] sm:$0xff]   ;;  %s4662_s12 = scalar_lea.sflag [#allocation3], %s377_s15 }
  0x1b   : > { %5762 = vmatpush3.bf16.msra.mxu1 %v6897_v4  ;;  %5747 = vmatprep.subr.bf16.mxu0 %v7194_v1  ;;  %v7432_v22 = vld [vmem:[%s9509_s1 + $0x130] sm:$0xff]   ;;  %v7439_v23 = vld [vmem:[%s9509_s1 + $0xc8] sm:$0xff]   ;;  %v7453_v25 = vld [vmem:[%s9509_s1 + $0xc0] sm:$0xff]   ;;  %v4811_v33 = vcombine.low %v7370_v14, %v7370_v14  ;;  %s7132_s13 = scalar_lea.vmem %s9469_s25, 16  ;;  %s7196_s21 = smov [#allocation2]  }
  0x1c   : > { %5763 = vmatprep.subr.bf16.mxu1 %v7194_v1  ;;  %v7446_v24 = vld [vmem:[%s9509_s1 + $0x128] sm:$0xff]   ;;  %v7460_v26 = vld [vmem:[%s9509_s1 + $0x120] sm:$0xff]   ;;  %v7480_v30 = vld [vmem:[%s9509_s1 + $0xb8] sm:$0xff]   ;;  %p7133_p11 = scmp.ne.s32.totalorder %s9469_s25, %s7132_s13  ;;  %s7136_s16 = sshll.u32 %s7196_s21, 4  ;;  %s7137_s16 = int_to_ptr.vmem [resolvable:$false] %s7136_s16 }
  0x1d   : > { %v7464_v27 = vld [vmem:[%s7357_s26 + $0xc] sm:$0xf]  ;;  %v7467_v28 = vld [vmem:[%s7357_s26 + $0x8] sm:$0xf]  ;;  %v7491_v31 = vld [vmem:[%s9509_s1 + $0x1a0] sm:$0xff]   ;;  %v779_v36 = vshll.u32 %v4811_v33, 16  ;;  %p7139_p0 = scmp.lt.s32.totalorder %s9469_s25, %s7137_s16 }
  0x1e   : > { %5748 = vmatpush3.bf16.msra.mxu0 %v6898_v5  ;;  %v7473_v29 = vld [vmem:[%s9509_s1 + $0x1a8] sm:$0xff]   ;;  %v7498_v32 = vld [vmem:[%s9509_s1 + $0xb0] sm:$0xff]   ;;  %v7511_v34 = vld [vmem:[%s9509_s1 + $0x198] sm:$0xff]   ;;  %v777_v39 = vshrl.u32 %v4811_v33, 16  ;;  %p7134_p12 = pnand %p7133_p11, %p7295_p5  ;;  %s7138_s14 = scalar_lea.vmem %s7137_s16, 32 }
  0x1f   : > { %5764 = vmatpush3.bf16.msra.mxu1 %v6899_v6  ;;  %5749 = vmatprep.subr.bf16.mxu0 %v7194_v1  ;;  %v7518_v35 = vld [vmem:[%s9509_s1 + $0xa8] sm:$0xff]   ;;  %v7525_v37 = vld [vmem:[%s9509_s1 + $0x190] sm:$0xff]   ;;  %v7532_v38 = vld [vmem:[%s9509_s1 + $0xa0] sm:$0xff]   ;;  %v781_v41 = vrot.slane %v779_v36, 1  ;;  %p7140_p1 = scmp.lt.s32.totalorder %s7138_s14, %s7132_s13 }
  0x20   : > { %5765 = vmatprep.subr.bf16.mxu1 %v7194_v1  ;;  %v7538_v40 = vld [vmem:[%s9509_s1 + $0x188] sm:$0xff]   ;;  %v7543_v42 = vld [vmem:[%s9509_s1 + $0x98] sm:$0xff]   ;;  %v7552_v43 = vld [vmem:[%s9509_s1 + $0x180] sm:$0xff]   ;;  %p7135_p13 = pneg %p7134_p12 }
  0x21   : > { %v7557_v44 = vld [vmem:[%s9509_s1 + $0x90] sm:$0xff]   ;;  %v7566_v45 = vld [vmem:[%s9509_s1 + $0x58] sm:$0xff]   ;;  %v7568_v46 = vor.u32 %v781_v41, %v777_v39  ;;  %v7600_v50 = vld [vmem:[%s9509_s1 + $0x48] sm:$0xff]   ;;  %p7141_p2 = por %p7140_p1, %p7139_p0 }
  0x22   : > { %5750 = vmatpush3.bf16.msra.mxu0 %v6900_v7  ;;  %v7573_v47 = vld [vmem:[%s9509_s1 + $0x118] sm:$0xff]   ;;  %v7582_v48 = vld [vmem:[%s9509_s1 + $0x50] sm:$0xff]   ;;  %v7607_v51 = vld [vmem:[%s9509_s1 + $0x108] sm:$0xff]  }
  0x23   : > { %5766 = vmatpush3.bf16.msra.mxu1 %v6901_v8  ;;  %5751 = vmatprep.subr.bf16.mxu0 %v7194_v1  ;;  %v7589_v49 = vld [vmem:[%s9509_s1 + $0x110] sm:$0xff]   ;;  %v7618_v52 = vld [vmem:[%s9509_s1 + $0x40] sm:$0xff]   ;;  %v7632_v54 = vld [vmem:[%s9509_s1 + $0x38] sm:$0xff]   ;;  %p7142_p3 = pnand %p7141_p2, %p7135_p13 }
  0x24   : > { %5767 = vmatprep.subr.bf16.mxu1 %v7194_v1  ;;  %v7623_v53 = vld [vmem:[%s9509_s1 + $0x100] sm:$0xff]   ;;  %v7637_v55 = vld [vmem:[%s9509_s1 + $0xf8] sm:$0xff]   ;;  %v7646_v56 = vld [vmem:[%s9509_s1 + $0x30] sm:$0xff]  }
  0x25   : > { %v7651_v57 = vld [vmem:[%s9509_s1 + $0xf0] sm:$0xff]   ;;  %v7660_v58 = vld [vmem:[%s9509_s1 + $0x178] sm:$0xff]   ;;  %v7692_v62 = vld [vmem:[%s9509_s1 + $0x168] sm:$0xff]  }
  0x26   : > { %5752 = vmatpush3.bf16.msra.mxu0 %v6902_v9  ;;  %v7665_v59 = vld [vmem:[%s9509_s1 + $0x1d8] sm:$0xff]   ;;  %v7674_v60 = vld [vmem:[%s9509_s1 + $0x170] sm:$0xff]   ;;  %v7699_v63 = vld [vmem:[%s9509_s1 + $0x1c8] sm:$0xff]  }
  0x27   : > { %5768 = vmatpush3.bf16.msra.mxu1 %v6903_v10  ;;  %5753 = vmatprep.subr.bf16.mxu0 %v7194_v1  ;;  %v7681_v61 = vld [vmem:[%s9509_s1 + $0x1d0] sm:$0xff]   ;;  %v7710_v0 = vld [vmem:[%s9509_s1 + $0x160] sm:$0xff]   ;;  %v7724_v3 = vld [vmem:[%s9509_s1 + $0x158] sm:$0xff]  }
  0x28   : > { %5769 = vmatprep.subr.bf16.mxu1 %v7194_v1  ;;  %v7715_v2 = vld [vmem:[%s9509_s1 + $0x1c0] sm:$0xff]   ;;  %v7729_v4 = vld [vmem:[%s9509_s1 + $0x1b8] sm:$0xff]   ;;  %v7738_v5 = vld [vmem:[%s9509_s1 + $0x150] sm:$0xff]  }
  0x29   : > { %v7743_v6 = vld [vmem:[%s9509_s1 + $0x1b0] sm:$0xff]   ;;  %v7760_v7 = vld [vmem:[%s9509_s1 + $0x88] sm:$0xff]   ;;  %v7778_v9 = vld [vmem:[%s9509_s1 + $0x80] sm:$0xff]  }
  0x2a   : > { %5754 = vmatpush3.bf16.msra.mxu0 %v6904_v11  ;;  %v7766_v8 = vld [vmem:[%s9509_s1 + $0x28] sm:$0xff]   ;;  %v7784_v10 = vld [vmem:[%s9509_s1 + $0x20] sm:$0xff]   ;;  %v7792_v11 = vld [vmem:[%s9509_s1 + $0x78] sm:$0xff]  }
  0x2b   : > { %5770 = vmatpush3.bf16.msra.mxu1 %v7363_v12  ;;  %5775 = vmatprep.subr.bf16.mxu0 %v7194_v1  ;;  %v7806_v33 = vld [vmem:[%s9509_s1 + $0x70] sm:$0xff]   ;;  %v7820_v39 = vld [vmem:[%s9509_s1 + $0x68] sm:$0xff]  }
  0x2c   : > { %5791 = vmatprep.subr.bf16.mxu1 %v7194_v1  ;;  %v7812_v36 = vld [vmem:[%s9509_s1 + $0x10] sm:$0xff]   ;;  %v7826_v41 = vld [vmem:[%s9509_s1 + $0x8] sm:$0xff]  }
  0x2d   : > { %5756 = vmatmul.mubr.msk.bf16.vlgmr.msra.gmra.mxu0 %vm451_vm1, %v7367_v13  ;;  %9541 = vst [vmem:[#allocation6_spill] sm:$0xff] %v7812_v36 }
  0x2e   : > { %5772 = vmatmul.mubr.msk.bf16.vlgmr.msra.gmra.mxu1 %vm451_vm1, %v7370_v14  ;;  %5776 = vmatpush3.bf16.msra.mxu0 %v7375_v15 }
  0x2f   : > { %5792 = vmatpush3.bf16.msra.mxu1 %v7382_v16  ;;  %5777 = vmatprep.subr.bf16.mxu0 %v7194_v1 }
  0x30   : > { %5793 = vmatprep.subr.bf16.mxu1 %v7194_v1  ;;  %5787 = vmatprep.mubr.msk.bf16.mxu0 %vm7195_vm0, %v7194_v1 }
  0x31   : > { %5803 = vmatprep.mubr.msk.bf16.mxu1 %vm7195_vm0, %v7194_v1 }
  0x32   : > { %5778 = vmatpush3.bf16.msra.mxu0 %v7393_v17 }
  0x33   : > { %5794 = vmatpush3.bf16.msra.mxu1 %v7400_v18  ;;  %5779 = vmatprep.subr.bf16.mxu0 %v7194_v1 }
  0x34   : > { %5795 = vmatprep.subr.bf16.mxu1 %v7194_v1 }
  0x36   : > { %5780 = vmatpush3.bf16.msra.mxu0 %v7411_v19 }
  0x37   : > { %5796 = vmatpush3.bf16.msra.mxu1 %v7418_v20  ;;  %5781 = vmatprep.subr.bf16.mxu0 %v7194_v1 }
  0x38   : > { %5797 = vmatprep.subr.bf16.mxu1 %v7194_v1 }
  0x3a   : > { %5782 = vmatpush3.bf16.msra.mxu0 %v7425_v21 }
  0x3b   : > { %5798 = vmatpush3.bf16.msra.mxu1 %v7432_v22  ;;  %5783 = vmatprep.subr.bf16.mxu0 %v7194_v1 }
  0x3c   : > { %5799 = vmatprep.subr.bf16.mxu1 %v7194_v1 }
  0x3e   : > { %5784 = vmatpush3.bf16.msra.mxu0 %v7439_v23 }
  0x3f   : > { %5800 = vmatpush3.bf16.msra.mxu1 %v7446_v24  ;;  %5785 = vmatprep.subr.bf16.mxu0 %v7194_v1 }
  0x40   : > { %5801 = vmatprep.subr.bf16.mxu1 %v7194_v1 }
  0x42   : > { %5786 = vmatpush3.bf16.msra.mxu0 %v7453_v25 }
  0x43   : > { %5802 = vmatpush3.bf16.msra.mxu1 %v7460_v26  ;;  %5807 = vmatprep.subr.bf16.mxu0 %v7194_v1 }
  0x44   : > { %5823 = vmatprep.subr.bf16.mxu1 %v7194_v1 }
  0x45   : > { %5788 = vmatmul.mubr.msk.bf16.vlgmr.msra.gmra.mxu0 %vm451_vm1, %v7467_v28 }
  0x46   : > { %5804 = vmatmul.mubr.msk.bf16.vlgmr.msra.gmra.mxu1 %vm451_vm1, %v7464_v27  ;;  %5808 = vmatpush3.bf16.msra.mxu0 %v7473_v29 }
  0x47   : > { %5824 = vmatpush3.bf16.msra.mxu1 %v7480_v30  ;;  %5809 = vmatprep.subr.bf16.mxu0 %v7194_v1 }
  0x48   : > { %5825 = vmatprep.subr.bf16.mxu1 %v7194_v1  ;;  %5819 = vmatprep.mubr.msk.bf16.mxu0 %vm7195_vm0, %v7194_v1 }
  0x49   : > { %5835 = vmatprep.mubr.msk.bf16.mxu1 %vm7195_vm0, %v7194_v1 }
  0x4a   : > { %5810 = vmatpush3.bf16.msra.mxu0 %v7491_v31 }
  0x4b   : > { %5826 = vmatpush3.bf16.msra.mxu1 %v7498_v32  ;;  %5811 = vmatprep.subr.bf16.mxu0 %v7194_v1 }
  0x4c   : > { %5827 = vmatprep.subr.bf16.mxu1 %v7194_v1 }
  0x4e   : > { %5812 = vmatpush3.bf16.msra.mxu0 %v7511_v34 }
  0x4f   : > { %5828 = vmatpush3.bf16.msra.mxu1 %v7518_v35  ;;  %5813 = vmatprep.subr.bf16.mxu0 %v7194_v1 }
  0x50   : > { %5829 = vmatprep.subr.bf16.mxu1 %v7194_v1 }
  0x52   : > { %5814 = vmatpush3.bf16.msra.mxu0 %v7525_v37 }
  0x53   : > { %5830 = vmatpush3.bf16.msra.mxu1 %v7532_v38  ;;  %5815 = vmatprep.subr.bf16.mxu0 %v7194_v1 }
  0x54   : > { %5831 = vmatprep.subr.bf16.mxu1 %v7194_v1 }
  0x56   : > { %5816 = vmatpush3.bf16.msra.mxu0 %v7538_v40 }
  0x57   : > { %5832 = vmatpush3.bf16.msra.mxu1 %v7543_v42  ;;  %5817 = vmatprep.subr.bf16.mxu0 %v7194_v1 }
  0x58   : > { %5833 = vmatprep.subr.bf16.mxu1 %v7194_v1 }
  0x5a   : > { %5818 = vmatpush3.bf16.msra.mxu0 %v7552_v43 }
  0x5b   : > { %5834 = vmatpush3.bf16.msra.mxu1 %v7557_v44  ;;  %5839 = vmatprep.subr.bf16.mxu0 %v7194_v1 }
  0x5c   : > { %5855 = vmatprep.subr.bf16.mxu1 %v7194_v1 }
  0x5d   : > { %5820 = vmatmul.mubr.msk.bf16.vlgmr.msra.gmra.mxu0 %vm451_vm1, %v7568_v46 }
  0x5e   : > { %5836 = vmatmul.mubr.msk.bf16.vlgmr.msra.gmra.mxu1 %vm451_vm1, %v7367_v13  ;;  %5840 = vmatpush3.bf16.msra.mxu0 %v7566_v45 }
  0x5f   : > { %5856 = vmatpush3.bf16.msra.mxu1 %v7573_v47  ;;  %5841 = vmatprep.subr.bf16.mxu0 %v7194_v1 }
  0x60   : > { %5857 = vmatprep.subr.bf16.mxu1 %v7194_v1  ;;  %5851 = vmatprep.mubr.msk.bf16.mxu0 %vm7195_vm0, %v7194_v1 }
  0x61   : > { %5867 = vmatprep.mubr.msk.bf16.mxu1 %vm7195_vm0, %v7194_v1 }
  0x62   : > { %5842 = vmatpush3.bf16.msra.mxu0 %v7582_v48 }
  0x63   : > { %5858 = vmatpush3.bf16.msra.mxu1 %v7589_v49  ;;  %5843 = vmatprep.subr.bf16.mxu0 %v7194_v1 }
  0x64   : > { %5859 = vmatprep.subr.bf16.mxu1 %v7194_v1 }
  0x66   : > { %5844 = vmatpush3.bf16.msra.mxu0 %v7600_v50 }
  0x67   : > { %5860 = vmatpush3.bf16.msra.mxu1 %v7607_v51  ;;  %5845 = vmatprep.subr.bf16.mxu0 %v7194_v1 }
  0x68   : > { %5861 = vmatprep.subr.bf16.mxu1 %v7194_v1 }
  0x6a   : > { %5846 = vmatpush3.bf16.msra.mxu0 %v7618_v52 }
  0x6b   : > { %5862 = vmatpush3.bf16.msra.mxu1 %v7623_v53  ;;  %5847 = vmatprep.subr.bf16.mxu0 %v7194_v1 }
  0x6c   : > { %5863 = vmatprep.subr.bf16.mxu1 %v7194_v1 }
  0x6e   : > { %5848 = vmatpush3.bf16.msra.mxu0 %v7632_v54 }
  0x6f   : > { %5864 = vmatpush3.bf16.msra.mxu1 %v7637_v55  ;;  %5849 = vmatprep.subr.bf16.mxu0 %v7194_v1 }
  0x70   : > { %5865 = vmatprep.subr.bf16.mxu1 %v7194_v1 }
  0x72   : > { %5850 = vmatpush3.bf16.msra.mxu0 %v7646_v56 }
  0x73   : > { %5866 = vmatpush3.bf16.msra.mxu1 %v7651_v57  ;;  %5871 = vmatprep.subr.bf16.mxu0 %v7194_v1 }
  0x74   : > { %5887 = vmatprep.subr.bf16.mxu1 %v7194_v1 }
  0x75   : > { %5852 = vmatmul.mubr.msk.bf16.vlgmr.msra.gmra.mxu0 %vm451_vm1, %v7370_v14  ;;  %v7798_v14 = vld [vmem:[%s9509_s1 + $0x18] sm:$0xff]  }
  0x76   : > { %5868 = vmatmul.mubr.msk.bf16.vlgmr.msra.gmra.mxu1 %vm451_vm1, %v7467_v28  ;;  %5872 = vmatpush3.bf16.msra.mxu0 %v7660_v58 }
  0x77   : > { %5888 = vmatpush3.bf16.msra.mxu1 %v7665_v59  ;;  %5873 = vmatprep.subr.bf16.mxu0 %v7194_v1 }
  0x78   : > { %5889 = vmatprep.subr.bf16.mxu1 %v7194_v1  ;;  %5883 = vmatprep.mubr.msk.bf16.mxu0 %vm7195_vm0, %v7194_v1 }
  0x79   : > { %5899 = vmatprep.mubr.msk.bf16.mxu1 %vm7195_vm0, %v7194_v1 }
  0x7a   : > { %5874 = vmatpush3.bf16.msra.mxu0 %v7674_v60 }
  0x7b   : > { %5890 = vmatpush3.bf16.msra.mxu1 %v7681_v61  ;;  %5875 = vmatprep.subr.bf16.mxu0 %v7194_v1 }
  0x7c   : > { %5891 = vmatprep.subr.bf16.mxu1 %v7194_v1 }
  0x7e   : > { %5876 = vmatpush3.bf16.msra.mxu0 %v7692_v62 }
  0x7f   : > { %5892 = vmatpush3.bf16.msra.mxu1 %v7699_v63  ;;  %5877 = vmatprep.subr.bf16.mxu0 %v7194_v1 }
  0x80   : > { %5893 = vmatprep.subr.bf16.mxu1 %v7194_v1 }
  0x82   : > { %5878 = vmatpush3.bf16.msra.mxu0 %v7710_v0 }
  0x83   : > { %5894 = vmatpush3.bf16.msra.mxu1 %v7715_v2  ;;  %5879 = vmatprep.subr.bf16.mxu0 %v7194_v1 }
  0x84   : > { %5895 = vmatprep.subr.bf16.mxu1 %v7194_v1 }
  0x86   : > { %5880 = vmatpush3.bf16.msra.mxu0 %v7724_v3 }
  0x87   : > { %5896 = vmatpush3.bf16.msra.mxu1 %v7729_v4  ;;  %5881 = vmatprep.subr.bf16.mxu0 %v7194_v1 }
  0x88   : > { %5897 = vmatprep.subr.bf16.mxu1 %v7194_v1 }
  0x8a   : > { %5882 = vmatpush3.bf16.msra.mxu0 %v7738_v5 }
  0x8b   : > { %5898 = vmatpush3.bf16.msra.mxu1 %v7743_v6  ;;  %5903 = vmatprep.subr.bf16.mxu0 %v7194_v1 }
  0x8c   : > { %5919 = vmatprep.subr.bf16.mxu1 %v7194_v1 }
  0x8d   : > { %5884 = vmatmul.mubr.msk.bf16.vlgmr.msra.gmra.mxu0 %vm451_vm1, %v7464_v27 }
  0x8e   : > { %5900 = vmatmul.mubr.msk.bf16.vlgmr.msra.gmra.mxu1 %vm451_vm1, %v7568_v46  ;;  %5904 = vmatpush3.bf16.msra.mxu0 %v7760_v7 }
  0x8f   : > { %5920 = vmatpush3.bf16.msra.mxu1 %v7766_v8  ;;  %5905 = vmatprep.subr.bf16.mxu0 %v7194_v1 }
  0x90   : > { %5921 = vmatprep.subr.bf16.mxu1 %v7194_v1  ;;  %5915 = vmatprep.mubr.msk.bf16.mxu0 %vm7195_vm0, %v7194_v1 }
  0x91   : > { %5931 = vmatprep.mubr.msk.bf16.mxu1 %vm7195_vm0, %v7194_v1 }
  0x92   : > { %5906 = vmatpush3.bf16.msra.mxu0 %v7778_v9 }
  0x93   : > { %5922 = vmatpush3.bf16.msra.mxu1 %v7784_v10  ;;  %5907 = vmatprep.subr.bf16.mxu0 %v7194_v1 }
  0x94   : > { %5923 = vmatprep.subr.bf16.mxu1 %v7194_v1 }
  0x96   : > { %5908 = vmatpush3.bf16.msra.mxu0 %v7792_v11 }
  0x97   : > { %5924 = vmatpush3.bf16.msra.mxu1 %v7798_v14  ;;  %5909 = vmatprep.subr.bf16.mxu0 %v7194_v1 }
  0x98   : > { %5925 = vmatprep.subr.bf16.mxu1 %v7194_v1 }
  0x9a   : > { %5910 = vmatpush3.bf16.msra.mxu0 %v7806_v33 }
  0x9b   : > { %5926 = vmatpush3.bf16.msra.mxu1 %v7812_v36  ;;  %5911 = vmatprep.subr.bf16.mxu0 %v7194_v1  ;;  %v7834_v36 = vld [vmem:[%s9509_s1 + $0x60] sm:$0xff]  }
  0x9c   : > { %5927 = vmatprep.subr.bf16.mxu1 %v7194_v1 }
  0x9e   : > { %5912 = vmatpush3.bf16.msra.mxu0 %v7820_v39 }
  0x9f   : > { %5928 = vmatpush3.bf16.msra.mxu1 %v7826_v41  ;;  %5913 = vmatprep.subr.bf16.mxu0 %v7194_v1 }
  0xa0   : > { %5929 = vmatprep.subr.bf16.mxu1 %v7194_v1 }
  0xa2   : > { %5914 = vmatpush3.bf16.msra.mxu0 %v7834_v36 }
  0xa3   : > { %5930 = vmatpush3.bf16.msra.mxu1 %v7363_v12  ;;  %5935 = vmatprep.subr.bf16.mxu0 %v7194_v1  ;;  %v7080_v12 = vld [vmem:[%s7357_s26 + $0x4] sm:$0xf] }
  0xa4   : > { %5951 = vmatprep.subr.bf16.mxu1 %v7194_v1 }
  0xa5   : > { %5916 = vmatmul.mubr.msk.bf16.vlgmr.msra.gmra.mxu0 %vm451_vm1, %v7467_v28 }
  0xa6   : > { %5932 = vmatmul.mubr.msk.bf16.vlgmr.msra.gmra.mxu1 %vm451_vm1, %v7367_v13  ;;  %5936 = vmatpush3.bf16.msra.mxu0 %v7375_v15  ;;  %v4918_v13 = vcombine.low %v7080_v12, %v7080_v12 }
  0xa7   : > { %5952 = vmatpush3.bf16.msra.mxu1 %v7382_v16  ;;  %5937 = vmatprep.subr.bf16.mxu0 %v7194_v1 }
  0xa8   : > { %5953 = vmatprep.subr.bf16.mxu1 %v7194_v1  ;;  %5947 = vmatprep.mubr.msk.bf16.mxu0 %vm7195_vm0, %v7194_v1  ;;  %v1480_v15 = vshll.u32 %v4918_v13, 16  ;;  %v1478_v16 = vshrl.u32 %v4918_v13, 16  ;;  %v8046_v13 = vld [vmem:[%s9509_s1 + $0x140] sm:$0xff]  }
  0xa9   : > { %5963 = vmatprep.mubr.msk.bf16.mxu1 %vm7195_vm0, %v7194_v1 }
  0xaa   : > { %5938 = vmatpush3.bf16.msra.mxu0 %v7393_v17  ;;  %v1482_v17 = vrot.slane %v1480_v15, 1 }
  0xab   : > { %5954 = vmatpush3.bf16.msra.mxu1 %v7400_v18  ;;  %5939 = vmatprep.subr.bf16.mxu0 %v7194_v1 }
  0xac   : > { %5955 = vmatprep.subr.bf16.mxu1 %v7194_v1  ;;  %v7901_v18 = vor.u32 %v1482_v17, %v1478_v16  ;;  %v8054_v17 = vld [vmem:[%s9509_s1 + $0xd8] sm:$0xff]  }
  0xae   : > { %5940 = vmatpush3.bf16.msra.mxu0 %v7411_v19 }
  0xaf   : > { %5956 = vmatpush3.bf16.msra.mxu1 %v7418_v20  ;;  %5941 = vmatprep.subr.bf16.mxu0 %v7194_v1 }
  0xb0   : > { %5957 = vmatprep.subr.bf16.mxu1 %v7194_v1 }
  0xb2   : > { %5942 = vmatpush3.bf16.msra.mxu0 %v7425_v21 }
  0xb3   : > { %5958 = vmatpush3.bf16.msra.mxu1 %v7432_v22  ;;  %5943 = vmatprep.subr.bf16.mxu0 %v7194_v1 }
  0xb4   : > { %5959 = vmatprep.subr.bf16.mxu1 %v7194_v1 }
  0xb6   : > { %5944 = vmatpush3.bf16.msra.mxu0 %v7439_v23 }
  0xb7   : > { %5960 = vmatpush3.bf16.msra.mxu1 %v7446_v24  ;;  %5945 = vmatprep.subr.bf16.mxu0 %v7194_v1 }
  0xb8   : > { %5961 = vmatprep.subr.bf16.mxu1 %v7194_v1 }
  0xba   : > { %5946 = vmatpush3.bf16.msra.mxu0 %v7453_v25 }
  0xbb   : > { %5962 = vmatpush3.bf16.msra.mxu1 %v7460_v26  ;;  %5967 = vmatprep.subr.bf16.mxu0 %v7194_v1 }
  0xbc   : > { %5983 = vmatprep.subr.bf16.mxu1 %v7194_v1 }
  0xbd   : > { %5948 = vmatmul.mubr.msk.bf16.vlgmr.msra.gmra.mxu0 %vm451_vm1, %v7464_v27 }
  0xbe   : > { %5964 = vmatmul.mubr.msk.bf16.vlgmr.msra.gmra.mxu1 %vm451_vm1, %v7568_v46  ;;  %5968 = vmatpush3.bf16.msra.mxu0 %v7473_v29 }
  0xbf   : > { %5984 = vmatpush3.bf16.msra.mxu1 %v7480_v30  ;;  %5969 = vmatprep.subr.bf16.mxu0 %v7194_v1 }
  0xc0   : > { %5985 = vmatprep.subr.bf16.mxu1 %v7194_v1  ;;  %5979 = vmatprep.mubr.msk.bf16.mxu0 %vm7195_vm0, %v7194_v1 }
  0xc1   : > { %5995 = vmatprep.mubr.msk.bf16.mxu1 %vm7195_vm0, %v7194_v1 }
  0xc2   : > { %5970 = vmatpush3.bf16.msra.mxu0 %v7491_v31 }
  0xc3   : > { %5986 = vmatpush3.bf16.msra.mxu1 %v7498_v32  ;;  %5971 = vmatprep.subr.bf16.mxu0 %v7194_v1 }
  0xc4   : > { %5987 = vmatprep.subr.bf16.mxu1 %v7194_v1 }
  0xc6   : > { %5972 = vmatpush3.bf16.msra.mxu0 %v7511_v34 }
  0xc7   : > { %5988 = vmatpush3.bf16.msra.mxu1 %v7518_v35  ;;  %5973 = vmatprep.subr.bf16.mxu0 %v7194_v1 }
  0xc8   : > { %5989 = vmatprep.subr.bf16.mxu1 %v7194_v1 }
  0xca   : > { %5974 = vmatpush3.bf16.msra.mxu0 %v7525_v37 }
  0xcb   : > { %5990 = vmatpush3.bf16.msra.mxu1 %v7532_v38  ;;  %5975 = vmatprep.subr.bf16.mxu0 %v7194_v1 }
  0xcc   : > { %5991 = vmatprep.subr.bf16.mxu1 %v7194_v1 }
  0xce   : > { %5976 = vmatpush3.bf16.msra.mxu0 %v7538_v40 }
  0xcf   : > { %5992 = vmatpush3.bf16.msra.mxu1 %v7543_v42  ;;  %5977 = vmatprep.subr.bf16.mxu0 %v7194_v1  ;;  %v9542_v42 = vld [vmem:[#allocation6_spill] sm:$0xff] }
  0xd0   : > { %5993 = vmatprep.subr.bf16.mxu1 %v7194_v1 }
  0xd2   : > { %5978 = vmatpush3.bf16.msra.mxu0 %v7552_v43  ;;  %v8002_v43 = vld [vmem:[%s9509_s1] sm:$0xff]  }
  0xd3   : > { %5994 = vmatpush3.bf16.msra.mxu1 %v7557_v44  ;;  %5999 = vmatprep.subr.bf16.mxu0 %v7194_v1 }
  0xd4   : > { %6015 = vmatprep.subr.bf16.mxu1 %v7194_v1 }
  0xd5   : > { %5980 = vmatmul.mubr.msk.bf16.vlgmr.msra.gmra.mxu0 %vm451_vm1, %v7901_v18 }
  0xd6   : > { %5996 = vmatmul.mubr.msk.bf16.vlgmr.msra.gmra.mxu1 %vm451_vm1, %v7467_v28  ;;  %6000 = vmatpush3.bf16.msra.mxu0 %v7566_v45  ;;  %v8008_v45 = vld [vmem:[%s7357_s26 + $0xc] sm:$0xf] }
  0xd7   : > { %6016 = vmatpush3.bf16.msra.mxu1 %v7573_v47  ;;  %6001 = vmatprep.subr.bf16.mxu0 %v7194_v1 }
  0xd8   : > { %6017 = vmatprep.subr.bf16.mxu1 %v7194_v1  ;;  %6011 = vmatprep.mubr.msk.bf16.mxu0 %vm7195_vm0, %v7194_v1 }
  0xd9   : > { %6027 = vmatprep.mubr.msk.bf16.mxu1 %vm7195_vm0, %v7194_v1 }
  0xda   : > { %6002 = vmatpush3.bf16.msra.mxu0 %v7582_v48 }
  0xdb   : > { %6018 = vmatpush3.bf16.msra.mxu1 %v7589_v49  ;;  %6003 = vmatprep.subr.bf16.mxu0 %v7194_v1  ;;  %v8015_v49 = vld [vmem:[%s7357_s26 + $0x8] sm:$0xf]  ;;  %s9467_s26 = scalar_lea.hbm %s9519_s11, %s5251_s22 }
  0xdc   : > { %6019 = vmatprep.subr.bf16.mxu1 %v7194_v1 }
  0xde   : > { %6004 = vmatpush3.bf16.msra.mxu0 %v7600_v50  ;;  %v8022_v50 = vld [vmem:[%s9509_s1 + $0xe8] sm:$0xff]  }
  0xdf   : > { %6020 = vmatpush3.bf16.msra.mxu1 %v7607_v51  ;;  %6005 = vmatprep.subr.bf16.mxu0 %v7194_v1  ;;  %v8028_v51 = vld [vmem:[%s9509_s1 + $0x148] sm:$0xff]  }
  0xe0   : > { %6021 = vmatprep.subr.bf16.mxu1 %v7194_v1 }
  0xe2   : > { %6006 = vmatpush3.bf16.msra.mxu0 %v7618_v52 }
  0xe3   : > { %6022 = vmatpush3.bf16.msra.mxu1 %v7623_v53  ;;  %6007 = vmatprep.subr.bf16.mxu0 %v7194_v1 }
  0xe4   : > { %6023 = vmatprep.subr.bf16.mxu1 %v7194_v1 }
  0xe6   : > { %6008 = vmatpush3.bf16.msra.mxu0 %v7632_v54 }
  0xe7   : > { %6024 = vmatpush3.bf16.msra.mxu1 %v7637_v55  ;;  %6009 = vmatprep.subr.bf16.mxu0 %v7194_v1 }
  0xe8   : > { %6025 = vmatprep.subr.bf16.mxu1 %v7194_v1 }
  0xea   : > { %6010 = vmatpush3.bf16.msra.mxu0 %v7646_v56 }
  0xeb   : > { %6026 = vmatpush3.bf16.msra.mxu1 %v7651_v57  ;;  %6031 = vmatprep.subr.bf16.mxu0 %v7194_v1 }
  0xec   : > { %6047 = vmatprep.subr.bf16.mxu1 %v7194_v1 }
  0xed   : > { %v489_v19 = vpop.f32.mrf.mxu0  ;;  %6012 = vmatmul.mubr.msk.bf16.vlgmr.msra.gmra.mxu0 %vm451_vm1, %v7080_v12  ;;  %v8040_v12 = vld [vmem:[%s9509_s1 + $0xe0] sm:$0xff]  }
  0xee   : > { %v568_v20 = vpop.f32.mrf.mxu1  ;;  %6028 = vmatmul.mubr.msk.bf16.vlgmr.msra.gmra.mxu1 %vm451_vm1, %v7464_v27  ;;  %6032 = vmatpush3.bf16.msra.mxu0 %v7660_v58 }
  0xef   : > { %v569_v21 = vadd.f32 %v568_v20, %v489_v19  ;;  %6048 = vmatpush3.bf16.msra.mxu1 %v7665_v59  ;;  %v5757_v22 = vpop.f32.mrf.mxu0  ;;  %6033 = vmatprep.subr.bf16.mxu0 %v7194_v1  ;;  %v8060_v19 = vld [vmem:[%s9509_s1 + $0x138] sm:$0xff]   ;;  %v8068_v20 = vld [vmem:[%s9509_s1 + $0xd0] sm:$0xff]  }
  0xf0   : > { %v5773_v23 = vpop.f32.mrf.mxu1  ;;  %6049 = vmatprep.subr.bf16.mxu1 %v7194_v1  ;;  %6043 = vmatprep.mubr.msk.bf16.mxu0 %vm7195_vm0, %v7194_v1  ;;  %v8082_v22 = vld [vmem:[%s9509_s1 + $0xc8] sm:$0xff]  }
  0xf1   : > { %v492_v24 = vpop.f32.mrf.mxu0  ;;  %6059 = vmatprep.mubr.msk.bf16.mxu1 %vm7195_vm0, %v7194_v1  ;;  %v8088_v23 = vld [vmem:[%s9509_s1 + $0x128] sm:$0xff]  }
  0xf2   : > { %v571_v25 = vpop.f32.mrf.mxu1  ;;  %6034 = vmatpush3.bf16.msra.mxu0 %v7674_v60  ;;  %v8096_v24 = vld [vmem:[%s9509_s1 + $0xc0] sm:$0xff]  }
  0xf3   : > { %6050 = vmatpush3.bf16.msra.mxu1 %v7681_v61  ;;  %v5758_v26 = vpop.f32.mrf.mxu0  ;;  %6035 = vmatprep.subr.bf16.mxu0 %v7194_v1  ;;  %v8102_v25 = vld [vmem:[%s9509_s1 + $0x120] sm:$0xff]  }
  0xf4   : > { %v5774_v27 = vpop.f32.mrf.mxu1  ;;  %6051 = vmatprep.subr.bf16.mxu1 %v7194_v1 }
  0xf6   : > { %6036 = vmatpush3.bf16.msra.mxu0 %v7692_v62 }
  0xf7   : > { %6052 = vmatpush3.bf16.msra.mxu1 %v7699_v63  ;;  %6037 = vmatprep.subr.bf16.mxu0 %v7194_v1 }
  0xf8   : > { %6053 = vmatprep.subr.bf16.mxu1 %v7194_v1 }
  0xfa   : > { %6038 = vmatpush3.bf16.msra.mxu0 %v7710_v0 }
  0xfb   : > { %6054 = vmatpush3.bf16.msra.mxu1 %v7715_v2  ;;  %6039 = vmatprep.subr.bf16.mxu0 %v7194_v1 }
  0xfc   : > { %6055 = vmatprep.subr.bf16.mxu1 %v7194_v1 }
  0xfe   : > { %6040 = vmatpush3.bf16.msra.mxu0 %v7724_v3 }
  0xff   : > { %6056 = vmatpush3.bf16.msra.mxu1 %v7729_v4  ;;  %6041 = vmatprep.subr.bf16.mxu0 %v7194_v1 }
 0x100   : > { %6057 = vmatprep.subr.bf16.mxu1 %v7194_v1 }
 0x102   : > { %6042 = vmatpush3.bf16.msra.mxu0 %v7738_v5 }
 0x103   : > { %6058 = vmatpush3.bf16.msra.mxu1 %v7743_v6  ;;  %6063 = vmatprep.subr.bf16.mxu0 %v7194_v1 }
 0x104   : > { %6079 = vmatprep.subr.bf16.mxu1 %v7194_v1 }
 0x105   : > { %v660_v28 = vpop.f32.mrf.mxu0  ;;  %6044 = vmatmul.mubr.msk.bf16.vlgmr.msra.gmra.mxu0 %vm451_vm1, %v7568_v46 }
 0x106   : > { %v666_v29 = vadd.f32 %v660_v28, %v569_v21  ;;  %v753_v30 = vpop.f32.mrf.mxu1  ;;  %6060 = vmatmul.mubr.msk.bf16.vlgmr.msra.gmra.mxu1 %vm451_vm1, %v7901_v18  ;;  %6064 = vmatpush3.bf16.msra.mxu0 %v7760_v7  ;;  %v8074_v21 = vld [vmem:[%s9509_s1 + $0x130] sm:$0xff]  }
 0x107   : > { %6080 = vmatpush3.bf16.msra.mxu1 %v7766_v8  ;;  %v5789_v31 = vpop.f32.mrf.mxu0  ;;  %6065 = vmatprep.subr.bf16.mxu0 %v7194_v1 }
 0x108   : > { %v759_v32 = vadd.f32 %v753_v30, %v666_v29  ;;  %v5805_v34 = vpop.f32.mrf.mxu1  ;;  %6081 = vmatprep.subr.bf16.mxu1 %v7194_v1  ;;  %6075 = vmatprep.mubr.msk.bf16.mxu0 %vm7195_vm0, %v7194_v1  ;;  %v8114_v29 = vld [vmem:[%s9509_s1 + $0x1a8] sm:$0xff]   ;;  %v8120_v30 = vld [vmem:[%s9509_s1 + $0xb8] sm:$0xff]  }
 0x109   : > { %v663_v35 = vpop.f32.mrf.mxu0  ;;  %6091 = vmatprep.mubr.msk.bf16.mxu1 %vm7195_vm0, %v7194_v1 }
 0x10a   : > { %v756_v37 = vpop.f32.mrf.mxu1  ;;  %6066 = vmatpush3.bf16.msra.mxu0 %v7778_v9 }
 0x10b   : > { %6082 = vmatpush3.bf16.msra.mxu1 %v7784_v10  ;;  %v5790_v38 = vpop.f32.mrf.mxu0  ;;  %6067 = vmatprep.subr.bf16.mxu0 %v7194_v1 }
 0x10c   : > { %v5806_v40 = vpop.f32.mrf.mxu1  ;;  %6083 = vmatprep.subr.bf16.mxu1 %v7194_v1  ;;  %v8132_v38 = vld [vmem:[%s9509_s1 + $0x1a0] sm:$0xff]  }
 0x10d   : > { %v8138_v40 = vld [vmem:[%s9509_s1 + $0xb0] sm:$0xff]  }
 0x10e   : > { %6068 = vmatpush3.bf16.msra.mxu0 %v7792_v11 }
 0x10f   : > { %6084 = vmatpush3.bf16.msra.mxu1 %v7798_v14  ;;  %6069 = vmatprep.subr.bf16.mxu0 %v7194_v1 }
 0x110   : > { %6085 = vmatprep.subr.bf16.mxu1 %v7194_v1 }
 0x112   : > { %6070 = vmatpush3.bf16.msra.mxu0 %v7806_v33 }
 0x113   : > { %6086 = vmatpush3.bf16.msra.mxu1 %v9542_v42  ;;  %6071 = vmatprep.subr.bf16.mxu0 %v7194_v1 }
 0x114   : > { %6087 = vmatprep.subr.bf16.mxu1 %v7194_v1 }
 0x116   : > { %6072 = vmatpush3.bf16.msra.mxu0 %v7820_v39 }
 0x117   : > { %6088 = vmatpush3.bf16.msra.mxu1 %v7826_v41  ;;  %6073 = vmatprep.subr.bf16.mxu0 %v7194_v1 }
 0x118   : > { %6089 = vmatprep.subr.bf16.mxu1 %v7194_v1 }
 0x11a   : > { %6074 = vmatpush3.bf16.msra.mxu0 %v7834_v36 }
 0x11b   : > { %6090 = vmatpush3.bf16.msra.mxu1 %v8002_v43  ;;  %6095 = vmatprep.subr.bf16.mxu0 %v7194_v1 }
 0x11c   : > { %6111 = vmatprep.subr.bf16.mxu1 %v7194_v1 }
 0x11d   : > { %v856_v44 = vpop.f32.mrf.mxu0  ;;  %6076 = vmatmul.mubr.msk.bf16.vlgmr.msra.gmra.mxu0 %vm451_vm1, %v8008_v45 }
 0x11e   : > { %v8012_v47 = vadd.f32 %v856_v44, %v759_v32  ;;  %v959_v48 = vpop.f32.mrf.mxu1  ;;  %6092 = vmatmul.mubr.msk.bf16.vlgmr.msra.gmra.mxu1 %vm451_vm1, %v8015_v49  ;;  %6096 = vmatpush3.bf16.msra.mxu0 %v8022_v50 }
 0x11f   : > { %6112 = vmatpush3.bf16.msra.mxu1 %v8028_v51  ;;  %v5821_v52 = vpop.f32.mrf.mxu0  ;;  %6097 = vmatprep.subr.bf16.mxu0 %v7194_v1 }
 0x120   : > { %v5837_v53 = vpop.f32.mrf.mxu1  ;;  %6113 = vmatprep.subr.bf16.mxu1 %v7194_v1  ;;  %6107 = vmatprep.mubr.msk.bf16.mxu0 %vm7195_vm0, %v7194_v1  ;;  %v4930_v52 = vcombine.low %v8015_v49, %v8015_v49 }
 0x121   : > { %v859_v54 = vpop.f32.mrf.mxu0  ;;  %6123 = vmatprep.mubr.msk.bf16.mxu1 %vm7195_vm0, %v7194_v1  ;;  %v8148_v53 = vld [vmem:[%s9509_s1 + $0x198] sm:$0xff]  }
 0x122   : > { %v962_v55 = vpop.f32.mrf.mxu1  ;;  %6098 = vmatpush3.bf16.msra.mxu0 %v8040_v12  ;;  %v8154_v54 = vld [vmem:[%s9509_s1 + $0xa8] sm:$0xff]  }
 0x123   : > { %6114 = vmatpush3.bf16.msra.mxu1 %v8046_v13  ;;  %v5822_v15 = vpop.f32.mrf.mxu0  ;;  %6099 = vmatprep.subr.bf16.mxu0 %v7194_v1  ;;  %v1910_v55 = vshll.u32 %v4930_v52, 16 }
 0x124   : > { %v5838_v16 = vpop.f32.mrf.mxu1  ;;  %6115 = vmatprep.subr.bf16.mxu1 %v7194_v1  ;;  %v8162_v15 = vld [vmem:[%s9509_s1 + $0x190] sm:$0xff]  }
 0x125   : > { %v8168_v16 = vld [vmem:[%s9509_s1 + $0xa0] sm:$0xff]  }
 0x126   : > { %6100 = vmatpush3.bf16.msra.mxu0 %v8054_v17 }
 0x127   : > { %6116 = vmatpush3.bf16.msra.mxu1 %v8060_v19  ;;  %6101 = vmatprep.subr.bf16.mxu0 %v7194_v1 }
 0x128   : > { %6117 = vmatprep.subr.bf16.mxu1 %v7194_v1 }
 0x12a   : > { %6102 = vmatpush3.bf16.msra.mxu0 %v8068_v20 }
 0x12b   : > { %6118 = vmatpush3.bf16.msra.mxu1 %v8074_v21  ;;  %6103 = vmatprep.subr.bf16.mxu0 %v7194_v1 }
 0x12c   : > { %6119 = vmatprep.subr.bf16.mxu1 %v7194_v1 }
 0x12e   : > { %6104 = vmatpush3.bf16.msra.mxu0 %v8082_v22 }
 0x12f   : > { %6120 = vmatpush3.bf16.msra.mxu1 %v8088_v23  ;;  %6105 = vmatprep.subr.bf16.mxu0 %v7194_v1 }
 0x130   : > { %6121 = vmatprep.subr.bf16.mxu1 %v7194_v1 }
 0x132   : > { %6106 = vmatpush3.bf16.msra.mxu0 %v8096_v24 }
 0x133   : > { %6122 = vmatpush3.bf16.msra.mxu1 %v8102_v25  ;;  %6127 = vmatprep.subr.bf16.mxu0 %v7194_v1 }
 0x134   : > { %6143 = vmatprep.subr.bf16.mxu1 %v7194_v1 }
 0x135   : > { %v1035_v26 = vpop.f32.mrf.mxu0  ;;  %6108 = vmatmul.mubr.msk.bf16.vlgmr.msra.gmra.mxu0 %vm451_vm1, %v7568_v46 }
 0x136   : > { %v1036_v27 = vadd.f32 %v1035_v26, %v959_v48  ;;  %v1124_v28 = vpop.f32.mrf.mxu1  ;;  %6124 = vmatmul.mubr.msk.bf16.vlgmr.msra.gmra.mxu1 %vm451_vm1, %v7901_v18  ;;  %6128 = vmatpush3.bf16.msra.mxu0 %v8114_v29  ;;  %v1908_v26 = vshrl.u32 %v4930_v52, 16 }
 0x137   : > { %6144 = vmatpush3.bf16.msra.mxu1 %v8120_v30  ;;  %v5853_v31 = vpop.f32.mrf.mxu0  ;;  %6129 = vmatprep.subr.bf16.mxu0 %v7194_v1 }
 0x138   : > { %v1130_v32 = vadd.f32 %v1124_v28, %v1036_v27  ;;  %v5869_v34 = vpop.f32.mrf.mxu1  ;;  %6145 = vmatprep.subr.bf16.mxu1 %v7194_v1  ;;  %6139 = vmatprep.mubr.msk.bf16.mxu0 %vm7195_vm0, %v7194_v1  ;;  %v1912_v27 = vrot.slane %v1910_v55, 1  ;;  %v8176_v28 = vld [vmem:[%s9509_s1 + $0x188] sm:$0xff]   ;;  %v8182_v31 = vld [vmem:[%s9509_s1 + $0x98] sm:$0xff]  }
 0x139   : > { %v1038_v35 = vpop.f32.mrf.mxu0  ;;  %6155 = vmatprep.mubr.msk.bf16.mxu1 %vm7195_vm0, %v7194_v1  ;;  %v8210_v55 = vld [vmem:[%s9509_s1 + $0x58] sm:$0xff]  }
 0x13a   : > { %v1127_v37 = vpop.f32.mrf.mxu1  ;;  %6130 = vmatpush3.bf16.msra.mxu0 %v8132_v38  ;;  %v8187_v34 = vor.u32 %v1912_v27, %v1908_v26  ;;  %v8192_v35 = vld [vmem:[%s9509_s1 + $0x180] sm:$0xff]   ;;  %9545 = vst [vmem:[#allocation8_spill] sm:$0xff] %v8210_v55  ;;  %v8216_v26 = vld [vmem:[%s9509_s1 + $0x118] sm:$0xff]  }
 0x13b   : > { %6146 = vmatpush3.bf16.msra.mxu1 %v8138_v40  ;;  %v5854_v44 = vpop.f32.mrf.mxu0  ;;  %6131 = vmatprep.subr.bf16.mxu0 %v7194_v1  ;;  %9543 = vst [vmem:[#allocation6_spill] sm:$0xff] %v8192_v35  ;;  %v8198_v37 = vld [vmem:[%s9509_s1 + $0x90] sm:$0xff]  }
 0x13c   : > { %v5870_v48 = vpop.f32.mrf.mxu1  ;;  %6147 = vmatprep.subr.bf16.mxu1 %v7194_v1  ;;  %9544 = vst [vmem:[#allocation7_spill] sm:$0xff] %v8198_v37 }
 0x13e   : > { %6132 = vmatpush3.bf16.msra.mxu0 %v8148_v53 }
 0x13f   : > { %6148 = vmatpush3.bf16.msra.mxu1 %v8154_v54  ;;  %6133 = vmatprep.subr.bf16.mxu0 %v7194_v1 }
 0x140   : > { %6149 = vmatprep.subr.bf16.mxu1 %v7194_v1 }
 0x142   : > { %6134 = vmatpush3.bf16.msra.mxu0 %v8162_v15 }
 0x143   : > { %6150 = vmatpush3.bf16.msra.mxu1 %v8168_v16  ;;  %6135 = vmatprep.subr.bf16.mxu0 %v7194_v1 }
 0x144   : > { %6151 = vmatprep.subr.bf16.mxu1 %v7194_v1 }
 0x146   : > { %6136 = vmatpush3.bf16.msra.mxu0 %v8176_v28 }
 0x147   : > { %6152 = vmatpush3.bf16.msra.mxu1 %v8182_v31  ;;  %6137 = vmatprep.subr.bf16.mxu0 %v7194_v1 }
 0x148   : > { %6153 = vmatprep.subr.bf16.mxu1 %v7194_v1 }
 0x14a   : > { %6138 = vmatpush3.bf16.msra.mxu0 %v8192_v35 }
 0x14b   : > { %6154 = vmatpush3.bf16.msra.mxu1 %v8198_v37  ;;  %6159 = vmatprep.subr.bf16.mxu0 %v7194_v1 }
 0x14c   : > { %6175 = vmatprep.subr.bf16.mxu1 %v7194_v1 }
 0x14d   : > { %v1214_v44 = vpop.f32.mrf.mxu0  ;;  %6140 = vmatmul.mubr.msk.bf16.vlgmr.msra.gmra.mxu0 %vm451_vm1, %v8187_v34 }
 0x14e   : > { %v1220_v48 = vadd.f32 %v1214_v44, %v1130_v32  ;;  %v1304_v52 = vpop.f32.mrf.mxu1  ;;  %6156 = vmatmul.mubr.msk.bf16.vlgmr.msra.gmra.mxu1 %vm451_vm1, %v8008_v45  ;;  %6160 = vmatpush3.bf16.msra.mxu0 %v8210_v55  ;;  %v8274_v55 = vld [vmem:[%s9509_s1 + $0x38] sm:$0xff]  }
 0x14f   : > { %6176 = vmatpush3.bf16.msra.mxu1 %v8216_v26  ;;  %v5885_v27 = vpop.f32.mrf.mxu0  ;;  %6161 = vmatprep.subr.bf16.mxu0 %v7194_v1  ;;  %9549 = vst [vmem:[#allocation12_spill] sm:$0xff] %v8274_v55 }
 0x150   : > { %v8220_v32 = vadd.f32 %v1304_v52, %v1220_v48  ;;  %v5901_v44 = vpop.f32.mrf.mxu1  ;;  %6177 = vmatprep.subr.bf16.mxu1 %v7194_v1  ;;  %6171 = vmatprep.mubr.msk.bf16.mxu0 %vm7195_vm0, %v7194_v1  ;;  %v8232_v27 = vld [vmem:[%s9509_s1 + $0x50] sm:$0xff]  }
 0x151   : > { %v1217_v37 = vpop.f32.mrf.mxu0  ;;  %6187 = vmatprep.mubr.msk.bf16.mxu1 %vm7195_vm0, %v7194_v1  ;;  %v8238_v48 = vld [vmem:[%s9509_s1 + $0x110] sm:$0xff]   ;;  %v8252_v44 = vld [vmem:[%s9509_s1 + $0x108] sm:$0xff]  }
 0x152   : > { %v1307_v35 = vpop.f32.mrf.mxu1  ;;  %6162 = vmatpush3.bf16.msra.mxu0 %v8232_v27  ;;  %9546 = vst [vmem:[#allocation9_spill] sm:$0xff] %v8252_v44 }
 0x153   : > { %6178 = vmatpush3.bf16.msra.mxu1 %v8238_v48  ;;  %v5886_v37 = vpop.f32.mrf.mxu0  ;;  %6163 = vmatprep.subr.bf16.mxu0 %v7194_v1  ;;  %v8246_v35 = vld [vmem:[%s9509_s1 + $0x48] sm:$0xff]  }
 0x154   : > { %v5902_v52 = vpop.f32.mrf.mxu1  ;;  %6179 = vmatprep.subr.bf16.mxu1 %v7194_v1  ;;  %v8260_v37 = vld [vmem:[%s9509_s1 + $0x40] sm:$0xff]  }
 0x155   : > { %9547 = vst [vmem:[#allocation10_spill] sm:$0xff] %v8260_v37  ;;  %v8266_v52 = vld [vmem:[%s9509_s1 + $0x100] sm:$0xff]  }
 0x156   : > { %6164 = vmatpush3.bf16.msra.mxu0 %v8246_v35  ;;  %9548 = vst [vmem:[#allocation11_spill] sm:$0xff] %v8266_v52 }
 0x157   : > { %6180 = vmatpush3.bf16.msra.mxu1 %v8252_v44  ;;  %6165 = vmatprep.subr.bf16.mxu0 %v7194_v1 }
 0x158   : > { %6181 = vmatprep.subr.bf16.mxu1 %v7194_v1 }
 0x15a   : > { %6166 = vmatpush3.bf16.msra.mxu0 %v8260_v37  ;;  %v8280_v37 = vld [vmem:[%s9509_s1 + $0xf8] sm:$0xff]  }
 0x15b   : > { %6182 = vmatpush3.bf16.msra.mxu1 %v8266_v52  ;;  %6167 = vmatprep.subr.bf16.mxu0 %v7194_v1  ;;  %9550 = vst [vmem:[#allocation13_spill] sm:$0xff] %v8280_v37 }
 0x15c   : > { %6183 = vmatprep.subr.bf16.mxu1 %v7194_v1 }
 0x15e   : > { %6168 = vmatpush3.bf16.msra.mxu0 %v8274_v55 }
 0x15f   : > { %6184 = vmatpush3.bf16.msra.mxu1 %v8280_v37  ;;  %6169 = vmatprep.subr.bf16.mxu0 %v7194_v1 }
 0x160   : > { %6185 = vmatprep.subr.bf16.mxu1 %v7194_v1 }
 0x162   : > { %6170 = vmatpush3.bf16.msra.mxu0 %v7646_v56 }
 0x163   : > { %6186 = vmatpush3.bf16.msra.mxu1 %v7651_v57  ;;  %6191 = vmatprep.subr.bf16.mxu0 %v7194_v1 }
 0x164   : > { %6207 = vmatprep.subr.bf16.mxu1 %v7194_v1 }
 0x165   : > { %v1346_v55 = vpop.f32.mrf.mxu0  ;;  %6172 = vmatmul.mubr.msk.bf16.vlgmr.msra.gmra.mxu0 %vm451_vm1, %v8015_v49 }
 0x166   : > { %v1386_v52 = vpop.f32.mrf.mxu1  ;;  %6188 = vmatmul.mubr.msk.bf16.vlgmr.msra.gmra.mxu1 %vm451_vm1, %v7568_v46  ;;  %6192 = vmatpush3.bf16.msra.mxu0 %v7660_v58 }
 0x167   : > { %v1387_v37 = vadd.f32 %v1386_v52, %v1346_v55  ;;  %6208 = vmatpush3.bf16.msra.mxu1 %v7665_v59  ;;  %v5917_v56 = vpop.f32.mrf.mxu0  ;;  %6193 = vmatprep.subr.bf16.mxu0 %v7194_v1  ;;  %v9556_v52 = vld [vmem:[#allocation10_spill] sm:$0xff] }
 0x168   : > { %v5933_v57 = vpop.f32.mrf.mxu1  ;;  %6209 = vmatprep.subr.bf16.mxu1 %v7194_v1  ;;  %6203 = vmatprep.mubr.msk.bf16.mxu0 %vm7195_vm0, %v7194_v1  ;;  %v9557_v56 = vld [vmem:[#allocation11_spill] sm:$0xff] }
 0x169   : > { %v1349_v44 = vpop.f32.mrf.mxu0  ;;  %6219 = vmatprep.mubr.msk.bf16.mxu1 %vm7195_vm0, %v7194_v1  ;;  %v7119_v57 = vld [vmem:[%s9509_s1 + $0xf0] sm:$0xff]  }
 0x16a   : > { %v1389_v49 = vpop.f32.mrf.mxu1  ;;  %6194 = vmatpush3.bf16.msra.mxu0 %v7674_v60 }
 0x16b   : > { %6210 = vmatpush3.bf16.msra.mxu1 %v7681_v61  ;;  %v5918_v58 = vpop.f32.mrf.mxu0  ;;  %6195 = vmatprep.subr.bf16.mxu0 %v7194_v1 }
 0x16c   : > { %v5934_v59 = vpop.f32.mrf.mxu1  ;;  %6211 = vmatprep.subr.bf16.mxu1 %v7194_v1 }
 0x16d   : > { %v7120_v59 = vld [vmem:[%s9509_s1 + $0x178] sm:$0xff]  }
 0x16e   : > { %6196 = vmatpush3.bf16.msra.mxu0 %v7692_v62 }
 0x16f   : > { %6212 = vmatpush3.bf16.msra.mxu1 %v7699_v63  ;;  %6197 = vmatprep.subr.bf16.mxu0 %v7194_v1 }
 0x170   : > { %6213 = vmatprep.subr.bf16.mxu1 %v7194_v1 }
 0x172   : > { %6198 = vmatpush3.bf16.msra.mxu0 %v7710_v0 }
 0x173   : > { %6214 = vmatpush3.bf16.msra.mxu1 %v7715_v2  ;;  %6199 = vmatprep.subr.bf16.mxu0 %v7194_v1 }
 0x174   : > { %6215 = vmatprep.subr.bf16.mxu1 %v7194_v1 }
 0x176   : > { %6200 = vmatpush3.bf16.msra.mxu0 %v7724_v3 }
 0x177   : > { %6216 = vmatpush3.bf16.msra.mxu1 %v7729_v4  ;;  %6201 = vmatprep.subr.bf16.mxu0 %v7194_v1 }
 0x178   : > { %6217 = vmatprep.subr.bf16.mxu1 %v7194_v1 }
 0x17a   : > { %6202 = vmatpush3.bf16.msra.mxu0 %v7738_v5 }
 0x17b   : > { %6218 = vmatpush3.bf16.msra.mxu1 %v7743_v6  ;;  %6223 = vmatprep.subr.bf16.mxu0 %v7194_v1 }
 0x17c   : > { %6239 = vmatprep.subr.bf16.mxu1 %v7194_v1 }
 0x17d   : > { %v1426_v60 = vpop.f32.mrf.mxu0  ;;  %6204 = vmatmul.mubr.msk.bf16.vlgmr.msra.gmra.mxu0 %vm451_vm1, %v7901_v18 }
 0x17e   : > { %v1432_v61 = vadd.f32 %v1426_v60, %v1387_v37  ;;  %v1467_v62 = vpop.f32.mrf.mxu1  ;;  %6220 = vmatmul.mubr.msk.bf16.vlgmr.msra.gmra.mxu1 %vm451_vm1, %v8187_v34  ;;  %6224 = vmatpush3.bf16.msra.mxu0 %v7760_v7  ;;  %v9555_v37 = vld [vmem:[#allocation9_spill] sm:$0xff] }
 0x17f   : > { %6240 = vmatpush3.bf16.msra.mxu1 %v7766_v8  ;;  %v5949_v63 = vpop.f32.mrf.mxu0  ;;  %6225 = vmatprep.subr.bf16.mxu0 %v7194_v1 }
 0x180   : > { %v1473_v0 = vadd.f32 %v1467_v62, %v1432_v61  ;;  %v5965_v2 = vpop.f32.mrf.mxu1  ;;  %6241 = vmatprep.subr.bf16.mxu1 %v7194_v1  ;;  %6235 = vmatprep.mubr.msk.bf16.mxu0 %vm7195_vm0, %v7194_v1  ;;  %v7121_v61 = vld [vmem:[%s9509_s1 + $0x1d8] sm:$0xff]  }
 0x181   : > { %v1429_v3 = vpop.f32.mrf.mxu0  ;;  %6251 = vmatprep.mubr.msk.bf16.mxu1 %vm7195_vm0, %v7194_v1  ;;  %v7123_v2 = vld [vmem:[%s9509_s1 + $0x1d0] sm:$0xff]  }
 0x182   : > { %v1470_v4 = vpop.f32.mrf.mxu1  ;;  %6226 = vmatpush3.bf16.msra.mxu0 %v7778_v9 }
 0x183   : > { %6242 = vmatpush3.bf16.msra.mxu1 %v7784_v10  ;;  %v5950_v5 = vpop.f32.mrf.mxu0  ;;  %6227 = vmatprep.subr.bf16.mxu0 %v7194_v1 }
 0x184   : > { %v5966_v6 = vpop.f32.mrf.mxu1  ;;  %6243 = vmatprep.subr.bf16.mxu1 %v7194_v1  ;;  %v7124_v5 = vld [vmem:[%s9509_s1 + $0x168] sm:$0xff]  }
 0x185   : > { %v7125_v6 = vld [vmem:[%s9509_s1 + $0x1c8] sm:$0xff]  }
 0x186   : > { %6228 = vmatpush3.bf16.msra.mxu0 %v7792_v11  ;;  %v9551_v11 = vmax.f32 %v8012_v47, %v8220_v32 }
 0x187   : > { %6244 = vmatpush3.bf16.msra.mxu1 %v7798_v14  ;;  %6229 = vmatprep.subr.bf16.mxu0 %v7194_v1 }
 0x188   : > { %6245 = vmatprep.subr.bf16.mxu1 %v7194_v1 }
 0x18a   : > { %6230 = vmatpush3.bf16.msra.mxu0 %v7806_v33 }
 0x18b   : > { %6246 = vmatpush3.bf16.msra.mxu1 %v9542_v42  ;;  %6231 = vmatprep.subr.bf16.mxu0 %v7194_v1 }
 0x18c   : > { %6247 = vmatprep.subr.bf16.mxu1 %v7194_v1 }
 0x18e   : > { %6232 = vmatpush3.bf16.msra.mxu0 %v7820_v39 }
 0x18f   : > { %6248 = vmatpush3.bf16.msra.mxu1 %v7826_v41  ;;  %6233 = vmatprep.subr.bf16.mxu0 %v7194_v1 }
 0x190   : > { %6249 = vmatprep.subr.bf16.mxu1 %v7194_v1 }
 0x192   : > { %6234 = vmatpush3.bf16.msra.mxu0 %v7834_v36 }
 0x193   : > { %6250 = vmatpush3.bf16.msra.mxu1 %v8002_v43  ;;  %6255 = vmatprep.subr.bf16.mxu0 %v7194_v1 }
 0x194   : > { %6271 = vmatprep.subr.bf16.mxu1 %v7194_v1 }
 0x195   : > { %v1521_v7 = vpop.f32.mrf.mxu0  ;;  %6236 = vmatmul.mubr.msk.bf16.vlgmr.msra.gmra.mxu0 %vm451_vm1, %v7568_v46 }
 0x196   : > { %v1527_v8 = vadd.f32 %v1521_v7, %v1473_v0  ;;  %v1563_v9 = vpop.f32.mrf.mxu1  ;;  %6252 = vmatmul.mubr.msk.bf16.vlgmr.msra.gmra.mxu1 %vm451_vm1, %v8008_v45  ;;  %6256 = vmatpush3.bf16.msra.mxu0 %v8022_v50  ;;  %v7122_v0 = vld [vmem:[%s9509_s1 + $0x170] sm:$0xff]   ;;  %v7126_v7 = vld [vmem:[%s9509_s1 + $0x160] sm:$0xff]  }
 0x197   : > { %6272 = vmatpush3.bf16.msra.mxu1 %v8028_v51  ;;  %v5981_v10 = vpop.f32.mrf.mxu0  ;;  %6257 = vmatprep.subr.bf16.mxu0 %v7194_v1 }
 0x198   : > { %v8363_v14 = vmax.f32 %v9551_v11, %v1527_v8  ;;  %v5997_v33 = vpop.f32.mrf.mxu1  ;;  %6273 = vmatprep.subr.bf16.mxu1 %v7194_v1  ;;  %6267 = vmatprep.mubr.msk.bf16.mxu0 %vm7195_vm0, %v7194_v1  ;;  %v7127_v8 = vld [vmem:[%s9509_s1 + $0x1c0] sm:$0xff]   ;;  %v7129_v10 = vld [vmem:[%s9509_s1 + $0x1b8] sm:$0xff]   ;;  %v7130_v11 = vld [vmem:[%s9509_s1 + $0x150] sm:$0xff]  }
 0x199   : > { %v1524_v36 = vpop.f32.mrf.mxu0  ;;  %6283 = vmatprep.mubr.msk.bf16.mxu1 %vm7195_vm0, %v7194_v1  ;;  %v7131_v33 = vld [vmem:[%s9509_s1 + $0x1b0] sm:$0xff]  }
 0x19a   : > { %v1566_v39 = vpop.f32.mrf.mxu1  ;;  %6258 = vmatpush3.bf16.msra.mxu0 %v8040_v12  ;;  %v8523_v36 = vld [vmem:[%s9511_s3 + $0x30] sm:$0xff]  }
 0x19b   : > { %6274 = vmatpush3.bf16.msra.mxu1 %v8046_v13  ;;  %v5982_v41 = vpop.f32.mrf.mxu0  ;;  %6259 = vmatprep.subr.bf16.mxu0 %v7194_v1 }
 0x19c   : > { %v5998_v42 = vpop.f32.mrf.mxu1  ;;  %6275 = vmatprep.subr.bf16.mxu1 %v7194_v1 }
 0x19e   : > { %6260 = vmatpush3.bf16.msra.mxu0 %v8054_v17 }
 0x19f   : > { %6276 = vmatpush3.bf16.msra.mxu1 %v8060_v19  ;;  %6261 = vmatprep.subr.bf16.mxu0 %v7194_v1 }
 0x1a0   : > { %6277 = vmatprep.subr.bf16.mxu1 %v7194_v1 }
 0x1a2   : > { %6262 = vmatpush3.bf16.msra.mxu0 %v8068_v20 }
 0x1a3   : > { %6278 = vmatpush3.bf16.msra.mxu1 %v8074_v21  ;;  %6263 = vmatprep.subr.bf16.mxu0 %v7194_v1 }
 0x1a4   : > { %6279 = vmatprep.subr.bf16.mxu1 %v7194_v1 }
 0x1a6   : > { %6264 = vmatpush3.bf16.msra.mxu0 %v8082_v22  ;;  %v4941_v22 = vcombine.low %v8008_v45, %v8008_v45 }
 0x1a7   : > { %6280 = vmatpush3.bf16.msra.mxu1 %v8088_v23  ;;  %6265 = vmatprep.subr.bf16.mxu0 %v7194_v1 }
 0x1a8   : > { %6281 = vmatprep.subr.bf16.mxu1 %v7194_v1  ;;  %v2330_v23 = vshll.u32 %v4941_v22, 16 }
 0x1aa   : > { %6266 = vmatpush3.bf16.msra.mxu0 %v8096_v24  ;;  %v2328_v24 = vshrl.u32 %v4941_v22, 16  ;;  %v8566_v22 = vld [vmem:[%s9510_s2] ss:$0 sm:$0xff] }
 0x1ab   : > { %6282 = vmatpush3.bf16.msra.mxu1 %v8102_v25  ;;  %6287 = vmatprep.subr.bf16.mxu0 %v7194_v1  ;;  %v2332_v25 = vrot.slane %v2330_v23, 1  ;;  %v8572_v23 = vld [vmem:[%s9511_s3 + $0x8] sm:$0xff]  }
 0x1ac   : > { %6303 = vmatprep.subr.bf16.mxu1 %v7194_v1 }
 0x1ad   : > { %v1603_v43 = vpop.f32.mrf.mxu0  ;;  %6268 = vmatmul.mubr.msk.bf16.vlgmr.msra.gmra.mxu0 %vm451_vm1, %v7901_v18 }
 0x1ae   : > { %v1604_v47 = vadd.f32 %v1603_v43, %v1563_v9  ;;  %v1643_v50 = vpop.f32.mrf.mxu1  ;;  %6284 = vmatmul.mubr.msk.bf16.vlgmr.msra.gmra.mxu1 %vm451_vm1, %v8187_v34  ;;  %6288 = vmatpush3.bf16.msra.mxu0 %v8114_v29  ;;  %v8420_v29 = vor.u32 %v2332_v25, %v2328_v24  ;;  %v7128_v9 = vld [vmem:[%s9509_s1 + $0x158] sm:$0xff]   ;;  %v8583_v25 = vld [vmem:[%s9511_s3] sm:$0xff]  }
 0x1af   : > { %6304 = vmatpush3.bf16.msra.mxu1 %v8120_v30  ;;  %v6013_v51 = vpop.f32.mrf.mxu0  ;;  %6289 = vmatprep.subr.bf16.mxu0 %v7194_v1  ;;  %v9552_v30 = vld [vmem:[#allocation6_spill] sm:$0xff] }
 0x1b0   : > { %v1649_v12 = vadd.f32 %v1643_v50, %v1604_v47  ;;  %v6029_v13 = vpop.f32.mrf.mxu1  ;;  %6305 = vmatprep.subr.bf16.mxu1 %v7194_v1  ;;  %6299 = vmatprep.mubr.msk.bf16.mxu0 %vm7195_vm0, %v7194_v1  ;;  %v8537_v47 = vld [vmem:[%s9511_s3 + $0x28] sm:$0xff]  }
 0x1b1   : > { %v1606_v17 = vpop.f32.mrf.mxu0  ;;  %6315 = vmatprep.mubr.msk.bf16.mxu1 %vm7195_vm0, %v7194_v1 }
 0x1b2   : > { %v1646_v19 = vpop.f32.mrf.mxu1  ;;  %6290 = vmatpush3.bf16.msra.mxu0 %v8132_v38  ;;  %v9553_v38 = vld [vmem:[#allocation7_spill] sm:$0xff]  ;;  %v8546_v17 = vld [vmem:[%s9511_s3 + $0x20] sm:$0xff]  }
 0x1b3   : > { %6306 = vmatpush3.bf16.msra.mxu1 %v8138_v40  ;;  %v6014_v20 = vpop.f32.mrf.mxu0  ;;  %6291 = vmatprep.subr.bf16.mxu0 %v7194_v1 }
 0x1b4   : > { %v6030_v21 = vpop.f32.mrf.mxu1  ;;  %6307 = vmatprep.subr.bf16.mxu1 %v7194_v1  ;;  %v8553_v20 = vld [vmem:[%s9511_s3 + $0x18] sm:$0xff]  }
 0x1b5   : > { %v8560_v21 = vld [vmem:[%s9511_s3 + $0x10] sm:$0xff]  }
 0x1b6   : > { %6292 = vmatpush3.bf16.msra.mxu0 %v8148_v53 }
 0x1b7   : > { %6308 = vmatpush3.bf16.msra.mxu1 %v8154_v54  ;;  %6293 = vmatprep.subr.bf16.mxu0 %v7194_v1 }
 0x1b8   : > { %6309 = vmatprep.subr.bf16.mxu1 %v7194_v1 }
 0x1ba   : > { %6294 = vmatpush3.bf16.msra.mxu0 %v8162_v15  ;;  %v9554_v15 = vld [vmem:[#allocation8_spill] sm:$0xff] }
 0x1bb   : > { %6310 = vmatpush3.bf16.msra.mxu1 %v8168_v16  ;;  %6295 = vmatprep.subr.bf16.mxu0 %v7194_v1 }
 0x1bc   : > { %6311 = vmatprep.subr.bf16.mxu1 %v7194_v1 }
 0x1be   : > { %6296 = vmatpush3.bf16.msra.mxu0 %v8176_v28 }
 0x1bf   : > { %6312 = vmatpush3.bf16.msra.mxu1 %v8182_v31  ;;  %6297 = vmatprep.subr.bf16.mxu0 %v7194_v1 }
 0x1c0   : > { %6313 = vmatprep.subr.bf16.mxu1 %v7194_v1 }
 0x1c2   : > { %6298 = vmatpush3.bf16.msra.mxu0 %v9552_v30 }
 0x1c3   : > { %6314 = vmatpush3.bf16.msra.mxu1 %v9553_v38  ;;  %6319 = vmatprep.subr.bf16.mxu0 %v7194_v1 }
 0x1c4   : > { %6335 = vmatprep.subr.bf16.mxu1 %v7194_v1 }
 0x1c5   : > { %v1684_v40 = vpop.f32.mrf.mxu0  ;;  %6300 = vmatmul.mubr.msk.bf16.vlgmr.msra.gmra.mxu0 %vm451_vm1, %v8420_v29 }
 0x1c6   : > { %v1690_v53 = vadd.f32 %v1684_v40, %v1649_v12  ;;  %v1725_v54 = vpop.f32.mrf.mxu1  ;;  %6316 = vmatmul.mubr.msk.bf16.vlgmr.msra.gmra.mxu1 %vm451_vm1, %v7568_v46  ;;  %6320 = vmatpush3.bf16.msra.mxu0 %v9554_v15 }
 0x1c7   : > { %6336 = vmatpush3.bf16.msra.mxu1 %v8216_v26  ;;  %v6045_v16 = vpop.f32.mrf.mxu0  ;;  %6321 = vmatprep.subr.bf16.mxu0 %v7194_v1 }
 0x1c8   : > { %v8433_v28 = vadd.f32 %v1725_v54, %v1690_v53  ;;  %v6061_v31 = vpop.f32.mrf.mxu1  ;;  %6337 = vmatprep.subr.bf16.mxu1 %v7194_v1  ;;  %6331 = vmatprep.mubr.msk.bf16.mxu0 %vm7195_vm0, %v7194_v1 }
 0x1c9   : > { %v1687_v55 = vpop.f32.mrf.mxu0  ;;  %6347 = vmatprep.mubr.msk.bf16.mxu1 %vm7195_vm0, %v7194_v1 }
 0x1ca   : > { %v1732_v46 = vmax.f32 %v8363_v14, %v8433_v28  ;;  %v1728_v32 = vpop.f32.mrf.mxu1  ;;  %6322 = vmatpush3.bf16.msra.mxu0 %v8232_v27  ;;  %v9558_v27 = vld [vmem:[#allocation12_spill] sm:$0xff]  ;;  %v8599_v55 = vld [vmem:[%s9511_s3 + $0xa0] sm:$0xff]  }
 0x1cb   : > { %6338 = vmatpush3.bf16.msra.mxu1 %v8238_v48  ;;  %v6046_v26 = vpop.f32.mrf.mxu0  ;;  %6323 = vmatprep.subr.bf16.mxu0 %v7194_v1  ;;  %v9559_v48 = vld [vmem:[#allocation13_spill] sm:$0xff] }
 0x1cc   : > { %v6062_v44 = vpop.f32.mrf.mxu1  ;;  %6339 = vmatprep.subr.bf16.mxu1 %v7194_v1  ;;  %v1739_v24 = vadd.f32 %v8566_v22, %v1732_v46  ;;  %v8604_v46 = vld [vmem:[%s9511_s3 + $0x180] sm:$0xff]  }
 0x1ce   : > { %6324 = vmatpush3.bf16.msra.mxu0 %v8246_v35  ;;  %v7118_v35 = vld [vmem:[%s9509_s1 + $0x30] sm:$0xff]  }
 0x1cf   : > { %6340 = vmatpush3.bf16.msra.mxu1 %v9555_v37  ;;  %6325 = vmatprep.subr.bf16.mxu0 %v7194_v1  ;;  %v8610_v37 = vld [vmem:[%s9511_s3 + $0x98] sm:$0xff]  }
 0x1d0   : > { %6341 = vmatprep.subr.bf16.mxu1 %v7194_v1 }
 0x1d2   : > { %6326 = vmatpush3.bf16.msra.mxu0 %v9556_v52  ;;  %v8616_v52 = vld [vmem:[%s9511_s3 + $0x178] sm:$0xff]  }
 0x1d3   : > { %6342 = vmatpush3.bf16.msra.mxu1 %v9557_v56  ;;  %6327 = vmatprep.subr.bf16.mxu0 %v7194_v1 }
 0x1d4   : > { %6343 = vmatprep.subr.bf16.mxu1 %v7194_v1 }
 0x1d6   : > { %6328 = vmatpush3.bf16.msra.mxu0 %v9558_v27 }
 0x1d7   : > { %6344 = vmatpush3.bf16.msra.mxu1 %v9559_v48  ;;  %6329 = vmatprep.subr.bf16.mxu0 %v7194_v1 }
 0x1d8   : > { %6345 = vmatprep.subr.bf16.mxu1 %v7194_v1 }
 0x1da   : > { %6330 = vmatpush3.bf16.msra.mxu0 %v7118_v35 }
 0x1db   : > { %6346 = vmatpush3.bf16.msra.mxu1 %v7119_v57  ;;  %6351 = vmatprep.subr.bf16.mxu0 %v7194_v1 }
 0x1dc   : > { %6367 = vmatprep.subr.bf16.mxu1 %v7194_v1 }
 0x1dd   : > { %v1776_v49 = vpop.f32.mrf.mxu0  ;;  %6332 = vmatmul.mubr.msk.bf16.vlgmr.msra.gmra.mxu0 %vm451_vm1, %v8008_v45 }
 0x1de   : > { %v1816_v58 = vpop.f32.mrf.mxu1  ;;  %6348 = vmatmul.mubr.msk.bf16.vlgmr.msra.gmra.mxu1 %vm451_vm1, %v7901_v18  ;;  %6352 = vmatpush3.bf16.msra.mxu0 %v7120_v59 }
 0x1df   : > { %v1817_v60 = vadd.f32 %v1816_v58, %v1776_v49  ;;  %6368 = vmatpush3.bf16.msra.mxu1 %v7121_v61  ;;  %v6077_v62 = vpop.f32.mrf.mxu0  ;;  %6353 = vmatprep.subr.bf16.mxu0 %v7194_v1  ;;  %v8624_v49 = vld [vmem:[%s9511_s3 + $0x90] sm:$0xff]   ;;  %v8638_v61 = vld [vmem:[%s9511_s3 + $0x88] sm:$0xff]  }
 0x1e0   : > { %v6093_v63 = vpop.f32.mrf.mxu1  ;;  %6369 = vmatprep.subr.bf16.mxu1 %v7194_v1  ;;  %6363 = vmatprep.mubr.msk.bf16.mxu0 %vm7195_vm0, %v7194_v1  ;;  %v8630_v58 = vld [vmem:[%s9511_s3 + $0x170] sm:$0xff]   ;;  %v8648_v62 = vld [vmem:[%s9511_s3 + $0x80] sm:$0xff]  }
 0x1e1   : > { %v1779_v18 = vpop.f32.mrf.mxu0  ;;  %6379 = vmatprep.mubr.msk.bf16.mxu1 %vm7195_vm0, %v7194_v1  ;;  %v8654_v63 = vld [vmem:[%s9511_s3 + $0x168] sm:$0xff]  }
 0x1e2   : > { %v1819_v45 = vpop.f32.mrf.mxu1  ;;  %6354 = vmatpush3.bf16.msra.mxu0 %v7122_v0  ;;  %v8661_v18 = vld [vmem:[%s9511_s3 + $0x78] sm:$0xff]  }
 0x1e3   : > { %6370 = vmatpush3.bf16.msra.mxu1 %v7123_v2  ;;  %v6078_v3 = vpop.f32.mrf.mxu0  ;;  %6355 = vmatprep.subr.bf16.mxu0 %v7194_v1  ;;  %v8668_v45 = vld [vmem:[%s9511_s3 + $0x160] sm:$0xff]   ;;  %v8675_v2 = vld [vmem:[%s9511_s3 + $0x70] sm:$0xff]  }
 0x1e4   : > { %v6094_v4 = vpop.f32.mrf.mxu1  ;;  %6371 = vmatprep.subr.bf16.mxu1 %v7194_v1 }
 0x1e6   : > { %6356 = vmatpush3.bf16.msra.mxu0 %v7124_v5 }
 0x1e7   : > { %6372 = vmatpush3.bf16.msra.mxu1 %v7125_v6  ;;  %6357 = vmatprep.subr.bf16.mxu0 %v7194_v1  ;;  %v8682_v6 = vld [vmem:[%s9511_s3 + $0x158] sm:$0xff]  }
 0x1e8   : > { %6373 = vmatprep.subr.bf16.mxu1 %v7194_v1 }
 0x1ea   : > { %6358 = vmatpush3.bf16.msra.mxu0 %v7126_v7 }
 0x1eb   : > { %6374 = vmatpush3.bf16.msra.mxu1 %v7127_v8  ;;  %6359 = vmatprep.subr.bf16.mxu0 %v7194_v1 }
 0x1ec   : > { %6375 = vmatprep.subr.bf16.mxu1 %v7194_v1 }
 0x1ee   : > { %6360 = vmatpush3.bf16.msra.mxu0 %v7128_v9 }
 0x1ef   : > { %6376 = vmatpush3.bf16.msra.mxu1 %v7129_v10  ;;  %6361 = vmatprep.subr.bf16.mxu0 %v7194_v1 }
 0x1f0   : > { %6377 = vmatprep.subr.bf16.mxu1 %v7194_v1 }
 0x1f2   : > { %6362 = vmatpush3.bf16.msra.mxu0 %v7130_v11 }
 0x1f3   : > { %6378 = vmatpush3.bf16.msra.mxu1 %v7131_v33  ;;  %6383 = vmatprep.subr.bf16.mxu0 %v7194_v1 }
 0x1f4   : > { %6401 = vmatprep.subr.bf16.mxu1 %v7194_v1 }
 0x1f5   : > { %v1856_v39 = vpop.f32.mrf.mxu0  ;;  %6364 = vmatmul.mubr.msk.bf16.vlgmr.msra.gmra.mxu0 %vm451_vm1, %v8187_v34 }
 0x1f6   : > { %v1862_v41 = vadd.f32 %v1856_v39, %v1817_v60  ;;  %v1897_v42 = vpop.f32.mrf.mxu1  ;;  %6380 = vmatmul.mubr.msk.bf16.vlgmr.msra.gmra.mxu1 %vm451_vm1, %v8420_v29  ;;  %6397 = vmatprep.mubr.msk.bf16.mxu0 %vm7195_vm0, %v7194_v1  ;;  %v1740_v29 = vmax.f32 %v1739_v24, 0.0  ;;  %v8691_v39 = vld [vmem:[%s9511_s3 + $0x150] sm:$0xff]  }
 0x1f7   : > { %6402 = vmatpush3.bf16.msra.mxu1 %v8523_v36  ;;  %v6109_v43 = vpop.f32.mrf.mxu0  ;;  %6415 = vmatprep.mubr.msk.bf16.mxu1 %vm7195_vm0, %v7194_v1 }
 0x1f8   : > { %v1903_v34 = vadd.f32 %v1897_v42, %v1862_v41  ;;  %v6125_v50 = vpop.f32.mrf.mxu1  ;;  %6403 = vmatprep.subr.bf16.mxu1 %v7194_v1  ;;  %v8589_v53 = vpack.c.bf16 %v1740_v29, %v1740_v29  ;;  %6384 = vmatpush3.bf16.msra.mxu0 %v8599_v55 }
 0x1f9   : > { %v1859_v51 = vpop.f32.mrf.mxu0  ;;  %6385 = vmatprep.subr.bf16.mxu0 %v7194_v1 }
 0x1fa   : > { %v1900_v12 = vpop.f32.mrf.mxu1 }
 0x1fb   : > { %6404 = vmatpush3.bf16.msra.mxu1 %v8537_v47  ;;  %v6110_v13 = vpop.f32.mrf.mxu0 }
 0x1fc   : > { %v6126_v19 = vpop.f32.mrf.mxu1  ;;  %6405 = vmatprep.subr.bf16.mxu1 %v7194_v1  ;;  %6386 = vmatpush3.bf16.msra.mxu0 %v8610_v37 }
 0x1fd   : > { %6387 = vmatprep.subr.bf16.mxu0 %v7194_v1 }
 0x1ff   : > { %6406 = vmatpush3.bf16.msra.mxu1 %v8546_v17 }
 0x200   : > { %6407 = vmatprep.subr.bf16.mxu1 %v7194_v1  ;;  %6388 = vmatpush3.bf16.msra.mxu0 %v8624_v49 }
 0x201   : > { %6389 = vmatprep.subr.bf16.mxu0 %v7194_v1 }
 0x203   : > { %6408 = vmatpush3.bf16.msra.mxu1 %v8553_v20 }
 0x204   : > { %6409 = vmatprep.subr.bf16.mxu1 %v7194_v1  ;;  %6390 = vmatpush3.bf16.msra.mxu0 %v8638_v61 }
 0x205   : > { %6391 = vmatprep.subr.bf16.mxu0 %v7194_v1 }
 0x207   : > { %6410 = vmatpush3.bf16.msra.mxu1 %v8560_v21 }
 0x208   : > { %6411 = vmatprep.subr.bf16.mxu1 %v7194_v1  ;;  %6392 = vmatpush3.bf16.msra.mxu0 %v8648_v62 }
 0x209   : > { %6393 = vmatprep.subr.bf16.mxu0 %v7194_v1 }
 0x20b   : > { %6412 = vmatpush3.bf16.msra.mxu1 %v8572_v23 }
 0x20c   : > { %6413 = vmatprep.subr.bf16.mxu1 %v7194_v1  ;;  %6394 = vmatpush3.bf16.msra.mxu0 %v8661_v18 }
 0x20d   : > { %v1951_v30 = vpop.f32.mrf.mxu0  ;;  %6395 = vmatprep.subr.bf16.mxu0 %v7194_v1 }
 0x20e   : > { %v8586_v38 = vadd.f32 %v1951_v30, %v1903_v34  ;;  %v1992_v40 = vpop.f32.mrf.mxu1 }
 0x20f   : > { %6414 = vmatpush3.bf16.msra.mxu1 %v8583_v25  ;;  %v6141_v14 = vpop.f32.mrf.mxu0 }
 0x210   : > { %v6157_v54 = vpop.f32.mrf.mxu1  ;;  %6437 = vmatprep.subr.bf16.mxu1 %v7194_v1  ;;  %6396 = vmatpush3.bf16.msra.mxu0 %v8675_v2 }
 0x211   : > { %v1954_v15 = vpop.f32.mrf.mxu0  ;;  %6419 = vmatprep.subr.bf16.mxu0 %v7194_v1 }
 0x212   : > { %v1995_v16 = vpop.f32.mrf.mxu1  ;;  %6416 = vmatmul.mubr.msk.bf16.vlgmr.msra.gmra.mxu1 %vm2658_vm2, %v8589_v53 }
 0x213   : > { %v6142_v28 = vpop.f32.mrf.mxu0  ;;  %6451 = vmatprep.mubr.msk.bf16.mxu1 %vm7195_vm0, %v7194_v1  ;;  %6438 = vmatpush3.bf16.msra.mxu1 %v8604_v46 }
 0x214   : > { %v6158_v31 = vpop.f32.mrf.mxu1  ;;  %6439 = vmatprep.subr.bf16.mxu1 %v7194_v1 }
 0x217   : > { %6440 = vmatpush3.bf16.msra.mxu1 %v8616_v52 }
 0x218   : > { %6441 = vmatprep.subr.bf16.mxu1 %v7194_v1 }
 0x21b   : > { %6442 = vmatpush3.bf16.msra.mxu1 %v8630_v58 }
 0x21c   : > { %6443 = vmatprep.subr.bf16.mxu1 %v7194_v1 }
 0x21f   : > { %6444 = vmatpush3.bf16.msra.mxu1 %v8654_v63 }
 0x220   : > { %6445 = vmatprep.subr.bf16.mxu1 %v7194_v1 }
 0x223   : > { %6446 = vmatpush3.bf16.msra.mxu1 %v8668_v45 }
 0x224   : > { %6447 = vmatprep.subr.bf16.mxu1 %v7194_v1 }
 0x225   : > { %v2032_v32 = vpop.f32.mrf.mxu0 }
 0x226   : > { %v2033_v26 = vadd.f32 %v2032_v32, %v1992_v40  ;;  %v2072_v44 = vpop.f32.mrf.mxu1 }
 0x227   : > { %v6173_v56 = vpop.f32.mrf.mxu0  ;;  %6448 = vmatpush3.bf16.msra.mxu1 %v8682_v6 }
 0x228   : > { %v2078_v27 = vadd.f32 %v2072_v44, %v2033_v26  ;;  %v6189_v48 = vpop.f32.mrf.mxu1  ;;  %6449 = vmatprep.subr.bf16.mxu1 %v7194_v1 }
 0x229   : > { %v2035_v35 = vpop.f32.mrf.mxu0 }
 0x22a   : > { %v2075_v57 = vpop.f32.mrf.mxu1 }
 0x22b   : > { %v6174_v59 = vpop.f32.mrf.mxu0  ;;  %6450 = vmatpush3.bf16.msra.mxu1 %v8691_v39 }
 0x22c   : > { %v6190_v60 = vpop.f32.mrf.mxu1  ;;  %6473 = vmatprep.subr.bf16.mxu1 %v7194_v1 }
 0x23d   : > { %v2113_v0 = vpop.f32.mrf.mxu0 }
 0x23e   : > { %v2119_v3 = vadd.f32 %v2113_v0, %v2078_v27  ;;  %v2154_v4 = vpop.f32.mrf.mxu1 }
 0x23f   : > { %v6205_v5 = vpop.f32.mrf.mxu0 }
 0x240   : > { %v2160_v7 = vadd.f32 %v2154_v4, %v2119_v3  ;;  %v6221_v8 = vpop.f32.mrf.mxu1 }
 0x241   : > { %v2116_v9 = vpop.f32.mrf.mxu0 }
 0x242   : > { %v2161_v10 = vmax.f32 %v8586_v38, %v2160_v7  ;;  %v2157_v11 = vpop.f32.mrf.mxu1 }
 0x243   : > { %v6206_v33 = vpop.f32.mrf.mxu0 }
 0x244   : > { %v6222_v41 = vpop.f32.mrf.mxu1 }
 0x255   : > { %v2196_v42 = vpop.f32.mrf.mxu0 }
 0x256   : > { %v2236_v43 = vpop.f32.mrf.mxu1 }
 0x257   : > { %v2237_v34 = vadd.f32 %v2236_v43, %v2196_v42  ;;  %v6237_v50 = vpop.f32.mrf.mxu0 }
 0x258   : > { %v6253_v51 = vpop.f32.mrf.mxu1 }
 0x259   : > { %v2199_v12 = vpop.f32.mrf.mxu0 }
 0x25a   : > { %v2239_v13 = vpop.f32.mrf.mxu1 }
 0x25b   : > { %v6238_v19 = vpop.f32.mrf.mxu0 }
 0x25c   : > { %v6254_v24 = vpop.f32.mrf.mxu1 }
 0x26d   : > { %v2276_v29 = vpop.f32.mrf.mxu0 }
 0x26e   : > { %v2282_v30 = vadd.f32 %v2276_v29, %v2237_v34  ;;  %v2317_v38 = vpop.f32.mrf.mxu1 }
 0x26f   : > { %v6269_v40 = vpop.f32.mrf.mxu0 }
 0x270   : > { %v2323_v14 = vadd.f32 %v2317_v38, %v2282_v30  ;;  %v6285_v54 = vpop.f32.mrf.mxu1  ;;  %v8699_v40 = vld [vmem:[%s9511_s3 + $0x110] sm:$0xff]  }
 0x271   : > { %v2279_v15 = vpop.f32.mrf.mxu0 }
 0x272   : > { %v2320_v16 = vpop.f32.mrf.mxu1 }
 0x273   : > { %v6270_v28 = vpop.f32.mrf.mxu0 }
 0x274   : > { %v6286_v31 = vpop.f32.mrf.mxu1  ;;  %v8719_v28 = vld [vmem:[%s9511_s3 + $0xd8] sm:$0xff]  }
 0x285   : > { %v2371_v32 = vpop.f32.mrf.mxu0 }
 0x286   : > { %v2377_v26 = vadd.f32 %v2371_v32, %v2323_v14  ;;  %v2413_v44 = vpop.f32.mrf.mxu1  ;;  %v8727_v32 = vld [vmem:[%s9511_s3 + $0x100] sm:$0xff]  }
 0x287   : > { %v6301_v56 = vpop.f32.mrf.mxu0 }
 0x288   : > { %v2378_v27 = vmax.f32 %v2161_v10, %v2377_v26  ;;  %v6317_v48 = vpop.f32.mrf.mxu1  ;;  %v8736_v26 = vld [vmem:[%s9511_s3 + $0xd0] sm:$0xff]   ;;  %v8752_v56 = vld [vmem:[%s9511_s3 + $0xc8] sm:$0xff]  }
 0x289   : > { %v2374_v35 = vpop.f32.mrf.mxu0  ;;  %v8766_v48 = vld [vmem:[%s9511_s3 + $0xc0] sm:$0xff]  }
 0x28a   : > { %v2416_v57 = vpop.f32.mrf.mxu1 }
 0x28b   : > { %v6302_v59 = vpop.f32.mrf.mxu0  ;;  %v8775_v57 = vld [vmem:[%s9511_s3 + $0xe8] sm:$0xff]  }
 0x28c   : > { %v6318_v60 = vpop.f32.mrf.mxu1 }
 0x28d   : > { %v2804_v60 = vshll.u32 %v8589_v53, 16 }
 0x29d   : > { %v2453_v0 = vpop.f32.mrf.mxu0 }
 0x29e   : > { %v2493_v3 = vpop.f32.mrf.mxu1  ;;  %v2454_v33 = vadd.f32 %v2453_v0, %v2413_v44  ;;  %v8745_v44 = vld [vmem:[%s9511_s3 + $0xf8] sm:$0xff]  }
 0x29f   : > { %v6333_v4 = vpop.f32.mrf.mxu0  ;;  %v8783_v0 = vld [vmem:[%s9511_s3 + $0xb8] sm:$0xff]  }
 0x2a0   : > { %v6349_v5 = vpop.f32.mrf.mxu1  ;;  %v2499_v41 = vadd.f32 %v2493_v3, %v2454_v33  ;;  %v8790_v4 = vld [vmem:[%s9511_s3 + $0xe0] sm:$0xff]  }
 0x2a1   : > { %v2456_v7 = vpop.f32.mrf.mxu0 }
 0x2a2   : > { %v2496_v8 = vpop.f32.mrf.mxu1  ;;  %v2806_v7 = vrot.slane %v2804_v60, 1  ;;  %v8948_v60 = vld [vmem:[%s9511_s3 + $0x58] sm:$0xff]  }
 0x2a3   : > { %v6334_v9 = vpop.f32.mrf.mxu0  ;;  %v8797_v8 = vld [vmem:[%s9511_s3 + $0xb0] sm:$0xff]  }
 0x2a4   : > { %v6350_v11 = vpop.f32.mrf.mxu1  ;;  %v2802_v9 = vshrl.u32 %v8589_v53, 16 }
 0x2a5   : > { %v8805_v11 = vld [vmem:[%s9511_s3 + $0x1f0] sm:$0xff]  }
 0x2a6   : > { %v8807_v33 = vor.u32 %v2806_v7, %v2802_v9  ;;  %v8973_v7 = vld [vmem:[%s9511_s3 + $0x218] sm:$0xff]   ;;  %v8980_v9 = vld [vmem:[%s9511_s3 + $0x48] sm:$0xff]  }
 0x2a7   : > { %9562 = vst [vmem:[#allocation8_spill] sm:$0xff] %v8973_v7  ;;  %9563 = vst [vmem:[#allocation9_spill] sm:$0xff] %v8980_v9 }
 0x2b5   : > { %v2534_v42 = vpop.f32.mrf.mxu0 }
 0x2b6   : > { %v2540_v43 = vadd.f32 %v2534_v42, %v2499_v41  ;;  %v2575_v34 = vpop.f32.mrf.mxu1  ;;  %v8814_v41 = vld [vmem:[%s9511_s3 + $0xa8] sm:$0xff]  }
 0x2b7   : > { %v6365_v50 = vpop.f32.mrf.mxu0  ;;  %v8823_v42 = vld [vmem:[%s9511_s3 + $0x1e8] sm:$0xff]  }
 0x2b8   : > { %v2581_v10 = vadd.f32 %v2575_v34, %v2540_v43  ;;  %v6381_v51 = vpop.f32.mrf.mxu1  ;;  %v8832_v43 = vld [vmem:[%s9511_s3 + $0x148] sm:$0xff]   ;;  %v8839_v34 = vld [vmem:[%s9511_s3 + $0x1e0] sm:$0xff]  }
 0x2b9   : > { %v2537_v12 = vpop.f32.mrf.mxu0  ;;  %v8848_v50 = vld [vmem:[%s9511_s3 + $0x140] sm:$0xff]   ;;  %v8864_v51 = vld [vmem:[%s9511_s3 + $0x138] sm:$0xff]  }
 0x2ba   : > { %v2582_v13 = vmax.f32 %v2378_v27, %v2581_v10  ;;  %v2578_v19 = vpop.f32.mrf.mxu1  ;;  %v8759_v27 = vld [vmem:[%s9511_s3 + $0xf0] sm:$0xff]   ;;  %v8857_v10 = vld [vmem:[%s9511_s3 + $0x1d8] sm:$0xff]  }
 0x2bb   : > { %v6366_v24 = vpop.f32.mrf.mxu0  ;;  %v8871_v12 = vld [vmem:[%s9511_s3 + $0x1d0] sm:$0xff]   ;;  %v8885_v19 = vld [vmem:[%s9511_s3 + $0x1c8] sm:$0xff]  }
 0x2bc   : > { %v2583_v29 = vadd.f32 %v8566_v22, %v2582_v13  ;;  %v6382_v30 = vpop.f32.mrf.mxu1  ;;  %v8710_v22 = vld [vmem:[%s9511_s3 + $0x108] sm:$0xff]   ;;  %v8878_v13 = vld [vmem:[%s9511_s3 + $0x130] sm:$0xff]  }
 0x2bd   : > { %v8892_v24 = vld [vmem:[%s9511_s3 + $0x128] sm:$0xff]   ;;  %v8906_v30 = vld [vmem:[%s9511_s3 + $0x120] sm:$0xff]  }
 0x2be   : > { %v2584_v38 = vmax.f32 %v2583_v29, 0.0  ;;  %v8899_v29 = vld [vmem:[%s9511_s3 + $0x1c0] sm:$0xff]  }
 0x2c0   : > { %v8701_v14 = vpack.c.bf16 %v2584_v38, %v2584_v38  ;;  %v8913_v38 = vld [vmem:[%s9511_s3 + $0x68] sm:$0xff]  }
 0x2c2   : > { %6398 = vmatmul.mubr.msk.bf16.vlgmr.msra.gmra.mxu0 %vm2658_vm2, %v8701_v14  ;;  %v2911_v54 = vshll.u32 %v8701_v14, 16  ;;  %v2909_v15 = vshrl.u32 %v8701_v14, 16 }
 0x2c3   : > { %6420 = vmatpush3.bf16.msra.mxu0 %v8699_v40  ;;  %6433 = vmatprep.mubr.msk.bf16.mxu0 %vm7195_vm0, %v7194_v1 }
 0x2c4   : > { %6421 = vmatprep.subr.bf16.mxu0 %v7194_v1  ;;  %v2913_v16 = vrot.slane %v2911_v54, 1  ;;  %v8916_v54 = vrot.slane %v8589_v53, 1 }
 0x2c6   : > { %v8721_v31 = vor.u32 %v2913_v16, %v2909_v15  ;;  %v8923_v15 = vld [vmem:[%s9511_s3 + $0x118] sm:$0xff]   ;;  %v8932_v16 = vld [vmem:[%s9511_s3 + $0x60] sm:$0xff]  }
 0x2c7   : > { %6422 = vmatpush3.bf16.msra.mxu0 %v8710_v22 }
 0x2c8   : > { %6452 = vmatmul.mubr.msk.bf16.vlgmr.msra.gmra.mxu1 %vm2658_vm2, %v8721_v31  ;;  %6423 = vmatprep.subr.bf16.mxu0 %v7194_v1 }
 0x2c9   : > { %6474 = vmatpush3.bf16.msra.mxu1 %v8719_v28  ;;  %6487 = vmatprep.mubr.msk.bf16.mxu1 %vm7195_vm0, %v7194_v1 }
 0x2ca   : > { %6475 = vmatprep.subr.bf16.mxu1 %v7194_v1 }
 0x2cb   : > { %6424 = vmatpush3.bf16.msra.mxu0 %v8727_v32 }
 0x2cc   : > { %6425 = vmatprep.subr.bf16.mxu0 %v7194_v1 }
 0x2cd   : > { %6476 = vmatpush3.bf16.msra.mxu1 %v8736_v26 }
 0x2ce   : > { %6477 = vmatprep.subr.bf16.mxu1 %v7194_v1 }
 0x2cf   : > { %6426 = vmatpush3.bf16.msra.mxu0 %v8745_v44 }
 0x2d0   : > { %6427 = vmatprep.subr.bf16.mxu0 %v7194_v1 }
 0x2d1   : > { %6478 = vmatpush3.bf16.msra.mxu1 %v8752_v56 }
 0x2d2   : > { %v8768_v35 = vpop.f32.mrf.mxu1  ;;  %6479 = vmatprep.subr.bf16.mxu1 %v7194_v1 }
 0x2d3   : > { %9560 = vst [vmem:[#allocation6_spill] sm:$0xff] %v8768_v35  ;;  %6428 = vmatpush3.bf16.msra.mxu0 %v8759_v27  ;;  %v8987_v35 = vld [vmem:[%s9511_s3 + $0x210] sm:$0xff]  }
 0x2d4   : > { %v6417_v59 = vpop.f32.mrf.mxu1  ;;  %6429 = vmatprep.subr.bf16.mxu0 %v7194_v1  ;;  %9564 = vst [vmem:[#allocation10_spill] sm:$0xff] %v8987_v35 }
 0x2d5   : > { %6480 = vmatpush3.bf16.msra.mxu1 %v8766_v48  ;;  %v8941_v59 = vld [vmem:[%s9511_s3 + $0x228] sm:$0xff]  }
 0x2d6   : > { %v2784_v3 = vpop.f32.mrf.mxu1  ;;  %6481 = vmatprep.subr.bf16.mxu1 %v7194_v1 }
 0x2d7   : > { %6430 = vmatpush3.bf16.msra.mxu0 %v8775_v57  ;;  %v8957_v3 = vld [vmem:[%s9511_s3 + $0x220] sm:$0xff]  }
 0x2d8   : > { %v6418_v5 = vpop.f32.mrf.mxu1  ;;  %6431 = vmatprep.subr.bf16.mxu0 %v7194_v1 }
 0x2d9   : > { %6482 = vmatpush3.bf16.msra.mxu1 %v8783_v0  ;;  %v8966_v5 = vld [vmem:[%s9511_s3 + $0x50] sm:$0xff]  }
 0x2da   : > { %6483 = vmatprep.subr.bf16.mxu1 %v7194_v1  ;;  %9561 = vst [vmem:[#allocation7_spill] sm:$0xff] %v8966_v5 }
 0x2db   : > { %6432 = vmatpush3.bf16.msra.mxu0 %v8790_v4 }
 0x2dc   : > { %6455 = vmatprep.subr.bf16.mxu0 %v7194_v1 }
 0x2dd   : > { %6484 = vmatpush3.bf16.msra.mxu1 %v8797_v8 }
 0x2de   : > { %6434 = vmatmul.mubr.msk.bf16.vlgmr.msra.gmra.mxu0 %vm2658_vm2, %v8807_v33  ;;  %6485 = vmatprep.subr.bf16.mxu1 %v7194_v1 }
 0x2df   : > { %6456 = vmatpush3.bf16.msra.mxu0 %v8805_v11  ;;  %6469 = vmatprep.mubr.msk.bf16.mxu0 %vm7195_vm0, %v7194_v1 }
 0x2e0   : > { %6457 = vmatprep.subr.bf16.mxu0 %v7194_v1 }
 0x2e1   : > { %6486 = vmatpush3.bf16.msra.mxu1 %v8814_v41 }
 0x2e2   : > { %6509 = vmatprep.subr.bf16.mxu1 %v7194_v1 }
 0x2e3   : > { %6458 = vmatpush3.bf16.msra.mxu0 %v8823_v42 }
 0x2e4   : > { %6488 = vmatmul.mubr.msk.bf16.vlgmr.msra.gmra.mxu1 %vm2658_vm2, %v8701_v14  ;;  %6459 = vmatprep.subr.bf16.mxu0 %v7194_v1 }
 0x2e5   : > { %6510 = vmatpush3.bf16.msra.mxu1 %v8832_v43  ;;  %6523 = vmatprep.mubr.msk.bf16.mxu1 %vm7195_vm0, %v7194_v1 }
 0x2e6   : > { %6511 = vmatprep.subr.bf16.mxu1 %v7194_v1 }
 0x2e7   : > { %6460 = vmatpush3.bf16.msra.mxu0 %v8839_v34 }
 0x2e8   : > { %6461 = vmatprep.subr.bf16.mxu0 %v7194_v1 }
 0x2e9   : > { %6512 = vmatpush3.bf16.msra.mxu1 %v8848_v50 }
 0x2ea   : > { %6513 = vmatprep.subr.bf16.mxu1 %v7194_v1 }
 0x2eb   : > { %6462 = vmatpush3.bf16.msra.mxu0 %v8857_v10 }
 0x2ec   : > { %6463 = vmatprep.subr.bf16.mxu0 %v7194_v1 }
 0x2ed   : > { %6514 = vmatpush3.bf16.msra.mxu1 %v8864_v51 }
 0x2ee   : > { %6515 = vmatprep.subr.bf16.mxu1 %v7194_v1 }
 0x2ef   : > { %6464 = vmatpush3.bf16.msra.mxu0 %v8871_v12 }
 0x2f0   : > { %6465 = vmatprep.subr.bf16.mxu0 %v7194_v1 }
 0x2f1   : > { %6516 = vmatpush3.bf16.msra.mxu1 %v8878_v13 }
 0x2f2   : > { %6517 = vmatprep.subr.bf16.mxu1 %v7194_v1 }
 0x2f3   : > { %6466 = vmatpush3.bf16.msra.mxu0 %v8885_v19 }
 0x2f4   : > { %6467 = vmatprep.subr.bf16.mxu0 %v7194_v1 }
 0x2f5   : > { %6518 = vmatpush3.bf16.msra.mxu1 %v8892_v24 }
 0x2f6   : > { %6519 = vmatprep.subr.bf16.mxu1 %v7194_v1 }
 0x2f7   : > { %6468 = vmatpush3.bf16.msra.mxu0 %v8899_v29 }
 0x2f8   : > { %6491 = vmatprep.subr.bf16.mxu0 %v7194_v1 }
 0x2f9   : > { %6520 = vmatpush3.bf16.msra.mxu1 %v8906_v30 }
 0x2fa   : > { %6470 = vmatmul.mubr.msk.bf16.vlgmr.msra.gmra.mxu0 %vm2658_vm2, %v8916_v54  ;;  %6521 = vmatprep.subr.bf16.mxu1 %v7194_v1 }
 0x2fb   : > { %6492 = vmatpush3.bf16.msra.mxu0 %v8913_v38  ;;  %6505 = vmatprep.mubr.msk.bf16.mxu0 %vm7195_vm0, %v7194_v1 }
 0x2fc   : > { %6493 = vmatprep.subr.bf16.mxu0 %v7194_v1 }
 0x2fd   : > { %6522 = vmatpush3.bf16.msra.mxu1 %v8923_v15 }
 0x2fe   : > { %6545 = vmatprep.subr.bf16.mxu1 %v7194_v1 }
 0x2ff   : > { %6494 = vmatpush3.bf16.msra.mxu0 %v8932_v16 }
 0x300   : > { %6524 = vmatmul.mubr.msk.bf16.vlgmr.msra.gmra.mxu1 %vm2658_vm2, %v8807_v33  ;;  %6495 = vmatprep.subr.bf16.mxu0 %v7194_v1 }
 0x301   : > { %6546 = vmatpush3.bf16.msra.mxu1 %v8941_v59  ;;  %6559 = vmatprep.mubr.msk.bf16.mxu1 %vm7195_vm0, %v7194_v1 }
 0x302   : > { %6547 = vmatprep.subr.bf16.mxu1 %v7194_v1 }
 0x303   : > { %6496 = vmatpush3.bf16.msra.mxu0 %v8948_v60 }
 0x304   : > { %6497 = vmatprep.subr.bf16.mxu0 %v7194_v1 }
 0x305   : > { %6548 = vmatpush3.bf16.msra.mxu1 %v8957_v3 }
 0x306   : > { %6549 = vmatprep.subr.bf16.mxu1 %v7194_v1 }
 0x307   : > { %6498 = vmatpush3.bf16.msra.mxu0 %v8966_v5  ;;  %v8994_v5 = vld [vmem:[%s9511_s3 + $0x40] sm:$0xff]  }
 0x308   : > { %6499 = vmatprep.subr.bf16.mxu0 %v7194_v1  ;;  %9565 = vst [vmem:[#allocation11_spill] sm:$0xff] %v8994_v5 }
 0x309   : > { %6550 = vmatpush3.bf16.msra.mxu1 %v8973_v7  ;;  %v9001_v7 = vld [vmem:[%s9511_s3 + $0x208] sm:$0xff]  }
 0x30a   : > { %6551 = vmatprep.subr.bf16.mxu1 %v7194_v1  ;;  %9566 = vst [vmem:[#allocation12_spill] sm:$0xff] %v9001_v7 }
 0x30b   : > { %6500 = vmatpush3.bf16.msra.mxu0 %v8980_v9  ;;  %v9008_v9 = vld [vmem:[%s9511_s3 + $0x38] sm:$0xff]  }
 0x30c   : > { %6501 = vmatprep.subr.bf16.mxu0 %v7194_v1  ;;  %9567 = vst [vmem:[#allocation13_spill] sm:$0xff] %v9008_v9 }
 0x30d   : > { %6552 = vmatpush3.bf16.msra.mxu1 %v8987_v35  ;;  %v9015_v35 = vld [vmem:[%s9511_s3 + $0x200] sm:$0xff]  }
 0x30e   : > { %6553 = vmatprep.subr.bf16.mxu1 %v7194_v1 }
 0x30f   : > { %6502 = vmatpush3.bf16.msra.mxu0 %v8994_v5  ;;  %v9022_v5 = vld [vmem:[%s9511_s3 + $0x1b8] sm:$0xff]  }
 0x310   : > { %6503 = vmatprep.subr.bf16.mxu0 %v7194_v1 }
 0x311   : > { %6554 = vmatpush3.bf16.msra.mxu1 %v9001_v7  ;;  %v9029_v7 = vld [vmem:[%s9511_s3 + $0x1f8] sm:$0xff]  }
 0x312   : > { %6555 = vmatprep.subr.bf16.mxu1 %v7194_v1 }
 0x313   : > { %6504 = vmatpush3.bf16.msra.mxu0 %v9008_v9  ;;  %v9038_v9 = vld [vmem:[%s9511_s3 + $0x1b0] sm:$0xff]  }
 0x314   : > { %6527 = vmatprep.subr.bf16.mxu0 %v7194_v1  ;;  %9568 = vst [vmem:[#allocation14_spill] sm:$0xff] %v9038_v9 }
 0x315   : > { %6556 = vmatpush3.bf16.msra.mxu1 %v9015_v35 }
 0x316   : > { %6506 = vmatmul.mubr.msk.bf16.vlgmr.msra.gmra.mxu0 %vm2658_vm2, %v8589_v53  ;;  %6557 = vmatprep.subr.bf16.mxu1 %v7194_v1  ;;  %v9049_v53 = vld [vmem:[%s9511_s3 + $0x1a8] sm:$0xff]  }
 0x317   : > { %6528 = vmatpush3.bf16.msra.mxu0 %v9022_v5  ;;  %6541 = vmatprep.mubr.msk.bf16.mxu0 %vm7195_vm0, %v7194_v1 }
 0x318   : > { %6529 = vmatprep.subr.bf16.mxu0 %v7194_v1 }
 0x319   : > { %6558 = vmatpush3.bf16.msra.mxu1 %v9029_v7 }
 0x31a   : > { %6581 = vmatprep.subr.bf16.mxu1 %v7194_v1 }
 0x31b   : > { %6530 = vmatpush3.bf16.msra.mxu0 %v9038_v9  ;;  %v9062_v9 = vld [vmem:[%s9511_s3 + $0x1a0] sm:$0xff]  }
 0x31c   : > { %6560 = vmatmul.mubr.msk.bf16.vlgmr.msra.gmra.mxu1 %vm2658_vm2, %v8916_v54  ;;  %6531 = vmatprep.subr.bf16.mxu0 %v7194_v1 }
 0x31d   : > { %6582 = vmatpush3.bf16.msra.mxu1 %v8523_v36  ;;  %6595 = vmatprep.mubr.msk.bf16.mxu1 %vm7195_vm0, %v7194_v1  ;;  %v9071_v36 = vld [vmem:[%s9511_s3 + $0x198] sm:$0xff]  }
 0x31e   : > { %6583 = vmatprep.subr.bf16.mxu1 %v7194_v1 }
 0x31f   : > { %6532 = vmatpush3.bf16.msra.mxu0 %v9049_v53 }
 0x320   : > { %6533 = vmatprep.subr.bf16.mxu0 %v7194_v1 }
 0x321   : > { %6584 = vmatpush3.bf16.msra.mxu1 %v8537_v47  ;;  %v9080_v47 = vld [vmem:[%s9511_s3 + $0x190] sm:$0xff]  }
 0x322   : > { %6585 = vmatprep.subr.bf16.mxu1 %v7194_v1 }
 0x323   : > { %6534 = vmatpush3.bf16.msra.mxu0 %v9062_v9 }
 0x324   : > { %6535 = vmatprep.subr.bf16.mxu0 %v7194_v1 }
 0x325   : > { %6586 = vmatpush3.bf16.msra.mxu1 %v8546_v17  ;;  %v9089_v17 = vld [vmem:[%s9511_s3 + $0x188] sm:$0xff]  }
 0x326   : > { %6587 = vmatprep.subr.bf16.mxu1 %v7194_v1 }
 0x327   : > { %6536 = vmatpush3.bf16.msra.mxu0 %v9071_v36 }
 0x328   : > { %6537 = vmatprep.subr.bf16.mxu0 %v7194_v1 }
 0x329   : > { %6588 = vmatpush3.bf16.msra.mxu1 %v8553_v20 }
 0x32a   : > { %6589 = vmatprep.subr.bf16.mxu1 %v7194_v1 }
 0x32b   : > { %6538 = vmatpush3.bf16.msra.mxu0 %v9080_v47 }
 0x32c   : > { %6539 = vmatprep.subr.bf16.mxu0 %v7194_v1 }
 0x32d   : > { %6590 = vmatpush3.bf16.msra.mxu1 %v8560_v21 }
 0x32e   : > { %6591 = vmatprep.subr.bf16.mxu1 %v7194_v1 }
 0x32f   : > { %6540 = vmatpush3.bf16.msra.mxu0 %v9089_v17 }
 0x330   : > { %6563 = vmatprep.subr.bf16.mxu0 %v7194_v1 }
 0x331   : > { %6592 = vmatpush3.bf16.msra.mxu1 %v8572_v23  ;;  %v3756_v23 = vrot.slane %v8701_v14, 1 }
 0x332   : > { %6542 = vmatmul.mubr.msk.bf16.vlgmr.msra.gmra.mxu0 %vm2658_vm2, %v8721_v31  ;;  %6593 = vmatprep.subr.bf16.mxu1 %v7194_v1 }
 0x333   : > { %6564 = vmatpush3.bf16.msra.mxu0 %v8599_v55  ;;  %6577 = vmatprep.mubr.msk.bf16.mxu0 %vm7195_vm0, %v7194_v1 }
 0x334   : > { %6565 = vmatprep.subr.bf16.mxu0 %v7194_v1 }
 0x335   : > { %6594 = vmatpush3.bf16.msra.mxu1 %v8583_v25 }
 0x336   : > { %6617 = vmatprep.subr.bf16.mxu1 %v7194_v1 }
 0x337   : > { %6566 = vmatpush3.bf16.msra.mxu0 %v8610_v37 }
 0x338   : > { %6596 = vmatmul.mubr.msk.bf16.vlgmr.msra.gmra.mxu1 %vm2658_vm2, %v8701_v14  ;;  %6567 = vmatprep.subr.bf16.mxu0 %v7194_v1 }
 0x339   : > { %6618 = vmatpush3.bf16.msra.mxu1 %v8604_v46  ;;  %6631 = vmatprep.mubr.msk.bf16.mxu1 %vm7195_vm0, %v7194_v1 }
 0x33a   : > { %6619 = vmatprep.subr.bf16.mxu1 %v7194_v1 }
 0x33b   : > { %6568 = vmatpush3.bf16.msra.mxu0 %v8624_v49 }
 0x33c   : > { %6569 = vmatprep.subr.bf16.mxu0 %v7194_v1 }
 0x33d   : > { %6620 = vmatpush3.bf16.msra.mxu1 %v8616_v52 }
 0x33e   : > { %6621 = vmatprep.subr.bf16.mxu1 %v7194_v1 }
 0x33f   : > { %6570 = vmatpush3.bf16.msra.mxu0 %v8638_v61  ;;  %v9570_v61 = vld [vmem:[#allocation8_spill] sm:$0xff] }
 0x340   : > { %6571 = vmatprep.subr.bf16.mxu0 %v7194_v1 }
 0x341   : > { %6622 = vmatpush3.bf16.msra.mxu1 %v8630_v58  ;;  %v9569_v58 = vld [vmem:[#allocation7_spill] sm:$0xff] }
 0x342   : > { %6623 = vmatprep.subr.bf16.mxu1 %v7194_v1 }
 0x343   : > { %6572 = vmatpush3.bf16.msra.mxu0 %v8648_v62  ;;  %v9571_v62 = vld [vmem:[#allocation9_spill] sm:$0xff] }
 0x344   : > { %6573 = vmatprep.subr.bf16.mxu0 %v7194_v1 }
 0x345   : > { %6624 = vmatpush3.bf16.msra.mxu1 %v8654_v63  ;;  %v9572_v63 = vld [vmem:[#allocation10_spill] sm:$0xff] }
 0x346   : > { %6625 = vmatprep.subr.bf16.mxu1 %v7194_v1 }
 0x347   : > { %6574 = vmatpush3.bf16.msra.mxu0 %v8661_v18  ;;  %v9573_v18 = vld [vmem:[#allocation11_spill] sm:$0xff] }
 0x348   : > { %6575 = vmatprep.subr.bf16.mxu0 %v7194_v1 }
 0x349   : > { %6626 = vmatpush3.bf16.msra.mxu1 %v8668_v45  ;;  %v9574_v45 = vld [vmem:[#allocation6_spill] sm:$0xff] }
 0x34a   : > { %6627 = vmatprep.subr.bf16.mxu1 %v7194_v1 }
 0x34b   : > { %6576 = vmatpush3.bf16.msra.mxu0 %v8675_v2 }
 0x34c   : > { %6599 = vmatprep.subr.bf16.mxu0 %v7194_v1 }
 0x34d   : > { %6628 = vmatpush3.bf16.msra.mxu1 %v8682_v6  ;;  %v9575_v6 = vld [vmem:[#allocation12_spill] sm:$0xff] }
 0x34e   : > { %6578 = vmatmul.mubr.msk.bf16.vlgmr.msra.gmra.mxu0 %vm2658_vm2, %v8807_v33  ;;  %6629 = vmatprep.subr.bf16.mxu1 %v7194_v1 }
 0x34f   : > { %6600 = vmatpush3.bf16.msra.mxu0 %v8699_v40  ;;  %6613 = vmatprep.mubr.msk.bf16.mxu0 %vm7195_vm0, %v7194_v1 }
 0x350   : > { %6601 = vmatprep.subr.bf16.mxu0 %v7194_v1 }
 0x351   : > { %6630 = vmatpush3.bf16.msra.mxu1 %v8691_v39 }
 0x352   : > { %6653 = vmatprep.subr.bf16.mxu1 %v7194_v1 }
 0x353   : > { %6602 = vmatpush3.bf16.msra.mxu0 %v8710_v22  ;;  %v9576_v22 = vld [vmem:[#allocation13_spill] sm:$0xff] }
 0x354   : > { %6632 = vmatmul.mubr.msk.bf16.vlgmr.msra.gmra.mxu1 %vm2658_vm2, %v8916_v54  ;;  %6603 = vmatprep.subr.bf16.mxu0 %v7194_v1 }
 0x355   : > { %6654 = vmatpush3.bf16.msra.mxu1 %v8719_v28  ;;  %6667 = vmatprep.mubr.msk.bf16.mxu1 %vm7195_vm0, %v7194_v1 }
 0x356   : > { %6655 = vmatprep.subr.bf16.mxu1 %v7194_v1 }
 0x357   : > { %6604 = vmatpush3.bf16.msra.mxu0 %v8727_v32 }
 0x358   : > { %6605 = vmatprep.subr.bf16.mxu0 %v7194_v1 }
 0x359   : > { %6656 = vmatpush3.bf16.msra.mxu1 %v8736_v26 }
 0x35a   : > { %6657 = vmatprep.subr.bf16.mxu1 %v7194_v1 }
 0x35b   : > { %6606 = vmatpush3.bf16.msra.mxu0 %v8745_v44 }
 0x35c   : > { %6607 = vmatprep.subr.bf16.mxu0 %v7194_v1 }
 0x35d   : > { %6658 = vmatpush3.bf16.msra.mxu1 %v8752_v56 }
 0x35e   : > { %6659 = vmatprep.subr.bf16.mxu1 %v7194_v1 }
 0x35f   : > { %6608 = vmatpush3.bf16.msra.mxu0 %v8759_v27  ;;  %v9577_v27 = vld [vmem:[#allocation14_spill] sm:$0xff] }
 0x360   : > { %6609 = vmatprep.subr.bf16.mxu0 %v7194_v1 }
 0x361   : > { %6660 = vmatpush3.bf16.msra.mxu1 %v8766_v48 }
 0x362   : > { %6661 = vmatprep.subr.bf16.mxu1 %v7194_v1 }
 0x363   : > { %6610 = vmatpush3.bf16.msra.mxu0 %v8775_v57 }
 0x364   : > { %6611 = vmatprep.subr.bf16.mxu0 %v7194_v1 }
 0x365   : > { %6662 = vmatpush3.bf16.msra.mxu1 %v8783_v0 }
 0x366   : > { %6663 = vmatprep.subr.bf16.mxu1 %v7194_v1 }
 0x367   : > { %6612 = vmatpush3.bf16.msra.mxu0 %v8790_v4 }
 0x368   : > { %6635 = vmatprep.subr.bf16.mxu0 %v7194_v1 }
 0x369   : > { %6664 = vmatpush3.bf16.msra.mxu1 %v8797_v8 }
 0x36a   : > { %6614 = vmatmul.mubr.msk.bf16.vlgmr.msra.gmra.mxu0 %vm2658_vm2, %v8721_v31  ;;  %6665 = vmatprep.subr.bf16.mxu1 %v7194_v1 }
 0x36b   : > { %6636 = vmatpush3.bf16.msra.mxu0 %v8805_v11  ;;  %6649 = vmatprep.mubr.msk.bf16.mxu0 %vm7195_vm0, %v7194_v1 }
 0x36c   : > { %6637 = vmatprep.subr.bf16.mxu0 %v7194_v1 }
 0x36d   : > { %6666 = vmatpush3.bf16.msra.mxu1 %v8814_v41 }
 0x36e   : > { %6689 = vmatprep.subr.bf16.mxu1 %v7194_v1 }
 0x36f   : > { %6638 = vmatpush3.bf16.msra.mxu0 %v8823_v42 }
 0x370   : > { %6668 = vmatmul.mubr.msk.bf16.vlgmr.msra.gmra.mxu1 %vm2658_vm2, %v8807_v33  ;;  %6639 = vmatprep.subr.bf16.mxu0 %v7194_v1 }
 0x371   : > { %6690 = vmatpush3.bf16.msra.mxu1 %v8832_v43  ;;  %6703 = vmatprep.mubr.msk.bf16.mxu1 %vm7195_vm0, %v7194_v1 }
 0x372   : > { %6691 = vmatprep.subr.bf16.mxu1 %v7194_v1 }
 0x373   : > { %6640 = vmatpush3.bf16.msra.mxu0 %v8839_v34 }
 0x374   : > { %6641 = vmatprep.subr.bf16.mxu0 %v7194_v1 }
 0x375   : > { %6692 = vmatpush3.bf16.msra.mxu1 %v8848_v50 }
 0x376   : > { %6693 = vmatprep.subr.bf16.mxu1 %v7194_v1 }
 0x377   : > { %6642 = vmatpush3.bf16.msra.mxu0 %v8857_v10 }
 0x378   : > { %6643 = vmatprep.subr.bf16.mxu0 %v7194_v1 }
 0x379   : > { %6694 = vmatpush3.bf16.msra.mxu1 %v8864_v51 }
 0x37a   : > { %6695 = vmatprep.subr.bf16.mxu1 %v7194_v1 }
 0x37b   : > { %6644 = vmatpush3.bf16.msra.mxu0 %v8871_v12 }
 0x37c   : > { %6645 = vmatprep.subr.bf16.mxu0 %v7194_v1 }
 0x37d   : > { %6696 = vmatpush3.bf16.msra.mxu1 %v8878_v13 }
 0x37e   : > { %6697 = vmatprep.subr.bf16.mxu1 %v7194_v1 }
 0x37f   : > { %6646 = vmatpush3.bf16.msra.mxu0 %v8885_v19 }
 0x380   : > { %6647 = vmatprep.subr.bf16.mxu0 %v7194_v1 }
 0x381   : > { %6698 = vmatpush3.bf16.msra.mxu1 %v8892_v24 }
 0x382   : > { %v2696_v20 = vpop.f32.mrf.mxu0  ;;  %6699 = vmatprep.subr.bf16.mxu1 %v7194_v1 }
 0x383   : > { %6648 = vmatpush3.bf16.msra.mxu0 %v8899_v29  ;;  %v2782_v2 = vadd.f32 %v9574_v45, %v2696_v20 }
 0x384   : > { %v6399_v21 = vpop.f32.mrf.mxu0  ;;  %6671 = vmatprep.subr.bf16.mxu0 %v7194_v1 }
 0x385   : > { %6700 = vmatpush3.bf16.msra.mxu1 %v8906_v30  ;;  %v7028_v30 = vld [vmem:[%s9513_s5 + $0x20] sm:$0xff]   ;;  %v7033_v21 = vld [vmem:[%s9513_s5 + $0x38] sm:$0xff]  }
 0x386   : > { %6650 = vmatmul.mubr.msk.bf16.vlgmr.msra.gmra.mxu0 %vm2658_vm2, %v3756_v23  ;;  %v2699_v25 = vpop.f32.mrf.mxu0  ;;  %6701 = vmatprep.subr.bf16.mxu1 %v7194_v1 }
 0x387   : > { %6672 = vmatpush3.bf16.msra.mxu0 %v8913_v38  ;;  %6685 = vmatprep.mubr.msk.bf16.mxu0 %vm7195_vm0, %v7194_v1  ;;  %v7029_v38 = vld [vmem:[%s9513_s5 + $0x48] sm:$0xff]   ;;  %v7035_v25 = vld [vmem:[%s9513_s5 + $0x30] sm:$0xff]  }
 0x388   : > { %v6400_v55 = vpop.f32.mrf.mxu0  ;;  %v2994_v46 = vpop.f32.mrf.mxu1  ;;  %6673 = vmatprep.subr.bf16.mxu0 %v7194_v1 }
 0x389   : > { %6702 = vmatpush3.bf16.msra.mxu1 %v8923_v15  ;;  %v7031_v15 = vld [vmem:[%s9513_s5 + $0x40] sm:$0xff]  }
 0x38a   : > { %v6453_v37 = vpop.f32.mrf.mxu1  ;;  %6725 = vmatprep.subr.bf16.mxu1 %v7194_v1  ;;  %v7036_v55 = vld [vmem:[%s9513_s5] sm:$0xff]  }
 0x38b   : > { %6674 = vmatpush3.bf16.msra.mxu0 %v8932_v16 }
 0x38c   : > { %6704 = vmatmul.mubr.msk.bf16.vlgmr.msra.gmra.mxu1 %vm2658_vm2, %v8721_v31  ;;  %v2997_v52 = vpop.f32.mrf.mxu1  ;;  %6675 = vmatprep.subr.bf16.mxu0 %v7194_v1 }
 0x38d   : > { %6726 = vmatpush3.bf16.msra.mxu1 %v8941_v59  ;;  %6739 = vmatprep.mubr.msk.bf16.mxu1 %vm7195_vm0, %v7194_v1 }
 0x38e   : > { %v6454_v49 = vpop.f32.mrf.mxu1  ;;  %6727 = vmatprep.subr.bf16.mxu1 %v7194_v1 }
 0x38f   : > { %6676 = vmatpush3.bf16.msra.mxu0 %v8948_v60 }
 0x390   : > { %6677 = vmatprep.subr.bf16.mxu0 %v7194_v1 }
 0x391   : > { %6728 = vmatpush3.bf16.msra.mxu1 %v8957_v3 }
 0x392   : > { %6729 = vmatprep.subr.bf16.mxu1 %v7194_v1 }
 0x393   : > { %6678 = vmatpush3.bf16.msra.mxu0 %v9569_v58 }
 0x394   : > { %6679 = vmatprep.subr.bf16.mxu0 %v7194_v1 }
 0x395   : > { %6730 = vmatpush3.bf16.msra.mxu1 %v9570_v61 }
 0x396   : > { %6731 = vmatprep.subr.bf16.mxu1 %v7194_v1 }
 0x397   : > { %6680 = vmatpush3.bf16.msra.mxu0 %v9571_v62 }
 0x398   : > { %6681 = vmatprep.subr.bf16.mxu0 %v7194_v1 }
 0x399   : > { %6732 = vmatpush3.bf16.msra.mxu1 %v9572_v63 }
 0x39a   : > { %6733 = vmatprep.subr.bf16.mxu1 %v7194_v1 }
 0x39b   : > { %6682 = vmatpush3.bf16.msra.mxu0 %v9573_v18 }
 0x39c   : > { %6683 = vmatprep.subr.bf16.mxu0 %v7194_v1 }
 0x39d   : > { %6734 = vmatpush3.bf16.msra.mxu1 %v9575_v6 }
 0x39e   : > { %v2887_v39 = vpop.f32.mrf.mxu0  ;;  %6735 = vmatprep.subr.bf16.mxu1 %v7194_v1 }
 0x39f   : > { %v2893_v40 = vadd.f32 %v2887_v39, %v2782_v2  ;;  %6684 = vmatpush3.bf16.msra.mxu0 %v9576_v22 }
 0x3a0   : > { %v6435_v28 = vpop.f32.mrf.mxu0  ;;  %6707 = vmatprep.subr.bf16.mxu0 %v7194_v1 }
 0x3a1   : > { %6736 = vmatpush3.bf16.msra.mxu1 %v9015_v35  ;;  %v3000_v31 = vadd.f32 %v2994_v46, %v2893_v40  ;;  %v7037_v46 = vld [vmem:[%s9513_s5 + $0x28] sm:$0xff]  }
 0x3a2   : > { %v2890_v32 = vpop.f32.mrf.mxu0  ;;  %6686 = vmatmul.mubr.msk.bf16.vlgmr.msra.gmra.mxu0 %vm2658_vm2, %v8701_v14  ;;  %6737 = vmatprep.subr.bf16.mxu1 %v7194_v1 }
 0x3a3   : > { %6708 = vmatpush3.bf16.msra.mxu0 %v9022_v5  ;;  %6721 = vmatprep.mubr.msk.bf16.mxu0 %vm7195_vm0, %v7194_v1 }
 0x3a4   : > { %v6436_v26 = vpop.f32.mrf.mxu0  ;;  %v3210_v44 = vpop.f32.mrf.mxu1  ;;  %6709 = vmatprep.subr.bf16.mxu0 %v7194_v1 }
 0x3a5   : > { %6738 = vmatpush3.bf16.msra.mxu1 %v9029_v7 }
 0x3a6   : > { %v6489_v56 = vpop.f32.mrf.mxu1  ;;  %6757 = vmatprep.subr.bf16.mxu1 %v7194_v1 }
 0x3a7   : > { %6710 = vmatpush3.bf16.msra.mxu0 %v9577_v27 }
 0x3a8   : > { %v3213_v48 = vpop.f32.mrf.mxu1  ;;  %6740 = vmatmul.mubr.msk.bf16.vlgmr.msra.gmra.mxu1 %vm2658_vm2, %v3756_v23  ;;  %6711 = vmatprep.subr.bf16.mxu0 %v7194_v1  ;;  %v7034_v23 = vld [vmem:[%s9513_s5 + $0x8] sm:$0xff]  }
 0x3a9   : > { %6767 = vmatprep.mubr.msk.bf16.mxu1 %vm7195_vm0, %v7194_v1  ;;  %6758 = vmatpush3.bf16.msra.mxu1 %v7028_v30 }
 0x3aa   : > { %v6490_v14 = vpop.f32.mrf.mxu1  ;;  %6759 = vmatprep.subr.bf16.mxu1 %v7194_v1 }
 0x3ab   : > { %6712 = vmatpush3.bf16.msra.mxu0 %v9049_v53 }
 0x3ac   : > { %6713 = vmatprep.subr.bf16.mxu0 %v7194_v1 }
 0x3af   : > { %6714 = vmatpush3.bf16.msra.mxu0 %v9062_v9 }
 0x3b0   : > { %6715 = vmatprep.subr.bf16.mxu0 %v7194_v1 }
 0x3b3   : > { %6716 = vmatpush3.bf16.msra.mxu0 %v9071_v36 }
 0x3b4   : > { %6717 = vmatprep.subr.bf16.mxu0 %v7194_v1 }
 0x3b7   : > { %6718 = vmatpush3.bf16.msra.mxu0 %v9080_v47 }
 0x3b8   : > { %6719 = vmatprep.subr.bf16.mxu0 %v7194_v1 }
 0x3ba   : > { %v3097_v35 = vpop.f32.mrf.mxu0 }
 0x3bb   : > { %v9264_v57 = vadd.f32 %v3097_v35, %v3000_v31  ;;  %6720 = vmatpush3.bf16.msra.mxu0 %v9089_v17  ;;  %v7032_v17 = vld [vmem:[%s9513_s5 + $0x10] sm:$0xff]  }
 0x3bc   : > { %v6471_v0 = vpop.f32.mrf.mxu0  ;;  %6743 = vmatprep.subr.bf16.mxu0 %v7194_v1 }
 0x3be   : > { %v3100_v4 = vpop.f32.mrf.mxu0  ;;  %6722 = vmatmul.mubr.msk.bf16.vlgmr.msra.gmra.mxu0 %vm2658_vm2, %v8916_v54  ;;  %v7030_v54 = vld [vmem:[%s9513_s5 + $0x18] sm:$0xff]  }
 0x3bf   : > { %6753 = vmatprep.mubr.msk.bf16.mxu0 %vm7195_vm0, %v7194_v1  ;;  %6744 = vmatpush3.bf16.msra.mxu0 %v7029_v38  ;;  %v5164_v38 = vld [vmem:[%s9512_s4] ss:$0 sm:$0xff] }
 0x3c0   : > { %v6472_v8 = vpop.f32.mrf.mxu0  ;;  %v3389_v11 = vpop.f32.mrf.mxu1  ;;  %6745 = vmatprep.subr.bf16.mxu0 %v7194_v1  ;;  %6760 = vmatpush3.bf16.msra.mxu1 %v7030_v54 }
 0x3c1   : > { %6761 = vmatprep.subr.bf16.mxu1 %v7194_v1 }
 0x3c2   : > { %v6525_v33 = vpop.f32.mrf.mxu1 }
 0x3c3   : > { %6746 = vmatpush3.bf16.msra.mxu0 %v7031_v15 }
 0x3c4   : > { %v3392_v41 = vpop.f32.mrf.mxu1  ;;  %6747 = vmatprep.subr.bf16.mxu0 %v7194_v1  ;;  %6762 = vmatpush3.bf16.msra.mxu1 %v7032_v17  ;;  %v7043_v17 = vld [vmem:[%s9513_s5 + $0x60] sm:$0xff]  }
 0x3c5   : > { %6763 = vmatprep.subr.bf16.mxu1 %v7194_v1 }
 0x3c6   : > { %v6526_v42 = vpop.f32.mrf.mxu1 }
 0x3c7   : > { %6748 = vmatpush3.bf16.msra.mxu0 %v7033_v21  ;;  %v7045_v21 = vld [vmem:[%s9513_s5 + $0x58] sm:$0xff]  }
 0x3c8   : > { %6749 = vmatprep.subr.bf16.mxu0 %v7194_v1  ;;  %6764 = vmatpush3.bf16.msra.mxu1 %v7034_v23  ;;  %v7046_v23 = vld [vmem:[%s9513_s5 + $0x78] sm:$0xff]  }
 0x3c9   : > { %6765 = vmatprep.subr.bf16.mxu1 %v7194_v1 }
 0x3cb   : > { %6750 = vmatpush3.bf16.msra.mxu0 %v7035_v25  ;;  %v7047_v25 = vld [vmem:[%s9513_s5 + $0x50] sm:$0xff]  }
 0x3cc   : > { %6751 = vmatprep.subr.bf16.mxu0 %v7194_v1  ;;  %6766 = vmatpush3.bf16.msra.mxu1 %v7036_v55 }
 0x3cd   : > { %6785 = vmatprep.subr.bf16.mxu1 %v7194_v1 }
 0x3cf   : > { %6752 = vmatpush3.bf16.msra.mxu0 %v7037_v46  ;;  %v7048_v46 = vld [vmem:[%s9513_s5 + $0xc0] sm:$0xff]  }
 0x3d0   : > { %6771 = vmatprep.subr.bf16.mxu0 %v7194_v1 }
 0x3d6   : > { %v3292_v43 = vpop.f32.mrf.mxu0 }
 0x3d7   : > { %v3293_v34 = vadd.f32 %v3292_v43, %v3210_v44 }
 0x3d8   : > { %v6507_v50 = vpop.f32.mrf.mxu0 }
 0x3d9   : > { %v3395_v10 = vadd.f32 %v3389_v11, %v3293_v34 }
 0x3da   : > { %v3295_v51 = vpop.f32.mrf.mxu0 }
 0x3dc   : > { %v6508_v12 = vpop.f32.mrf.mxu0  ;;  %v3585_v13 = vpop.f32.mrf.mxu1 }
 0x3de   : > { %v6561_v19 = vpop.f32.mrf.mxu1 }
 0x3e0   : > { %v3588_v24 = vpop.f32.mrf.mxu1 }
 0x3e2   : > { %v6562_v29 = vpop.f32.mrf.mxu1 }
 0x3f2   : > { %v3487_v16 = vpop.f32.mrf.mxu0 }
 0x3f3   : > { %v3493_v59 = vadd.f32 %v3487_v16, %v3395_v10 }
 0x3f4   : > { %v6543_v60 = vpop.f32.mrf.mxu0 }
 0x3f5   : > { %v3591_v3 = vadd.f32 %v3585_v13, %v3493_v59 }
 0x3f6   : > { %v3490_v5 = vpop.f32.mrf.mxu0 }
 0x3f7   : > { %v3592_v7 = vmax.f32 %v9264_v57, %v3591_v3  ;;  %v7038_v3 = vld [vmem:[%s9513_s5 + $0x98] sm:$0xff]  }
 0x3f8   : > { %v6544_v9 = vpop.f32.mrf.mxu0  ;;  %v3667_v53 = vpop.f32.mrf.mxu1 }
 0x3fa   : > { %v6597_v36 = vpop.f32.mrf.mxu1 }
 0x3fb   : > { %v7041_v36 = vld [vmem:[%s9513_s5 + $0x68] sm:$0xff]  }
 0x3fc   : > { %v3670_v47 = vpop.f32.mrf.mxu1 }
 0x3fd   : > { %v7042_v47 = vld [vmem:[%s9513_s5 + $0x88] sm:$0xff]  }
 0x3fe   : > { %v6598_v20 = vpop.f32.mrf.mxu1 }
 0x3ff   : > { %v7044_v20 = vld [vmem:[%s9513_s5 + $0x80] sm:$0xff]  }
 0x40e   : > { %v3627_v37 = vpop.f32.mrf.mxu0 }
 0x40f   : > { %v3668_v52 = vadd.f32 %v3667_v53, %v3627_v37  ;;  %v7040_v53 = vld [vmem:[%s9513_s5 + $0x90] sm:$0xff]  }
 0x410   : > { %v6579_v49 = vpop.f32.mrf.mxu0 }
 0x411   : > { %v7050_v49 = vld [vmem:[%s9513_s5 + $0xb0] sm:$0xff]  }
 0x412   : > { %v3630_v58 = vpop.f32.mrf.mxu0 }
 0x413   : > { %v7051_v58 = vld [vmem:[%s9513_s5 + $0xa8] sm:$0xff]  }
 0x414   : > { %v6580_v61 = vpop.f32.mrf.mxu0  ;;  %v3748_v62 = vpop.f32.mrf.mxu1 }
 0x415   : > { %v7052_v61 = vld [vmem:[%s9513_s5 + $0xa0] sm:$0xff]  }
 0x416   : > { %v6633_v63 = vpop.f32.mrf.mxu1 }
 0x417   : > { %v7053_v63 = vld [vmem:[%s9515_s7 + $0x38] sm:$0xff]  }
 0x418   : > { %v3751_v18 = vpop.f32.mrf.mxu1 }
 0x419   : > { %v7054_v18 = vld [vmem:[%s9515_s7 + $0x30] sm:$0xff]  }
 0x41a   : > { %v6634_v45 = vpop.f32.mrf.mxu1 }
 0x41b   : > { %v7055_v45 = vld [vmem:[%s9515_s7 + $0x28] sm:$0xff]  }
 0x42a   : > { %v3707_v2 = vpop.f32.mrf.mxu0 }
 0x42b   : > { %v3713_v6 = vadd.f32 %v3707_v2, %v3668_v52  ;;  %v7049_v52 = vld [vmem:[%s9513_s5 + $0xb8] sm:$0xff]   ;;  %v7056_v2 = vld [vmem:[%s9515_s7 + $0x20] sm:$0xff]  }
 0x42c   : > { %v6615_v39 = vpop.f32.mrf.mxu0 }
 0x42d   : > { %v3754_v40 = vadd.f32 %v3748_v62, %v3713_v6  ;;  %v7057_v6 = vld [vmem:[%s9515_s7 + $0x18] sm:$0xff]   ;;  %v7058_v39 = vld [vmem:[%s9515_s7 + $0x10] sm:$0xff]  }
 0x42e   : > { %v3710_v22 = vpop.f32.mrf.mxu0 }
 0x42f   : > { %v7060_v22 = vld [vmem:[%s9515_s7] sm:$0xff]  }
 0x430   : > { %v6616_v28 = vpop.f32.mrf.mxu0  ;;  %v3836_v31 = vpop.f32.mrf.mxu1 }
 0x431   : > { %v7061_v28 = vld [vmem:[%s9517_s9 + $0x38] sm:$0xff]  }
 0x432   : > { %v6669_v32 = vpop.f32.mrf.mxu1 }
 0x433   : > { %v7063_v32 = vld [vmem:[%s9517_s9 + $0x28] sm:$0xff]  }
 0x434   : > { %v3839_v26 = vpop.f32.mrf.mxu1 }
 0x435   : > { %v7064_v26 = vld [vmem:[%s9517_s9 + $0x20] sm:$0xff]  }
 0x436   : > { %v6670_v44 = vpop.f32.mrf.mxu1 }
 0x437   : > { %v7065_v44 = vld [vmem:[%s9517_s9 + $0x18] sm:$0xff]  }
 0x446   : > { %v3794_v56 = vpop.f32.mrf.mxu0 }
 0x447   : > { %v3800_v27 = vadd.f32 %v3794_v56, %v3754_v40  ;;  %v7059_v40 = vld [vmem:[%s9515_s7 + $0x8] sm:$0xff]   ;;  %v7066_v56 = vld [vmem:[%s9517_s9 + $0x10] sm:$0xff]  }
 0x448   : > { %v6651_v48 = vpop.f32.mrf.mxu0 }
 0x449   : > { %v3801_v14 = vmax.f32 %v3592_v7, %v3800_v27  ;;  %v7039_v7 = vld [vmem:[%s9513_s5 + $0x70] sm:$0xff]  }
 0x44a   : > { %v3797_v35 = vpop.f32.mrf.mxu0 }
 0x44c   : > { %v6652_v57 = vpop.f32.mrf.mxu0  ;;  %v3916_v0 = vpop.f32.mrf.mxu1 }
 0x44e   : > { %v6705_v4 = vpop.f32.mrf.mxu1 }
 0x450   : > { %v3919_v8 = vpop.f32.mrf.mxu1 }
 0x452   : > { %v6706_v11 = vpop.f32.mrf.mxu1 }
 0x462   : > { %v3876_v33 = vpop.f32.mrf.mxu0 }
 0x463   : > { %v3877_v12 = vadd.f32 %v3876_v33, %v3836_v31  ;;  %v7062_v31 = vld [vmem:[%s9517_s9 + $0x30] sm:$0xff]  }
 0x464   : > { %v6687_v41 = vpop.f32.mrf.mxu0 }
 0x465   : > { %v3922_v13 = vadd.f32 %v3916_v0, %v3877_v12 }
 0x466   : > { %v3879_v42 = vpop.f32.mrf.mxu0 }
 0x468   : > { %v6688_v43 = vpop.f32.mrf.mxu0  ;;  %v3998_v34 = vpop.f32.mrf.mxu1 }
 0x46a   : > { %v6741_v50 = vpop.f32.mrf.mxu1 }
 0x46c   : > { %v4001_v10 = vpop.f32.mrf.mxu1 }
 0x46e   : > { %v6742_v51 = vpop.f32.mrf.mxu1 }
 0x47e   : > { %v3957_v19 = vpop.f32.mrf.mxu0 }
 0x47f   : > { %v3963_v24 = vadd.f32 %v3957_v19, %v3922_v13 }
 0x480   : > { %v6723_v29 = vpop.f32.mrf.mxu0 }
 0x481   : > { %v4004_v30 = vadd.f32 %v3998_v34, %v3963_v24  ;;  %v4444_v24 = vld [vmem:[%s9514_s6] sm:$0x1] }
 0x482   : > { %v3960_v54 = vpop.f32.mrf.mxu0 }
 0x483   : > { %v4005_v15 = vmax.f32 %v3801_v14, %v4004_v30 }
 0x484   : > { %v6724_v16 = vpop.f32.mrf.mxu0 }
 0x485   : > { %v4012_v59 = vadd.f32 %v5164_v38, %v4005_v15 }
 0x487   : > { %v4013_v60 = vmax.f32 %v4012_v59, 0.0 }
 0x489   : > { %v4014_v5 = vpack.c.bf16 %v4013_v60, %v4013_v60  ;;  %v7067_v60 = vld [vmem:[%s9517_s9 + $0x8] sm:$0xff]  }
 0x48b   : > { %v4037_v9 = vshrl.u32 %v4014_v5, 16  ;;  %6768 = vmatmul.mubr.msk.bf16.vlgmr.msra.gmra.mxu1 %vm4069_vm3, %v4014_v5  ;;  %v4197_v37 = vrot.slane %v4014_v5, 1  ;;  %v4369_v62 = vrot.slane %v4014_v5, 2  ;;  %v4464_v5 = vld [vmem:[%s9516_s8] sm:$0x1] }
 0x48c   : > { %6786 = vmatpush3.bf16.msra.mxu1 %v7038_v3  ;;  %6795 = vmatprep.mubr.msk.bf16.mxu1 %vm7195_vm0, %v7194_v1  ;;  %v7068_v3 = vld [vmem:[%s9517_s9] sm:$0xff]  }
 0x48d   : > { %6754 = vmatmul.mubr.msk.bf16.vlgmr.msra.gmra.mxu0 %vm4069_vm3, %v4037_v9  ;;  %6787 = vmatprep.subr.bf16.mxu1 %v7194_v1  ;;  %v4283_v55 = vrot.slane %v4037_v9, 1 }
 0x48e   : > { %6772 = vmatpush3.bf16.msra.mxu0 %v7039_v7  ;;  %6781 = vmatprep.mubr.msk.bf16.mxu0 %vm7195_vm0, %v7194_v1 }
 0x48f   : > { %6773 = vmatprep.subr.bf16.mxu0 %v7194_v1 }
 0x490   : > { %6788 = vmatpush3.bf16.msra.mxu1 %v7040_v53 }
 0x491   : > { %6789 = vmatprep.subr.bf16.mxu1 %v7194_v1 }
 0x492   : > { %6774 = vmatpush3.bf16.msra.mxu0 %v7041_v36 }
 0x493   : > { %6775 = vmatprep.subr.bf16.mxu0 %v7194_v1 }
 0x494   : > { %6790 = vmatpush3.bf16.msra.mxu1 %v7042_v47 }
 0x495   : > { %6791 = vmatprep.subr.bf16.mxu1 %v7194_v1 }
 0x496   : > { %6776 = vmatpush3.bf16.msra.mxu0 %v7043_v17 }
 0x497   : > { %6777 = vmatprep.subr.bf16.mxu0 %v7194_v1 }
 0x498   : > { %6792 = vmatpush3.bf16.msra.mxu1 %v7044_v20 }
 0x499   : > { %6793 = vmatprep.subr.bf16.mxu1 %v7194_v1 }
 0x49a   : > { %6778 = vmatpush3.bf16.msra.mxu0 %v7045_v21 }
 0x49b   : > { %6779 = vmatprep.subr.bf16.mxu0 %v7194_v1 }
 0x49c   : > { %6794 = vmatpush3.bf16.msra.mxu1 %v7046_v23 }
 0x49d   : > { %6813 = vmatprep.subr.bf16.mxu1 %v7194_v1 }
 0x49e   : > { %6780 = vmatpush3.bf16.msra.mxu0 %v7047_v25 }
 0x49f   : > { %6796 = vmatmul.mubr.msk.bf16.vlgmr.msra.gmra.mxu1 %vm4069_vm3, %v4283_v55  ;;  %6799 = vmatprep.subr.bf16.mxu0 %v7194_v1 }
 0x4a0   : > { %6829 = vmatprep.mubr.msk.bf16.mxu1 %vm7195_vm0, %v7194_v1  ;;  %6814 = vmatpush3.bf16.msra.mxu1 %v7053_v63 }
 0x4a1   : > { %6782 = vmatmul.mubr.msk.bf16.vlgmr.msra.gmra.mxu0 %vm4069_vm3, %v4197_v37  ;;  %6815 = vmatprep.subr.bf16.mxu1 %v7194_v1 }
 0x4a2   : > { %6800 = vmatpush3.bf16.msra.mxu0 %v7048_v46  ;;  %6809 = vmatprep.mubr.msk.bf16.mxu0 %vm7195_vm0, %v7194_v1 }
 0x4a3   : > { %6801 = vmatprep.subr.bf16.mxu0 %v7194_v1 }
 0x4a4   : > { %6816 = vmatpush3.bf16.msra.mxu1 %v7054_v18 }
 0x4a5   : > { %6817 = vmatprep.subr.bf16.mxu1 %v7194_v1 }
 0x4a6   : > { %6802 = vmatpush3.bf16.msra.mxu0 %v7049_v52 }
 0x4a7   : > { %6803 = vmatprep.subr.bf16.mxu0 %v7194_v1 }
 0x4a8   : > { %6818 = vmatpush3.bf16.msra.mxu1 %v7055_v45 }
 0x4a9   : > { %6819 = vmatprep.subr.bf16.mxu1 %v7194_v1 }
 0x4aa   : > { %6804 = vmatpush3.bf16.msra.mxu0 %v7050_v49 }
 0x4ab   : > { %6805 = vmatprep.subr.bf16.mxu0 %v7194_v1 }
 0x4ac   : > { %6820 = vmatpush3.bf16.msra.mxu1 %v7056_v2 }
 0x4ad   : > { %6821 = vmatprep.subr.bf16.mxu1 %v7194_v1 }
 0x4ae   : > { %6806 = vmatpush3.bf16.msra.mxu0 %v7051_v58 }
 0x4af   : > { %6807 = vmatprep.subr.bf16.mxu0 %v7194_v1 }
 0x4b0   : > { %6822 = vmatpush3.bf16.msra.mxu1 %v7057_v6 }
 0x4b1   : > { %6823 = vmatprep.subr.bf16.mxu1 %v7194_v1 }
 0x4b2   : > { %6808 = vmatpush3.bf16.msra.mxu0 %v7052_v61 }
 0x4b3   : > { %6833 = vmatprep.subr.bf16.mxu0 %v7194_v1 }
 0x4b4   : > { %6824 = vmatpush3.bf16.msra.mxu1 %v7058_v39 }
 0x4b5   : > { %6810 = vmatmul.mubr.msk.bf16.vlgmr.msra.gmra.mxu0 %vm4069_vm3, %v4369_v62  ;;  %6825 = vmatprep.subr.bf16.mxu1 %v7194_v1 }
 0x4b6   : > { %6849 = vmatprep.mubr.msk.bf16.mxu0 %vm7195_vm0, %v7194_v1  ;;  %6834 = vmatpush3.bf16.msra.mxu0 %v7061_v28 }
 0x4b7   : > { %6835 = vmatprep.subr.bf16.mxu0 %v7194_v1 }
 0x4b8   : > { %6826 = vmatpush3.bf16.msra.mxu1 %v7059_v40 }
 0x4b9   : > { %6827 = vmatprep.subr.bf16.mxu1 %v7194_v1 }
 0x4ba   : > { %6836 = vmatpush3.bf16.msra.mxu0 %v7062_v31 }
 0x4bb   : > { %6837 = vmatprep.subr.bf16.mxu0 %v7194_v1 }
 0x4bc   : > { %6828 = vmatpush3.bf16.msra.mxu1 %v7060_v22 }
 0x4be   : > { %6838 = vmatpush3.bf16.msra.mxu0 %v7063_v32 }
 0x4bf   : > { %6839 = vmatprep.subr.bf16.mxu0 %v7194_v1 }
 0x4c2   : > { %6840 = vmatpush3.bf16.msra.mxu0 %v7064_v26 }
 0x4c3   : > { %6841 = vmatprep.subr.bf16.mxu0 %v7194_v1 }
 0x4c6   : > { %6842 = vmatpush3.bf16.msra.mxu0 %v7065_v44 }
 0x4c7   : > { %6843 = vmatprep.subr.bf16.mxu0 %v7194_v1 }
 0x4ca   : > { %6844 = vmatpush3.bf16.msra.mxu0 %v7066_v56 }
 0x4cb   : > { %6845 = vmatprep.subr.bf16.mxu0 %v7194_v1 }
 0x4ce   : > { %6846 = vmatpush3.bf16.msra.mxu0 %v7067_v60 }
 0x4cf   : > { %6847 = vmatprep.subr.bf16.mxu0 %v7194_v1  ;;  %v4571_v1 = vld [vmem:[%s9518_s10] sm:$0x1] }
 0x4d2   : > { %6848 = vmatpush3.bf16.msra.mxu0 %v7068_v3 }
 0x54b   : > { %v4179_v27 = vpop.f32.mrf.mxu1 }
 0x54d   : > { %v4107_v48 = vpop.f32.mrf.mxu0  ;;  %v6769_v14 = vpop.f32.mrf.mxu1 }
 0x54e   : > { %v4180_v51 = vadd.f32 %v4179_v27, %v4107_v48 }
 0x54f   : > { %v6755_v35 = vpop.f32.mrf.mxu0  ;;  %v4182_v57 = vpop.f32.mrf.mxu1 }
 0x551   : > { %v4110_v0 = vpop.f32.mrf.mxu0  ;;  %v6770_v4 = vpop.f32.mrf.mxu1 }
 0x553   : > { %v6756_v8 = vpop.f32.mrf.mxu0 }
 0x55f   : > { %v4351_v11 = vpop.f32.mrf.mxu1 }
 0x561   : > { %v4265_v33 = vpop.f32.mrf.mxu0  ;;  %v6797_v41 = vpop.f32.mrf.mxu1 }
 0x562   : > { %v4271_v12 = vadd.f32 %v4265_v33, %v4180_v51 }
 0x563   : > { %v6783_v42 = vpop.f32.mrf.mxu0  ;;  %v4354_v43 = vpop.f32.mrf.mxu1 }
 0x564   : > { %v4357_v13 = vadd.f32 %v4351_v11, %v4271_v12 }
 0x565   : > { %v4268_v34 = vpop.f32.mrf.mxu0  ;;  %v6798_v50 = vpop.f32.mrf.mxu1 }
 0x567   : > { %v6784_v10 = vpop.f32.mrf.mxu0 }
 0x575   : > { %v4437_v19 = vpop.f32.mrf.mxu0 }
 0x576   : > { %v4443_v29 = vadd.f32 %v4437_v19, %v4357_v13 }
 0x577   : > { %v6811_v30 = vpop.f32.mrf.mxu0 }
 0x578   : > { %v4445_v38 = vadd.f32 %v4444_v24, %v4443_v29 }
 0x579   : > { %v4440_v54 = vpop.f32.mrf.mxu0 }
 0x57a   : > { %v4446_v15 = vmax.f32 %v4445_v38, 0.0 }
 0x57b   : > { %v6812_v16 = vpop.f32.mrf.mxu0 }
 0x57c   : > { %v4447_v59 = vpack.c.bf16 %v4446_v15, %v4446_v15 }
 0x57e   : > { %6830 = vmatmul.mubr.bf16.vlgmr.msra.gmra.mxu1 %v4447_v59 }
 0x63e   : > { %v4547_v7 = vpop.f32.mrf.mxu1 }
 0x63f   : > { %v4548_v9 = vadd.f32 %v4547_v7, %v4464_v5 }
 0x640   : > { %v6831_v53 = vpop.f32.mrf.mxu1 }
 0x641   : > { %v4553_v36 = vmax.f32 %v4548_v9, 0.0 }
 0x642   : > { %v4550_v47 = vpop.f32.mrf.mxu1 }
 0x643   : > { %v4554_v17 = vpack.c.bf16 %v4553_v36, %v4553_v36 }
 0x644   : > { %v6832_v20 = vpop.f32.mrf.mxu1 }
 0x645   : > { %6850 = vmatmul.mubr.bf16.vlgmr.msra.gmra.mxu0 %v4554_v17 }
 0x705   : > { %v4654_v21 = vpop.f32.mrf.mxu0 }
 0x706   : > { %v4655_v23 = vadd.f32 %v4654_v21, %v4571_v1 }
 0x707   : > { %v6851_v25 = vpop.f32.mrf.mxu0 }
 0x708   : > { %4660 = vst [vmem:[%s378_s24] sm:$0x1] %v4655_v23 }
 0x709   : > { %v4657_v55 = vpop.f32.mrf.mxu0 }
 0x70a   : > { %7145 = shalt.err (!%p7142_p3)
}
 0x70b   : > { %s7146_s22 = scalar_lea.hbm %s9467_s26, 16  ;;  %s7150_s29 = scalar_lea.hbm %s9519_s11, 32 }
 0x70c   : > { %p7147_p4 = scmp.ne.s32.totalorder %s9467_s26, %s7146_s22  ;;  %p7151_p9 = scmp.lt.s32.totalorder %s9467_s26, %s9519_s11 }
 0x70d   : > { %p7152_p10 = scmp.lt.s32.totalorder %s7150_s29, %s7146_s22 }
 0x70e   : > { %p7148_p7 = pnand %p7147_p4, %p7295_p5 }
 0x70f   : > { %p7153_p11 = por %p7152_p10, %p7151_p9 }
 0x710   : > { %p7149_p8 = pneg %p7148_p7 }
 0x712   : > { %p7154_p12 = pnand %p7153_p11, %p7149_p8 }
 0x714   : > { %7157 = shalt.err (!%p7154_p12)
}
 0x715   : > { %6853 = dma.vmem_to_hbm [thread:$0]  (%p7295_p5), %s9469_s25, 16, %s9467_s26, %s4662_s12   ;;  %v6852_v46 = vpop.f32.mrf.mxu0 }
 0x716 PF: > { %p6859_p13 = scmp.ge.s32.totalorder %s7192_s20, 2  ;;  %s4686_s13 = sand.u32 1, %s7180_s17  }
 0x717   : > { %s4687_s16 = scalar_lea.sflag [#allocation3], %s4686_s13 }
 0x718   : > { %p6856_p0 = pnand %p6859_p13, %p7299_p6 }
 0x71a   : > { %p6857_p1 = pneg %p6856_p0 }
 0x71c   : > { %7175 = dma.done.wait (%p6857_p1), %s4687_s16, 16  }
 0x71d   : > { %7177 = vsyncadd (%p6857_p1), %s4687_s16, 4294967280  ;;  %s9578_s27 = sld [smem:[#allocation5_spill]]  ;;  %p21_p2 = scmp.ge.s32.totalorder %s7282_s23, 4  }
 0x71e   : > { %s9579_s17 = smov %s7184_s18  ;;  %s9580_s18 = smov %s7188_s19 }
 0x71f   : > { %s9582_s20 = smov %s7282_s23  ;;  %23 = sbr.rel (!%p21_p2) target bundleno = 3 (0x3), region = 121 }
 0x723   : > { %s9581_s19 = smov %s9578_s27 }
 0x724   :  { %4691 = vsyncpa [#allocation3], 1 }
 0x725   :  { %4693 = vsyncpa [#allocation3 + $0x1], 1 }

</bundles_post_ra>
